<compile_context>
chip_gen: v5e
topology: v5e:2x2
jax: 0.10.0
libtpu: 0.0.40
codegen_flags: <defaults>
</compile_context>

<pallas_src>
import functools

import jax
import jax.numpy as jnp
from jax import lax
from jax.experimental import pallas as pl
from jax.experimental.pallas import tpu as pltpu


def _round_up(n, m):
    return ((n + m - 1) // m) * m


def _vmem_capacity_bytes():
    try:
        cap = int(getattr(pltpu.get_tpu_info(), "vmem_capacity_bytes", 0))
        if cap > 0:
            return cap
    except Exception:
        pass
    return 64 << 20  # v7x per-TensorCore VMEM: the most restrictive target


def _select_tiles(Cpad, H, Wps, K, EXTRA, x_itemsize, out_itemsize):
    """Pick (lane tile LT, sub-chunk SUB, block rows TR) under a VMEM budget."""
    capacity = _vmem_capacity_bytes()
    budget = max(capacity - (16 << 20), 24 << 20)   # headroom for Mosaic internals
    ACC_ELEMS = 8 * 1024        # ~8 f32 vregs of accumulator per register-resident sub-chunk
    TARGET_ELEMS = 512 * 1024   # ~2 MiB f32 per output block: amortizes grid-step overhead

    cands = [lt for lt in (512, 256, 128) if Cpad % lt == 0]
    # Prefer lane tiles that leave >= 2 steps on the lane axis (v7x megacore sharding),
    # then larger tiles (fewer, bigger steps).
    cands.sort(key=lambda lt: (Cpad // lt < 2, -lt))

    def sizes(LT, tr):
        R_out_pad = _round_up(H * Wps, tr)
        R_in = R_out_pad + (K - 1) * Wps + EXTRA
        need = (2 * R_in * LT * x_itemsize          # double-buffered resident slab
                + 2 * tr * LT * out_itemsize        # double-buffered output block
                + 2 * (K * K + 1) * LT * 4)         # weights + bias
        return R_out_pad, R_in, need

    for LT in cands:
        SUB = max(8, ACC_ELEMS // LT)
        tr = min(_round_up(H * Wps, SUB),
                 max(SUB, (TARGET_ELEMS // LT) // SUB * SUB))
        while True:
            R_out_pad, R_in, need = sizes(LT, tr)
            if need <= budget:
                return LT, SUB, tr, R_out_pad, R_in, need, capacity
            if tr <= SUB:
                break
            tr = max(SUB, (tr // 2) // SUB * SUB)

    # TODO(synk): feature maps whose padded plane cannot fit VMEM even at LT=128
    # need spatial tiling with manual halo DMA; fall through with the smallest config.
    LT = cands[-1]
    SUB = max(8, ACC_ELEMS // LT)
    R_out_pad, R_in, need = sizes(LT, SUB)
    return LT, SUB, SUB, R_out_pad, R_in, need, capacity


# ----------------------------- Pallas kernel -------------------------------- #
def _dyn_dw_conv_kernel(x_ref, w_ref, b_ref, o_ref, *,
                        K, Wps, SUB, n_sub, EXTRA, hoist_w):
    """Shift-and-accumulate depthwise conv on a channels-last flattened slab.

    x_ref : (R_in, LT)  VMEM  zero-padded input; rows = flattened (Hp, Wps),
                              lanes = folded (b*C + c) channels (lane-dense).
    w_ref : (K*K, LT)   VMEM  per-lane dynamic kernel taps (f32).
    b_ref : (1, LT)     VMEM  per-lane bias (f32).
    o_ref : (TR, LT)    VMEM  one row-chunk of the flattened (H, Wps) output.
    """
    LT = o_ref.shape[1]
    TR = SUB * n_sub
    r = pl.program_id(1)
    base = pl.multiple_of(r * TR, 8)               # TR is a multiple of 8

    bias_row = b_ref[...]                          # (1, LT) f32
    if hoist_w:
        w_all = w_ref[...]                         # (K*K, LT) f32, a few vregs

    def compute_sub(s):
        sub0 = s * SUB
        if not isinstance(sub0, int):              # dynamic (fori) path: hint alignment
            sub0 = pl.multiple_of(sub0, 8)
        acc = jnp.zeros((SUB, LT), jnp.float32)
        for i in range(K):                         # K*K taps: static, unrolled
            # ONE aligned (SUB+EXTRA)-row load per i, reused by all K j-taps.
            row0 = pl.multiple_of(base + sub0 + i * Wps, 8)
            win = x_ref[pl.ds(row0, SUB + EXTRA), :]
            for j in range(K):
                tap = i * K + j
                wrow = (w_all[tap:tap + 1, :] if hoist_w
                        else w_ref[pl.ds(tap, 1), :])
                # static value slice (cheap sublane shift), f32 accumulate
                acc = acc + wrow * win[j:j + SUB, :]
        o_ref[pl.ds(sub0, SUB), :] = (acc + bias_row).astype(o_ref.dtype)

    if n_sub <= 8:                                 # short: full static unroll
        for s in range(n_sub):
            compute_sub(s)
    else:
        def body(s, carry):
            compute_sub(s)
            return carry
        lax.fori_loop(0, n_sub, body, 0, unroll=2)


def dynamic_depthwise_conv2d_pallas(x, dyn_weight, bias, kernel_size, stride=1,
                                    compute_dtype=None):
    """x: (B, C, H, W); dyn_weight: (B, C, K, K); bias: (C,) -> (B, C, H, W).

    compute_dtype: optionally cast the input slab (e.g. jnp.bfloat16 on v6e/v7x)
    to halve resident VMEM / vld bytes; weights and accumulation stay f32.
    Leave None on v5e (no bf16 VALU) or when exact f32 numerics are required.
    """
    assert stride == 1  # TODO(synk): stride > 1 (allowed by the torch module) not implemented
    K = kernel_size
    assert K % 2 == 1, "only odd kernel_size gives 'same' output (torch uses padding=K//2)"
    B, C, H, W = x.shape
    p = K // 2
    Hp = H + 2 * p
    Wps = _round_up(W + 2 * p, 8)       # sublane-aligned padded width -> aligned tap rows
    BC = B * C
    Cpad = _round_up(BC, 128)           # lane-dense folded (b*C + c) axis
    # TODO(synk): for small B*C most of each lane is zero padding; folding image rows
    # into the lane axis would avoid that waste but needs a different shift scheme.
    EXTRA = _round_up(max(K - 1, 1), 8)

    x_comp = x if compute_dtype is None else x.astype(compute_dtype)
    xi = jnp.dtype(x_comp.dtype).itemsize
    oi = jnp.dtype(x.dtype).itemsize

    LT, SUB, TR, R_out_pad, R_in, need, capacity = _select_tiles(
        Cpad, H, Wps, K, EXTRA, xi, oi)
    n_sub = TR // SUB
    vmem_limit = int(min(max(need + (8 << 20), 32 << 20),
                         max(capacity - (4 << 20), 32 << 20)))
    hoist_w = ((K * K + 7) // 8) * (LT // 128) <= 16   # keep hoisted taps <= 16 vregs

    # ---- channels-last, lane-dense layout prep (layout plumbing; XLA fuses) ----
    xt = jnp.transpose(x_comp, (2, 3, 0, 1)).reshape(H, W, BC)      # (H, W, b*C+c)
    xt = jnp.pad(xt, ((p, p), (p, Wps - W - p), (0, Cpad - BC)))    # (Hp, Wps, Cpad)
    xf = xt.reshape(Hp * Wps, Cpad)
    xf = jnp.pad(xf, ((0, R_in - Hp * Wps), (0, 0)))                # (R_in, Cpad)

    wf = jnp.pad(jnp.transpose(dyn_weight.reshape(BC, K * K)).astype(jnp.float32),
                 ((0, 0), (0, Cpad - BC)))                          # (K*K, Cpad) f32
    bf = jnp.pad(jnp.tile(bias.astype(jnp.float32), B),
                 (0, Cpad - BC)).reshape(1, Cpad)                   # (1, Cpad) f32

    kernel = functools.partial(_dyn_dw_conv_kernel, K=K, Wps=Wps, SUB=SUB,
                               n_sub=n_sub, EXTRA=EXTRA, hoist_w=hoist_w)
    grid = (Cpad // LT, R_out_pad // TR)          # lane tiles outer, row chunks inner
    cost = pl.CostEstimate(
        flops=2 * K * K * R_out_pad * Cpad,
        transcendentals=0,
        bytes_accessed=R_in * Cpad * xi + R_out_pad * Cpad * oi + (K * K + 1) * Cpad * 4)

    out_flat = pl.pallas_call(
        kernel,
        out_shape=jax.ShapeDtypeStruct((R_out_pad, Cpad), x.dtype),
        grid=grid,
        in_specs=[
            # whole padded plane per lane tile; block index constant across r -> resident slab
            pl.BlockSpec((R_in, LT), lambda c, r: (0, c)),
            pl.BlockSpec((K * K, LT), lambda c, r: (0, c)),
            pl.BlockSpec((1, LT), lambda c, r: (0, c)),
        ],
        out_specs=pl.BlockSpec((TR, LT), lambda c, r: (r, c)),
        compiler_params=pltpu.CompilerParams(
            dimension_semantics=("parallel", "parallel"),
            vmem_limit_bytes=vmem_limit),
        cost_estimate=cost,
    )(xf, wf, bf)

    out = out_flat[:H * Wps].reshape(H, Wps, Cpad)[:, :W, :BC].reshape(H, W, B, C)
    return jnp.transpose(out, (2, 3, 0, 1))


# ------------------------- weight generator (glue) -------------------------- #
def adaptive_weight_module(x, params, K):
    """AdaptiveWeightModule.forward: (B, C, H, W) -> (B, C, K, K) dyn kernels."""
    B, C, _, _ = x.shape
    pooled = jnp.mean(x, axis=(2, 3))                              # AdaptiveAvgPool2d((1,1))
    z = jnp.maximum(pooled @ params["w1"].T + params["b1"], 0.0)   # relu(conv1 1x1)
    # LayerNorm, data_format='channels_first' -> normalize over channel axis
    u = jnp.mean(z, axis=1, keepdims=True)
    s = jnp.mean((z - u) ** 2, axis=1, keepdims=True)
    z = (z - u) / jnp.sqrt(s + 1e-6)
    z = z * params["ln_g"] + params["ln_b"]
    z = jnp.maximum(z @ params["w2"].T + params["b2"], 0.0)        # relu(conv2 1x1)
    return z.reshape(B, C, K, K)                                   # view(B*C, 1, K, K)


def dynamic_depthwise_conv2d(x, params, bias, kernel_size, stride=1, compute_dtype=None):
    dyn_w = adaptive_weight_module(x, params, kernel_size)
    return dynamic_depthwise_conv2d_pallas(x, dyn_w, bias, kernel_size, stride,
                                           compute_dtype=compute_dtype)


# ---------------------------------- main ------------------------------------ #
if __name__ == "__main__":
    B, C, H, W, K = 2, 8, 16, 16, 3
    Cr = C // 4

    key = jax.random.PRNGKey(0)
    k1, k2, k3, k4, k5, k6, k7, k8 = jax.random.split(key, 8)
    x = jax.random.normal(k1, (B, C, H, W), jnp.float32)
    params = {
        "w1": 0.1 * jax.random.normal(k2, (Cr, C), jnp.float32),          # conv1 (1x1)
        "b1": 0.1 * jax.random.normal(k3, (Cr,), jnp.float32),
        "ln_g": 1.0 + 0.1 * jax.random.normal(k4, (Cr,), jnp.float32),    # LayerNorm weight
        "ln_b": 0.1 * jax.random.normal(k5, (Cr,), jnp.float32),          # LayerNorm bias
        "w2": 0.1 * jax.random.normal(k6, (C * K * K, Cr), jnp.float32),  # conv2 (1x1)
        "b2": 0.1 * jax.random.normal(k7, (C * K * K,), jnp.float32),
    }
    bias = 0.1 * jax.random.normal(k8, (C,), jnp.float32)                 # depthwise bias

    out = dynamic_depthwise_conv2d(x, params, bias, K, stride=1)
    out = jax.block_until_ready(out)

    # Pure-JAX reference mirroring F.conv2d(x.reshape(1,-1,H,W), w, bias.repeat(B),
    #                                       stride=1, padding=K//2, groups=B*C)
    dyn_w = adaptive_weight_module(x, params, K)
    ref = lax.conv_general_dilated(
        x.reshape(1, B * C, H, W),
        dyn_w.reshape(B * C, 1, K, K),
        window_strides=(1, 1),
        padding=((K // 2, K // 2), (K // 2, K // 2)),
        dimension_numbers=("NCHW", "OIHW", "NCHW"),
        feature_group_count=B * C,
    ).reshape(B, C, H, W) + bias[None, :, None, None]

    assert out.shape == (B, C, H, W)
    assert jnp.allclose(out, ref, atol=2e-4, rtol=2e-4), float(jnp.max(jnp.abs(out - ref)))
    print("KERNEL_OK")
</pallas_src>

<mosaic_0001>
module attributes {stable_mosaic.version = 11 : i64} {
  func.func @_dyn_dw_conv_kernel(%arg0: i32, %arg1: i32, %arg2: memref<440x128xf32, #tpu.memory_space<vmem>>, %arg3: memref<9x128xf32, #tpu.memory_space<vmem>>, %arg4: memref<1x128xf32, #tpu.memory_space<vmem>>, %arg5: memref<384x128xf32, #tpu.memory_space<vmem>>) attributes {dimension_semantics = [#tpu.dimension_semantics<parallel>, #tpu.dimension_semantics<parallel>], iteration_bounds = array<i64: 1, 1>, scalar_prefetch = 0 : i64, scratch_operands = 0 : i64, tpu.core_type = #tpu.core_type<tc>, window_params = [{transform_indices = @transform_0, window_bounds = array<i64: 440, 128>}, {transform_indices = @transform_1, window_bounds = array<i64: 9, 128>}, {transform_indices = @transform_2, window_bounds = array<i64: 1, 128>}, {transform_indices = @transform_3, window_bounds = array<i64: 384, 128>}]} {
    %c384_i32 = arith.constant 384 : i32
    %0 = arith.muli %arg1, %c384_i32 : i32
    %1 = tpu.assume_multiple %0, 8 : i32
    %c0 = arith.constant 0 : index
    %c0_0 = arith.constant 0 : index
    %2 = vector.load %arg4[%c0, %c0_0] : memref<1x128xf32, #tpu.memory_space<vmem>>, vector<1x128xf32>
    %c0_1 = arith.constant 0 : index
    %c0_2 = arith.constant 0 : index
    %3 = vector.load %arg3[%c0_1, %c0_2] : memref<9x128xf32, #tpu.memory_space<vmem>>, vector<9x128xf32>
    %cst = arith.constant 0.000000e+00 : f32
    %4 = vector.broadcast %cst : f32 to vector<64x128xf32>
    %c0_i32 = arith.constant 0 : i32
    %5 = arith.addi %1, %c0_i32 : i32
    %c0_i32_3 = arith.constant 0 : i32
    %6 = arith.addi %5, %c0_i32_3 : i32
    %7 = tpu.assume_multiple %6, 8 : i32
    %8 = arith.index_cast %7 : i32 to index
    %c0_4 = arith.constant 0 : index
    %9 = vector.load %arg2[%8, %c0_4] : memref<440x128xf32, #tpu.memory_space<vmem>>, vector<72x128xf32>
    %10 = vector.extract_strided_slice %3 {offsets = [0, 0], sizes = [1, 128], strides = [1, 1]} : vector<9x128xf32> to vector<1x128xf32>
    %11 = vector.extract_strided_slice %9 {offsets = [0, 0], sizes = [64, 128], strides = [1, 1]} : vector<72x128xf32> to vector<64x128xf32>
    %12 = vector.broadcast %10 : vector<1x128xf32> to vector<64x128xf32>
    %13 = arith.mulf %12, %11 : vector<64x128xf32>
    %14 = arith.addf %4, %13 : vector<64x128xf32>
    %15 = vector.extract_strided_slice %3 {offsets = [1, 0], sizes = [1, 128], strides = [1, 1]} : vector<9x128xf32> to vector<1x128xf32>
    %16 = vector.extract_strided_slice %9 {offsets = [1, 0], sizes = [64, 128], strides = [1, 1]} : vector<72x128xf32> to vector<64x128xf32>
    %17 = vector.broadcast %15 : vector<1x128xf32> to vector<64x128xf32>
    %18 = arith.mulf %17, %16 : vector<64x128xf32>
    %19 = arith.addf %14, %18 : vector<64x128xf32>
    %20 = vector.extract_strided_slice %3 {offsets = [2, 0], sizes = [1, 128], strides = [1, 1]} : vector<9x128xf32> to vector<1x128xf32>
    %21 = vector.extract_strided_slice %9 {offsets = [2, 0], sizes = [64, 128], strides = [1, 1]} : vector<72x128xf32> to vector<64x128xf32>
    %22 = vector.broadcast %20 : vector<1x128xf32> to vector<64x128xf32>
    %23 = arith.mulf %22, %21 : vector<64x128xf32>
    %24 = arith.addf %19, %23 : vector<64x128xf32>
    %c0_i32_5 = arith.constant 0 : i32
    %25 = arith.addi %1, %c0_i32_5 : i32
    %c24_i32 = arith.constant 24 : i32
    %26 = arith.addi %25, %c24_i32 : i32
    %27 = tpu.assume_multiple %26, 8 : i32
    %28 = arith.index_cast %27 : i32 to index
    %c0_6 = arith.constant 0 : index
    %29 = vector.load %arg2[%28, %c0_6] : memref<440x128xf32, #tpu.memory_space<vmem>>, vector<72x128xf32>
    %30 = vector.extract_strided_slice %3 {offsets = [3, 0], sizes = [1, 128], strides = [1, 1]} : vector<9x128xf32> to vector<1x128xf32>
    %31 = vector.extract_strided_slice %29 {offsets = [0, 0], sizes = [64, 128], strides = [1, 1]} : vector<72x128xf32> to vector<64x128xf32>
    %32 = vector.broadcast %30 : vector<1x128xf32> to vector<64x128xf32>
    %33 = arith.mulf %32, %31 : vector<64x128xf32>
    %34 = arith.addf %24, %33 : vector<64x128xf32>
    %35 = vector.extract_strided_slice %3 {offsets = [4, 0], sizes = [1, 128], strides = [1, 1]} : vector<9x128xf32> to vector<1x128xf32>
    %36 = vector.extract_strided_slice %29 {offsets = [1, 0], sizes = [64, 128], strides = [1, 1]} : vector<72x128xf32> to vector<64x128xf32>
    %37 = vector.broadcast %35 : vector<1x128xf32> to vector<64x128xf32>
    %38 = arith.mulf %37, %36 : vector<64x128xf32>
    %39 = arith.addf %34, %38 : vector<64x128xf32>
    %40 = vector.extract_strided_slice %3 {offsets = [5, 0], sizes = [1, 128], strides = [1, 1]} : vector<9x128xf32> to vector<1x128xf32>
    %41 = vector.extract_strided_slice %29 {offsets = [2, 0], sizes = [64, 128], strides = [1, 1]} : vector<72x128xf32> to vector<64x128xf32>
    %42 = vector.broadcast %40 : vector<1x128xf32> to vector<64x128xf32>
    %43 = arith.mulf %42, %41 : vector<64x128xf32>
    %44 = arith.addf %39, %43 : vector<64x128xf32>
    %c0_i32_7 = arith.constant 0 : i32
    %45 = arith.addi %1, %c0_i32_7 : i32
    %c48_i32 = arith.constant 48 : i32
    %46 = arith.addi %45, %c48_i32 : i32
    %47 = tpu.assume_multiple %46, 8 : i32
    %48 = arith.index_cast %47 : i32 to index
    %c0_8 = arith.constant 0 : index
    %49 = vector.load %arg2[%48, %c0_8] : memref<440x128xf32, #tpu.memory_space<vmem>>, vector<72x128xf32>
    %50 = vector.extract_strided_slice %3 {offsets = [6, 0], sizes = [1, 128], strides = [1, 1]} : vector<9x128xf32> to vector<1x128xf32>
    %51 = vector.extract_strided_slice %49 {offsets = [0, 0], sizes = [64, 128], strides = [1, 1]} : vector<72x128xf32> to vector<64x128xf32>
    %52 = vector.broadcast %50 : vector<1x128xf32> to vector<64x128xf32>
    %53 = arith.mulf %52, %51 : vector<64x128xf32>
    %54 = arith.addf %44, %53 : vector<64x128xf32>
    %55 = vector.extract_strided_slice %3 {offsets = [7, 0], sizes = [1, 128], strides = [1, 1]} : vector<9x128xf32> to vector<1x128xf32>
    %56 = vector.extract_strided_slice %49 {offsets = [1, 0], sizes = [64, 128], strides = [1, 1]} : vector<72x128xf32> to vector<64x128xf32>
    %57 = vector.broadcast %55 : vector<1x128xf32> to vector<64x128xf32>
    %58 = arith.mulf %57, %56 : vector<64x128xf32>
    %59 = arith.addf %54, %58 : vector<64x128xf32>
    %60 = vector.extract_strided_slice %3 {offsets = [8, 0], sizes = [1, 128], strides = [1, 1]} : vector<9x128xf32> to vector<1x128xf32>
    %61 = vector.extract_strided_slice %49 {offsets = [2, 0], sizes = [64, 128], strides = [1, 1]} : vector<72x128xf32> to vector<64x128xf32>
    %62 = vector.broadcast %60 : vector<1x128xf32> to vector<64x128xf32>
    %63 = arith.mulf %62, %61 : vector<64x128xf32>
    %64 = arith.addf %59, %63 : vector<64x128xf32>
    %65 = vector.broadcast %2 : vector<1x128xf32> to vector<64x128xf32>
    %66 = arith.addf %64, %65 : vector<64x128xf32>
    %c0_9 = arith.constant 0 : index
    %c0_10 = arith.constant 0 : index
    %67 = vector.load %arg5[%c0_9, %c0_10] : memref<384x128xf32, #tpu.memory_space<vmem>>, vector<64x128xf32>
    tpu.vector_store %arg5[%c0_9, %c0_10], %66 {strides = array<i32>} : memref<384x128xf32, #tpu.memory_space<vmem>>, vector<64x128xf32>,
    %cst_11 = arith.constant 0.000000e+00 : f32
    %68 = vector.broadcast %cst_11 : f32 to vector<64x128xf32>
    %c64_i32 = arith.constant 64 : i32
    %69 = arith.addi %1, %c64_i32 : i32
    %c0_i32_12 = arith.constant 0 : i32
    %70 = arith.addi %69, %c0_i32_12 : i32
    %71 = tpu.assume_multiple %70, 8 : i32
    %72 = arith.index_cast %71 : i32 to index
    %c0_13 = arith.constant 0 : index
    %73 = vector.load %arg2[%72, %c0_13] : memref<440x128xf32, #tpu.memory_space<vmem>>, vector<72x128xf32>
    %74 = vector.extract_strided_slice %3 {offsets = [0, 0], sizes = [1, 128], strides = [1, 1]} : vector<9x128xf32> to vector<1x128xf32>
    %75 = vector.extract_strided_slice %73 {offsets = [0, 0], sizes = [64, 128], strides = [1, 1]} : vector<72x128xf32> to vector<64x128xf32>
    %76 = vector.broadcast %74 : vector<1x128xf32> to vector<64x128xf32>
    %77 = arith.mulf %76, %75 : vector<64x128xf32>
    %78 = arith.addf %68, %77 : vector<64x128xf32>
    %79 = vector.extract_strided_slice %3 {offsets = [1, 0], sizes = [1, 128], strides = [1, 1]} : vector<9x128xf32> to vector<1x128xf32>
    %80 = vector.extract_strided_slice %73 {offsets = [1, 0], sizes = [64, 128], strides = [1, 1]} : vector<72x128xf32> to vector<64x128xf32>
    %81 = vector.broadcast %79 : vector<1x128xf32> to vector<64x128xf32>
    %82 = arith.mulf %81, %80 : vector<64x128xf32>
    %83 = arith.addf %78, %82 : vector<64x128xf32>
    %84 = vector.extract_strided_slice %3 {offsets = [2, 0], sizes = [1, 128], strides = [1, 1]} : vector<9x128xf32> to vector<1x128xf32>
    %85 = vector.extract_strided_slice %73 {offsets = [2, 0], sizes = [64, 128], strides = [1, 1]} : vector<72x128xf32> to vector<64x128xf32>
    %86 = vector.broadcast %84 : vector<1x128xf32> to vector<64x128xf32>
    %87 = arith.mulf %86, %85 : vector<64x128xf32>
    %88 = arith.addf %83, %87 : vector<64x128xf32>
    %c64_i32_14 = arith.constant 64 : i32
    %89 = arith.addi %1, %c64_i32_14 : i32
    %c24_i32_15 = arith.constant 24 : i32
    %90 = arith.addi %89, %c24_i32_15 : i32
    %91 = tpu.assume_multiple %90, 8 : i32
    %92 = arith.index_cast %91 : i32 to index
    %c0_16 = arith.constant 0 : index
    %93 = vector.load %arg2[%92, %c0_16] : memref<440x128xf32, #tpu.memory_space<vmem>>, vector<72x128xf32>
    %94 = vector.extract_strided_slice %3 {offsets = [3, 0], sizes = [1, 128], strides = [1, 1]} : vector<9x128xf32> to vector<1x128xf32>
    %95 = vector.extract_strided_slice %93 {offsets = [0, 0], sizes = [64, 128], strides = [1, 1]} : vector<72x128xf32> to vector<64x128xf32>
    %96 = vector.broadcast %94 : vector<1x128xf32> to vector<64x128xf32>
    %97 = arith.mulf %96, %95 : vector<64x128xf32>
    %98 = arith.addf %88, %97 : vector<64x128xf32>
    %99 = vector.extract_strided_slice %3 {offsets = [4, 0], sizes = [1, 128], strides = [1, 1]} : vector<9x128xf32> to vector<1x128xf32>
    %100 = vector.extract_strided_slice %93 {offsets = [1, 0], sizes = [64, 128], strides = [1, 1]} : vector<72x128xf32> to vector<64x128xf32>
    %101 = vector.broadcast %99 : vector<1x128xf32> to vector<64x128xf32>
    %102 = arith.mulf %101, %100 : vector<64x128xf32>
    %103 = arith.addf %98, %102 : vector<64x128xf32>
    %104 = vector.extract_strided_slice %3 {offsets = [5, 0], sizes = [1, 128], strides = [1, 1]} : vector<9x128xf32> to vector<1x128xf32>
    %105 = vector.extract_strided_slice %93 {offsets = [2, 0], sizes = [64, 128], strides = [1, 1]} : vector<72x128xf32> to vector<64x128xf32>
    %106 = vector.broadcast %104 : vector<1x128xf32> to vector<64x128xf32>
    %107 = arith.mulf %106, %105 : vector<64x128xf32>
    %108 = arith.addf %103, %107 : vector<64x128xf32>
    %c64_i32_17 = arith.constant 64 : i32
    %109 = arith.addi %1, %c64_i32_17 : i32
    %c48_i32_18 = arith.constant 48 : i32
    %110 = arith.addi %109, %c48_i32_18 : i32
    %111 = tpu.assume_multiple %110, 8 : i32
    %112 = arith.index_cast %111 : i32 to index
    %c0_19 = arith.constant 0 : index
    %113 = vector.load %arg2[%112, %c0_19] : memref<440x128xf32, #tpu.memory_space<vmem>>, vector<72x128xf32>
    %114 = vector.extract_strided_slice %3 {offsets = [6, 0], sizes = [1, 128], strides = [1, 1]} : vector<9x128xf32> to vector<1x128xf32>
    %115 = vector.extract_strided_slice %113 {offsets = [0, 0], sizes = [64, 128], strides = [1, 1]} : vector<72x128xf32> to vector<64x128xf32>
    %116 = vector.broadcast %114 : vector<1x128xf32> to vector<64x128xf32>
    %117 = arith.mulf %116, %115 : vector<64x128xf32>
    %118 = arith.addf %108, %117 : vector<64x128xf32>
    %119 = vector.extract_strided_slice %3 {offsets = [7, 0], sizes = [1, 128], strides = [1, 1]} : vector<9x128xf32> to vector<1x128xf32>
    %120 = vector.extract_strided_slice %113 {offsets = [1, 0], sizes = [64, 128], strides = [1, 1]} : vector<72x128xf32> to vector<64x128xf32>
    %121 = vector.broadcast %119 : vector<1x128xf32> to vector<64x128xf32>
    %122 = arith.mulf %121, %120 : vector<64x128xf32>
    %123 = arith.addf %118, %122 : vector<64x128xf32>
    %124 = vector.extract_strided_slice %3 {offsets = [8, 0], sizes = [1, 128], strides = [1, 1]} : vector<9x128xf32> to vector<1x128xf32>
    %125 = vector.extract_strided_slice %113 {offsets = [2, 0], sizes = [64, 128], strides = [1, 1]} : vector<72x128xf32> to vector<64x128xf32>
    %126 = vector.broadcast %124 : vector<1x128xf32> to vector<64x128xf32>
    %127 = arith.mulf %126, %125 : vector<64x128xf32>
    %128 = arith.addf %123, %127 : vector<64x128xf32>
    %129 = vector.broadcast %2 : vector<1x128xf32> to vector<64x128xf32>
    %130 = arith.addf %128, %129 : vector<64x128xf32>
    %c64 = arith.constant 64 : index
    %c0_20 = arith.constant 0 : index
    %131 = vector.load %arg5[%c64, %c0_20] : memref<384x128xf32, #tpu.memory_space<vmem>>, vector<64x128xf32>
    tpu.vector_store %arg5[%c64, %c0_20], %130 {strides = array<i32>} : memref<384x128xf32, #tpu.memory_space<vmem>>, vector<64x128xf32>,
    %cst_21 = arith.constant 0.000000e+00 : f32
    %132 = vector.broadcast %cst_21 : f32 to vector<64x128xf32>
    %c128_i32 = arith.constant 128 : i32
    %133 = arith.addi %1, %c128_i32 : i32
    %c0_i32_22 = arith.constant 0 : i32
    %134 = arith.addi %133, %c0_i32_22 : i32
    %135 = tpu.assume_multiple %134, 8 : i32
    %136 = arith.index_cast %135 : i32 to index
    %c0_23 = arith.constant 0 : index
    %137 = vector.load %arg2[%136, %c0_23] : memref<440x128xf32, #tpu.memory_space<vmem>>, vector<72x128xf32>
    %138 = vector.extract_strided_slice %3 {offsets = [0, 0], sizes = [1, 128], strides = [1, 1]} : vector<9x128xf32> to vector<1x128xf32>
    %139 = vector.extract_strided_slice %137 {offsets = [0, 0], sizes = [64, 128], strides = [1, 1]} : vector<72x128xf32> to vector<64x128xf32>
    %140 = vector.broadcast %138 : vector<1x128xf32> to vector<64x128xf32>
    %141 = arith.mulf %140, %139 : vector<64x128xf32>
    %142 = arith.addf %132, %141 : vector<64x128xf32>
    %143 = vector.extract_strided_slice %3 {offsets = [1, 0], sizes = [1, 128], strides = [1, 1]} : vector<9x128xf32> to vector<1x128xf32>
    %144 = vector.extract_strided_slice %137 {offsets = [1, 0], sizes = [64, 128], strides = [1, 1]} : vector<72x128xf32> to vector<64x128xf32>
    %145 = vector.broadcast %143 : vector<1x128xf32> to vector<64x128xf32>
    %146 = arith.mulf %145, %144 : vector<64x128xf32>
    %147 = arith.addf %142, %146 : vector<64x128xf32>
    %148 = vector.extract_strided_slice %3 {offsets = [2, 0], sizes = [1, 128], strides = [1, 1]} : vector<9x128xf32> to vector<1x128xf32>
    %149 = vector.extract_strided_slice %137 {offsets = [2, 0], sizes = [64, 128], strides = [1, 1]} : vector<72x128xf32> to vector<64x128xf32>
    %150 = vector.broadcast %148 : vector<1x128xf32> to vector<64x128xf32>
    %151 = arith.mulf %150, %149 : vector<64x128xf32>
    %152 = arith.addf %147, %151 : vector<64x128xf32>
    %c128_i32_24 = arith.constant 128 : i32
    %153 = arith.addi %1, %c128_i32_24 : i32
    %c24_i32_25 = arith.constant 24 : i32
    %154 = arith.addi %153, %c24_i32_25 : i32
    %155 = tpu.assume_multiple %154, 8 : i32
    %156 = arith.index_cast %155 : i32 to index
    %c0_26 = arith.constant 0 : index
    %157 = vector.load %arg2[%156, %c0_26] : memref<440x128xf32, #tpu.memory_space<vmem>>, vector<72x128xf32>
    %158 = vector.extract_strided_slice %3 {offsets = [3, 0], sizes = [1, 128], strides = [1, 1]} : vector<9x128xf32> to vector<1x128xf32>
    %159 = vector.extract_strided_slice %157 {offsets = [0, 0], sizes = [64, 128], strides = [1, 1]} : vector<72x128xf32> to vector<64x128xf32>
    %160 = vector.broadcast %158 : vector<1x128xf32> to vector<64x128xf32>
    %161 = arith.mulf %160, %159 : vector<64x128xf32>
    %162 = arith.addf %152, %161 : vector<64x128xf32>
    %163 = vector.extract_strided_slice %3 {offsets = [4, 0], sizes = [1, 128], strides = [1, 1]} : vector<9x128xf32> to vector<1x128xf32>
    %164 = vector.extract_strided_slice %157 {offsets = [1, 0], sizes = [64, 128], strides = [1, 1]} : vector<72x128xf32> to vector<64x128xf32>
    %165 = vector.broadcast %163 : vector<1x128xf32> to vector<64x128xf32>
    %166 = arith.mulf %165, %164 : vector<64x128xf32>
    %167 = arith.addf %162, %166 : vector<64x128xf32>
    %168 = vector.extract_strided_slice %3 {offsets = [5, 0], sizes = [1, 128], strides = [1, 1]} : vector<9x128xf32> to vector<1x128xf32>
    %169 = vector.extract_strided_slice %157 {offsets = [2, 0], sizes = [64, 128], strides = [1, 1]} : vector<72x128xf32> to vector<64x128xf32>
    %170 = vector.broadcast %168 : vector<1x128xf32> to vector<64x128xf32>
    %171 = arith.mulf %170, %169 : vector<64x128xf32>
    %172 = arith.addf %167, %171 : vector<64x128xf32>
    %c128_i32_27 = arith.constant 128 : i32
    %173 = arith.addi %1, %c128_i32_27 : i32
    %c48_i32_28 = arith.constant 48 : i32
    %174 = arith.addi %173, %c48_i32_28 : i32
    %175 = tpu.assume_multiple %174, 8 : i32
    %176 = arith.index_cast %175 : i32 to index
    %c0_29 = arith.constant 0 : index
    %177 = vector.load %arg2[%176, %c0_29] : memref<440x128xf32, #tpu.memory_space<vmem>>, vector<72x128xf32>
    %178 = vector.extract_strided_slice %3 {offsets = [6, 0], sizes = [1, 128], strides = [1, 1]} : vector<9x128xf32> to vector<1x128xf32>
    %179 = vector.extract_strided_slice %177 {offsets = [0, 0], sizes = [64, 128], strides = [1, 1]} : vector<72x128xf32> to vector<64x128xf32>
    %180 = vector.broadcast %178 : vector<1x128xf32> to vector<64x128xf32>
    %181 = arith.mulf %180, %179 : vector<64x128xf32>
    %182 = arith.addf %172, %181 : vector<64x128xf32>
    %183 = vector.extract_strided_slice %3 {offsets = [7, 0], sizes = [1, 128], strides = [1, 1]} : vector<9x128xf32> to vector<1x128xf32>
    %184 = vector.extract_strided_slice %177 {offsets = [1, 0], sizes = [64, 128], strides = [1, 1]} : vector<72x128xf32> to vector<64x128xf32>
    %185 = vector.broadcast %183 : vector<1x128xf32> to vector<64x128xf32>
    %186 = arith.mulf %185, %184 : vector<64x128xf32>
    %187 = arith.addf %182, %186 : vector<64x128xf32>
    %188 = vector.extract_strided_slice %3 {offsets = [8, 0], sizes = [1, 128], strides = [1, 1]} : vector<9x128xf32> to vector<1x128xf32>
    %189 = vector.extract_strided_slice %177 {offsets = [2, 0], sizes = [64, 128], strides = [1, 1]} : vector<72x128xf32> to vector<64x128xf32>
    %190 = vector.broadcast %188 : vector<1x128xf32> to vector<64x128xf32>
    %191 = arith.mulf %190, %189 : vector<64x128xf32>
    %192 = arith.addf %187, %191 : vector<64x128xf32>
    %193 = vector.broadcast %2 : vector<1x128xf32> to vector<64x128xf32>
    %194 = arith.addf %192, %193 : vector<64x128xf32>
    %c128 = arith.constant 128 : index
    %c0_30 = arith.constant 0 : index
    %195 = vector.load %arg5[%c128, %c0_30] : memref<384x128xf32, #tpu.memory_space<vmem>>, vector<64x128xf32>
    tpu.vector_store %arg5[%c128, %c0_30], %194 {strides = array<i32>} : memref<384x128xf32, #tpu.memory_space<vmem>>, vector<64x128xf32>,
    %cst_31 = arith.constant 0.000000e+00 : f32
    %196 = vector.broadcast %cst_31 : f32 to vector<64x128xf32>
    %c192_i32 = arith.constant 192 : i32
    %197 = arith.addi %1, %c192_i32 : i32
    %c0_i32_32 = arith.constant 0 : i32
    %198 = arith.addi %197, %c0_i32_32 : i32
    %199 = tpu.assume_multiple %198, 8 : i32
    %200 = arith.index_cast %199 : i32 to index
    %c0_33 = arith.constant 0 : index
    %201 = vector.load %arg2[%200, %c0_33] : memref<440x128xf32, #tpu.memory_space<vmem>>, vector<72x128xf32>
    %202 = vector.extract_strided_slice %3 {offsets = [0, 0], sizes = [1, 128], strides = [1, 1]} : vector<9x128xf32> to vector<1x128xf32>
    %203 = vector.extract_strided_slice %201 {offsets = [0, 0], sizes = [64, 128], strides = [1, 1]} : vector<72x128xf32> to vector<64x128xf32>
    %204 = vector.broadcast %202 : vector<1x128xf32> to vector<64x128xf32>
    %205 = arith.mulf %204, %203 : vector<64x128xf32>
    %206 = arith.addf %196, %205 : vector<64x128xf32>
    %207 = vector.extract_strided_slice %3 {offsets = [1, 0], sizes = [1, 128], strides = [1, 1]} : vector<9x128xf32> to vector<1x128xf32>
    %208 = vector.extract_strided_slice %201 {offsets = [1, 0], sizes = [64, 128], strides = [1, 1]} : vector<72x128xf32> to vector<64x128xf32>
    %209 = vector.broadcast %207 : vector<1x128xf32> to vector<64x128xf32>
    %210 = arith.mulf %209, %208 : vector<64x128xf32>
    %211 = arith.addf %206, %210 : vector<64x128xf32>
    %212 = vector.extract_strided_slice %3 {offsets = [2, 0], sizes = [1, 128], strides = [1, 1]} : vector<9x128xf32> to vector<1x128xf32>
    %213 = vector.extract_strided_slice %201 {offsets = [2, 0], sizes = [64, 128], strides = [1, 1]} : vector<72x128xf32> to vector<64x128xf32>
    %214 = vector.broadcast %212 : vector<1x128xf32> to vector<64x128xf32>
    %215 = arith.mulf %214, %213 : vector<64x128xf32>
    %216 = arith.addf %211, %215 : vector<64x128xf32>
    %c192_i32_34 = arith.constant 192 : i32
    %217 = arith.addi %1, %c192_i32_34 : i32
    %c24_i32_35 = arith.constant 24 : i32
    %218 = arith.addi %217, %c24_i32_35 : i32
    %219 = tpu.assume_multiple %218, 8 : i32
    %220 = arith.index_cast %219 : i32 to index
    %c0_36 = arith.constant 0 : index
    %221 = vector.load %arg2[%220, %c0_36] : memref<440x128xf32, #tpu.memory_space<vmem>>, vector<72x128xf32>
    %222 = vector.extract_strided_slice %3 {offsets = [3, 0], sizes = [1, 128], strides = [1, 1]} : vector<9x128xf32> to vector<1x128xf32>
    %223 = vector.extract_strided_slice %221 {offsets = [0, 0], sizes = [64, 128], strides = [1, 1]} : vector<72x128xf32> to vector<64x128xf32>
    %224 = vector.broadcast %222 : vector<1x128xf32> to vector<64x128xf32>
    %225 = arith.mulf %224, %223 : vector<64x128xf32>
    %226 = arith.addf %216, %225 : vector<64x128xf32>
    %227 = vector.extract_strided_slice %3 {offsets = [4, 0], sizes = [1, 128], strides = [1, 1]} : vector<9x128xf32> to vector<1x128xf32>
    %228 = vector.extract_strided_slice %221 {offsets = [1, 0], sizes = [64, 128], strides = [1, 1]} : vector<72x128xf32> to vector<64x128xf32>
    %229 = vector.broadcast %227 : vector<1x128xf32> to vector<64x128xf32>
    %230 = arith.mulf %229, %228 : vector<64x128xf32>
    %231 = arith.addf %226, %230 : vector<64x128xf32>
    %232 = vector.extract_strided_slice %3 {offsets = [5, 0], sizes = [1, 128], strides = [1, 1]} : vector<9x128xf32> to vector<1x128xf32>
    %233 = vector.extract_strided_slice %221 {offsets = [2, 0], sizes = [64, 128], strides = [1, 1]} : vector<72x128xf32> to vector<64x128xf32>
    %234 = vector.broadcast %232 : vector<1x128xf32> to vector<64x128xf32>
    %235 = arith.mulf %234, %233 : vector<64x128xf32>
    %236 = arith.addf %231, %235 : vector<64x128xf32>
    %c192_i32_37 = arith.constant 192 : i32
    %237 = arith.addi %1, %c192_i32_37 : i32
    %c48_i32_38 = arith.constant 48 : i32
    %238 = arith.addi %237, %c48_i32_38 : i32
    %239 = tpu.assume_multiple %238, 8 : i32
    %240 = arith.index_cast %239 : i32 to index
    %c0_39 = arith.constant 0 : index
    %241 = vector.load %arg2[%240, %c0_39] : memref<440x128xf32, #tpu.memory_space<vmem>>, vector<72x128xf32>
    %242 = vector.extract_strided_slice %3 {offsets = [6, 0], sizes = [1, 128], strides = [1, 1]} : vector<9x128xf32> to vector<1x128xf32>
    %243 = vector.extract_strided_slice %241 {offsets = [0, 0], sizes = [64, 128], strides = [1, 1]} : vector<72x128xf32> to vector<64x128xf32>
    %244 = vector.broadcast %242 : vector<1x128xf32> to vector<64x128xf32>
    %245 = arith.mulf %244, %243 : vector<64x128xf32>
    %246 = arith.addf %236, %245 : vector<64x128xf32>
    %247 = vector.extract_strided_slice %3 {offsets = [7, 0], sizes = [1, 128], strides = [1, 1]} : vector<9x128xf32> to vector<1x128xf32>
    %248 = vector.extract_strided_slice %241 {offsets = [1, 0], sizes = [64, 128], strides = [1, 1]} : vector<72x128xf32> to vector<64x128xf32>
    %249 = vector.broadcast %247 : vector<1x128xf32> to vector<64x128xf32>
    %250 = arith.mulf %249, %248 : vector<64x128xf32>
    %251 = arith.addf %246, %250 : vector<64x128xf32>
    %252 = vector.extract_strided_slice %3 {offsets = [8, 0], sizes = [1, 128], strides = [1, 1]} : vector<9x128xf32> to vector<1x128xf32>
    %253 = vector.extract_strided_slice %241 {offsets = [2, 0], sizes = [64, 128], strides = [1, 1]} : vector<72x128xf32> to vector<64x128xf32>
    %254 = vector.broadcast %252 : vector<1x128xf32> to vector<64x128xf32>
    %255 = arith.mulf %254, %253 : vector<64x128xf32>
    %256 = arith.addf %251, %255 : vector<64x128xf32>
    %257 = vector.broadcast %2 : vector<1x128xf32> to vector<64x128xf32>
    %258 = arith.addf %256, %257 : vector<64x128xf32>
    %c192 = arith.constant 192 : index
    %c0_40 = arith.constant 0 : index
    %259 = vector.load %arg5[%c192, %c0_40] : memref<384x128xf32, #tpu.memory_space<vmem>>, vector<64x128xf32>
    tpu.vector_store %arg5[%c192, %c0_40], %258 {strides = array<i32>} : memref<384x128xf32, #tpu.memory_space<vmem>>, vector<64x128xf32>,
    %cst_41 = arith.constant 0.000000e+00 : f32
    %260 = vector.broadcast %cst_41 : f32 to vector<64x128xf32>
    %c256_i32 = arith.constant 256 : i32
    %261 = arith.addi %1, %c256_i32 : i32
    %c0_i32_42 = arith.constant 0 : i32
    %262 = arith.addi %261, %c0_i32_42 : i32
    %263 = tpu.assume_multiple %262, 8 : i32
    %264 = arith.index_cast %263 : i32 to index
    %c0_43 = arith.constant 0 : index
    %265 = vector.load %arg2[%264, %c0_43] : memref<440x128xf32, #tpu.memory_space<vmem>>, vector<72x128xf32>
    %266 = vector.extract_strided_slice %3 {offsets = [0, 0], sizes = [1, 128], strides = [1, 1]} : vector<9x128xf32> to vector<1x128xf32>
    %267 = vector.extract_strided_slice %265 {offsets = [0, 0], sizes = [64, 128], strides = [1, 1]} : vector<72x128xf32> to vector<64x128xf32>
    %268 = vector.broadcast %266 : vector<1x128xf32> to vector<64x128xf32>
    %269 = arith.mulf %268, %267 : vector<64x128xf32>
    %270 = arith.addf %260, %269 : vector<64x128xf32>
    %271 = vector.extract_strided_slice %3 {offsets = [1, 0], sizes = [1, 128], strides = [1, 1]} : vector<9x128xf32> to vector<1x128xf32>
    %272 = vector.extract_strided_slice %265 {offsets = [1, 0], sizes = [64, 128], strides = [1, 1]} : vector<72x128xf32> to vector<64x128xf32>
    %273 = vector.broadcast %271 : vector<1x128xf32> to vector<64x128xf32>
    %274 = arith.mulf %273, %272 : vector<64x128xf32>
    %275 = arith.addf %270, %274 : vector<64x128xf32>
    %276 = vector.extract_strided_slice %3 {offsets = [2, 0], sizes = [1, 128], strides = [1, 1]} : vector<9x128xf32> to vector<1x128xf32>
    %277 = vector.extract_strided_slice %265 {offsets = [2, 0], sizes = [64, 128], strides = [1, 1]} : vector<72x128xf32> to vector<64x128xf32>
    %278 = vector.broadcast %276 : vector<1x128xf32> to vector<64x128xf32>
    %279 = arith.mulf %278, %277 : vector<64x128xf32>
    %280 = arith.addf %275, %279 : vector<64x128xf32>
    %c256_i32_44 = arith.constant 256 : i32
    %281 = arith.addi %1, %c256_i32_44 : i32
    %c24_i32_45 = arith.constant 24 : i32
    %282 = arith.addi %281, %c24_i32_45 : i32
    %283 = tpu.assume_multiple %282, 8 : i32
    %284 = arith.index_cast %283 : i32 to index
    %c0_46 = arith.constant 0 : index
    %285 = vector.load %arg2[%284, %c0_46] : memref<440x128xf32, #tpu.memory_space<vmem>>, vector<72x128xf32>
    %286 = vector.extract_strided_slice %3 {offsets = [3, 0], sizes = [1, 128], strides = [1, 1]} : vector<9x128xf32> to vector<1x128xf32>
    %287 = vector.extract_strided_slice %285 {offsets = [0, 0], sizes = [64, 128], strides = [1, 1]} : vector<72x128xf32> to vector<64x128xf32>
    %288 = vector.broadcast %286 : vector<1x128xf32> to vector<64x128xf32>
    %289 = arith.mulf %288, %287 : vector<64x128xf32>
    %290 = arith.addf %280, %289 : vector<64x128xf32>
    %291 = vector.extract_strided_slice %3 {offsets = [4, 0], sizes = [1, 128], strides = [1, 1]} : vector<9x128xf32> to vector<1x128xf32>
    %292 = vector.extract_strided_slice %285 {offsets = [1, 0], sizes = [64, 128], strides = [1, 1]} : vector<72x128xf32> to vector<64x128xf32>
    %293 = vector.broadcast %291 : vector<1x128xf32> to vector<64x128xf32>
    %294 = arith.mulf %293, %292 : vector<64x128xf32>
    %295 = arith.addf %290, %294 : vector<64x128xf32>
    %296 = vector.extract_strided_slice %3 {offsets = [5, 0], sizes = [1, 128], strides = [1, 1]} : vector<9x128xf32> to vector<1x128xf32>
    %297 = vector.extract_strided_slice %285 {offsets = [2, 0], sizes = [64, 128], strides = [1, 1]} : vector<72x128xf32> to vector<64x128xf32>
    %298 = vector.broadcast %296 : vector<1x128xf32> to vector<64x128xf32>
    %299 = arith.mulf %298, %297 : vector<64x128xf32>
    %300 = arith.addf %295, %299 : vector<64x128xf32>
    %c256_i32_47 = arith.constant 256 : i32
    %301 = arith.addi %1, %c256_i32_47 : i32
    %c48_i32_48 = arith.constant 48 : i32
    %302 = arith.addi %301, %c48_i32_48 : i32
    %303 = tpu.assume_multiple %302, 8 : i32
    %304 = arith.index_cast %303 : i32 to index
    %c0_49 = arith.constant 0 : index
    %305 = vector.load %arg2[%304, %c0_49] : memref<440x128xf32, #tpu.memory_space<vmem>>, vector<72x128xf32>
    %306 = vector.extract_strided_slice %3 {offsets = [6, 0], sizes = [1, 128], strides = [1, 1]} : vector<9x128xf32> to vector<1x128xf32>
    %307 = vector.extract_strided_slice %305 {offsets = [0, 0], sizes = [64, 128], strides = [1, 1]} : vector<72x128xf32> to vector<64x128xf32>
    %308 = vector.broadcast %306 : vector<1x128xf32> to vector<64x128xf32>
    %309 = arith.mulf %308, %307 : vector<64x128xf32>
    %310 = arith.addf %300, %309 : vector<64x128xf32>
    %311 = vector.extract_strided_slice %3 {offsets = [7, 0], sizes = [1, 128], strides = [1, 1]} : vector<9x128xf32> to vector<1x128xf32>
    %312 = vector.extract_strided_slice %305 {offsets = [1, 0], sizes = [64, 128], strides = [1, 1]} : vector<72x128xf32> to vector<64x128xf32>
    %313 = vector.broadcast %311 : vector<1x128xf32> to vector<64x128xf32>
    %314 = arith.mulf %313, %312 : vector<64x128xf32>
    %315 = arith.addf %310, %314 : vector<64x128xf32>
    %316 = vector.extract_strided_slice %3 {offsets = [8, 0], sizes = [1, 128], strides = [1, 1]} : vector<9x128xf32> to vector<1x128xf32>
    %317 = vector.extract_strided_slice %305 {offsets = [2, 0], sizes = [64, 128], strides = [1, 1]} : vector<72x128xf32> to vector<64x128xf32>
    %318 = vector.broadcast %316 : vector<1x128xf32> to vector<64x128xf32>
    %319 = arith.mulf %318, %317 : vector<64x128xf32>
    %320 = arith.addf %315, %319 : vector<64x128xf32>
    %321 = vector.broadcast %2 : vector<1x128xf32> to vector<64x128xf32>
    %322 = arith.addf %320, %321 : vector<64x128xf32>
    %c256 = arith.constant 256 : index
    %c0_50 = arith.constant 0 : index
    %323 = vector.load %arg5[%c256, %c0_50] : memref<384x128xf32, #tpu.memory_space<vmem>>, vector<64x128xf32>
    tpu.vector_store %arg5[%c256, %c0_50], %322 {strides = array<i32>} : memref<384x128xf32, #tpu.memory_space<vmem>>, vector<64x128xf32>,
    %cst_51 = arith.constant 0.000000e+00 : f32
    %324 = vector.broadcast %cst_51 : f32 to vector<64x128xf32>
    %c320_i32 = arith.constant 320 : i32
    %325 = arith.addi %1, %c320_i32 : i32
    %c0_i32_52 = arith.constant 0 : i32
    %326 = arith.addi %325, %c0_i32_52 : i32
    %327 = tpu.assume_multiple %326, 8 : i32
    %328 = arith.index_cast %327 : i32 to index
    %c0_53 = arith.constant 0 : index
    %329 = vector.load %arg2[%328, %c0_53] : memref<440x128xf32, #tpu.memory_space<vmem>>, vector<72x128xf32>
    %330 = vector.extract_strided_slice %3 {offsets = [0, 0], sizes = [1, 128], strides = [1, 1]} : vector<9x128xf32> to vector<1x128xf32>
    %331 = vector.extract_strided_slice %329 {offsets = [0, 0], sizes = [64, 128], strides = [1, 1]} : vector<72x128xf32> to vector<64x128xf32>
    %332 = vector.broadcast %330 : vector<1x128xf32> to vector<64x128xf32>
    %333 = arith.mulf %332, %331 : vector<64x128xf32>
    %334 = arith.addf %324, %333 : vector<64x128xf32>
    %335 = vector.extract_strided_slice %3 {offsets = [1, 0], sizes = [1, 128], strides = [1, 1]} : vector<9x128xf32> to vector<1x128xf32>
    %336 = vector.extract_strided_slice %329 {offsets = [1, 0], sizes = [64, 128], strides = [1, 1]} : vector<72x128xf32> to vector<64x128xf32>
    %337 = vector.broadcast %335 : vector<1x128xf32> to vector<64x128xf32>
    %338 = arith.mulf %337, %336 : vector<64x128xf32>
    %339 = arith.addf %334, %338 : vector<64x128xf32>
    %340 = vector.extract_strided_slice %3 {offsets = [2, 0], sizes = [1, 128], strides = [1, 1]} : vector<9x128xf32> to vector<1x128xf32>
    %341 = vector.extract_strided_slice %329 {offsets = [2, 0], sizes = [64, 128], strides = [1, 1]} : vector<72x128xf32> to vector<64x128xf32>
    %342 = vector.broadcast %340 : vector<1x128xf32> to vector<64x128xf32>
    %343 = arith.mulf %342, %341 : vector<64x128xf32>
    %344 = arith.addf %339, %343 : vector<64x128xf32>
    %c320_i32_54 = arith.constant 320 : i32
    %345 = arith.addi %1, %c320_i32_54 : i32
    %c24_i32_55 = arith.constant 24 : i32
    %346 = arith.addi %345, %c24_i32_55 : i32
    %347 = tpu.assume_multiple %346, 8 : i32
    %348 = arith.index_cast %347 : i32 to index
    %c0_56 = arith.constant 0 : index
    %349 = vector.load %arg2[%348, %c0_56] : memref<440x128xf32, #tpu.memory_space<vmem>>, vector<72x128xf32>
    %350 = vector.extract_strided_slice %3 {offsets = [3, 0], sizes = [1, 128], strides = [1, 1]} : vector<9x128xf32> to vector<1x128xf32>
    %351 = vector.extract_strided_slice %349 {offsets = [0, 0], sizes = [64, 128], strides = [1, 1]} : vector<72x128xf32> to vector<64x128xf32>
    %352 = vector.broadcast %350 : vector<1x128xf32> to vector<64x128xf32>
    %353 = arith.mulf %352, %351 : vector<64x128xf32>
    %354 = arith.addf %344, %353 : vector<64x128xf32>
    %355 = vector.extract_strided_slice %3 {offsets = [4, 0], sizes = [1, 128], strides = [1, 1]} : vector<9x128xf32> to vector<1x128xf32>
    %356 = vector.extract_strided_slice %349 {offsets = [1, 0], sizes = [64, 128], strides = [1, 1]} : vector<72x128xf32> to vector<64x128xf32>
    %357 = vector.broadcast %355 : vector<1x128xf32> to vector<64x128xf32>
    %358 = arith.mulf %357, %356 : vector<64x128xf32>
    %359 = arith.addf %354, %358 : vector<64x128xf32>
    %360 = vector.extract_strided_slice %3 {offsets = [5, 0], sizes = [1, 128], strides = [1, 1]} : vector<9x128xf32> to vector<1x128xf32>
    %361 = vector.extract_strided_slice %349 {offsets = [2, 0], sizes = [64, 128], strides = [1, 1]} : vector<72x128xf32> to vector<64x128xf32>
    %362 = vector.broadcast %360 : vector<1x128xf32> to vector<64x128xf32>
    %363 = arith.mulf %362, %361 : vector<64x128xf32>
    %364 = arith.addf %359, %363 : vector<64x128xf32>
    %c320_i32_57 = arith.constant 320 : i32
    %365 = arith.addi %1, %c320_i32_57 : i32
    %c48_i32_58 = arith.constant 48 : i32
    %366 = arith.addi %365, %c48_i32_58 : i32
    %367 = tpu.assume_multiple %366, 8 : i32
    %368 = arith.index_cast %367 : i32 to index
    %c0_59 = arith.constant 0 : index
    %369 = vector.load %arg2[%368, %c0_59] : memref<440x128xf32, #tpu.memory_space<vmem>>, vector<72x128xf32>
    %370 = vector.extract_strided_slice %3 {offsets = [6, 0], sizes = [1, 128], strides = [1, 1]} : vector<9x128xf32> to vector<1x128xf32>
    %371 = vector.extract_strided_slice %369 {offsets = [0, 0], sizes = [64, 128], strides = [1, 1]} : vector<72x128xf32> to vector<64x128xf32>
    %372 = vector.broadcast %370 : vector<1x128xf32> to vector<64x128xf32>
    %373 = arith.mulf %372, %371 : vector<64x128xf32>
    %374 = arith.addf %364, %373 : vector<64x128xf32>
    %375 = vector.extract_strided_slice %3 {offsets = [7, 0], sizes = [1, 128], strides = [1, 1]} : vector<9x128xf32> to vector<1x128xf32>
    %376 = vector.extract_strided_slice %369 {offsets = [1, 0], sizes = [64, 128], strides = [1, 1]} : vector<72x128xf32> to vector<64x128xf32>
    %377 = vector.broadcast %375 : vector<1x128xf32> to vector<64x128xf32>
    %378 = arith.mulf %377, %376 : vector<64x128xf32>
    %379 = arith.addf %374, %378 : vector<64x128xf32>
    %380 = vector.extract_strided_slice %3 {offsets = [8, 0], sizes = [1, 128], strides = [1, 1]} : vector<9x128xf32> to vector<1x128xf32>
    %381 = vector.extract_strided_slice %369 {offsets = [2, 0], sizes = [64, 128], strides = [1, 1]} : vector<72x128xf32> to vector<64x128xf32>
    %382 = vector.broadcast %380 : vector<1x128xf32> to vector<64x128xf32>
    %383 = arith.mulf %382, %381 : vector<64x128xf32>
    %384 = arith.addf %379, %383 : vector<64x128xf32>
    %385 = vector.broadcast %2 : vector<1x128xf32> to vector<64x128xf32>
    %386 = arith.addf %384, %385 : vector<64x128xf32>
    %c320 = arith.constant 320 : index
    %c0_60 = arith.constant 0 : index
    %387 = vector.load %arg5[%c320, %c0_60] : memref<384x128xf32, #tpu.memory_space<vmem>>, vector<64x128xf32>
    tpu.vector_store %arg5[%c320, %c0_60], %386 {strides = array<i32>} : memref<384x128xf32, #tpu.memory_space<vmem>>, vector<64x128xf32>,
    return
  }
  func.func @transform_0(%arg0: i32, %arg1: i32) -> (i32, i32) {
    %c0_i32 = arith.constant 0 : i32
    %c0_i32_0 = arith.constant 0 : i32
    return %c0_i32, %arg0 : i32, i32
  }
  func.func @transform_1(%arg0: i32, %arg1: i32) -> (i32, i32) {
    %c0_i32 = arith.constant 0 : i32
    %c0_i32_0 = arith.constant 0 : i32
    return %c0_i32, %arg0 : i32, i32
  }
  func.func @transform_2(%arg0: i32, %arg1: i32) -> (i32, i32) {
    %c0_i32 = arith.constant 0 : i32
    %c0_i32_0 = arith.constant 0 : i32
    return %c0_i32, %arg0 : i32, i32
  }
  func.func @transform_3(%arg0: i32, %arg1: i32) -> (i32, i32) {
    %c0_i32 = arith.constant 0 : i32
    return %arg1, %arg0 : i32, i32
  }
}

</mosaic_0001>

<bundles_post_ra>
// kernel: tpu_custom_call.1
= control target key start
LH: loop header
LB: loop body
LE: loop exit
PB: predicated region body
PF: predicated region fallthrough
CT: control target
= control target key end

     0   :  { %8 = vsyncpa [#allocation3], 0  ;;  %s4203_s0 = inlined_call_operand.hbm [shape: f32[440,128], index: 0, kind: input, shape index: {}]   ;;  %s4204_s1 = inlined_call_operand.hbm [shape: f32[9,128], index: 1, kind: input, shape index: {}]   ;;  %s4205_s2 = inlined_call_operand.vmem [shape: f32[1,128], index: 2, kind: input, shape index: {}]   ;;  %s4206_s3 = inlined_call_operand.hbm [shape: f32[384,128], index: 3, kind: output, shape index: {}]  }
   0x1   :  { %9 = vsyncpa [#allocation6], 0 }
   0x2   :  { %10 = vsyncpa [#allocation4], 0  ;;  %s15_s14 = sshll.u32 %s4203_s0, 4  ;;  %s2608_s15 = smov [#allocation2]   ;;  %s16_s14 = int_to_ptr.hbm [resolvable:$true] %s15_s14 }
   0x3   :  { %s17_s16 = sshll.u32 %s2608_s15, 4  ;;  %s28_s19 = sshll.u32 %s4204_s1, 4  ;;  %s18_s16 = int_to_ptr.vmem [resolvable:$true] %s17_s16  ;;  %s29_s19 = int_to_ptr.hbm [resolvable:$true] %s28_s19 }
   0x4   :  { %s2609_s20 = smov 128   ;;  %s2610_s21 = smov 8  }
   0x5   :  { %23 = dma.hbm_to_vmem [thread:$0]  %s16_s14, 7040, %s18_s16, [#allocation3], %s2609_s20, %s2609_s20, %s2610_s21  }
   0x6   :  { %s2611_s22 = smov [#allocation5]  }
   0x7   :  { %s30_s23 = sshll.u32 %s2611_s22, 4  ;;  %s31_s23 = int_to_ptr.vmem [resolvable:$true] %s30_s23 }
   0x8   :  { %36 = dma.hbm_to_vmem [thread:$0]  %s29_s19, 256, %s31_s23, [#allocation6], %s2609_s20, %s2609_s20, %s2610_s21  }
   0x9   :  { %2602 = dma.done.wait [#allocation3], 7040  }
   0xa   :  { %2603 = vsyncadd [#allocation3], 4294960256 }
   0xb   :  { %2604 = dma.done.wait [#allocation6], 256  }
   0xc   :  { %2605 = vsyncadd [#allocation6], 4294967040  ;;  %v49_v0 = vld [vmem:[#allocation5] sm:$0xff]  ;;  %v52_v1 = vld [vmem:[#allocation2] sm:$0xff]  ;;  %vm97_vm0 = vcmask 1046528   ;;  %vm150_vm1 = vcmask 1045504  }
   0xd   :  { %v53_v2 = vld [vmem:[#allocation2 + $0x8] sm:$0xff]  ;;  %v2645_v3 = vperm.slane %v49_v0, 0  ;;  %v2647_v4 = vperm.slane %v49_v0, 1  ;;  %v2649_v5 = vperm.slane %v49_v0, 2  ;;  %v2651_v6 = vperm.slane %v49_v0, 4  ;;  %v2658_v11 = vld [vmem:[#allocation2 + $0x18] sm:$0xff] }
   0xe   :  { %v2653_v7 = vperm.slane %v49_v0, 5  ;;  %v2660_v12 = vld [vmem:[#allocation2 + $0x20] sm:$0xff]  ;;  %v2662_v13 = vperm.slane %v49_v0, 3  ;;  %v2677_v29 = vperm.slane %v49_v0, 6  ;;  %v2679_v30 = vperm.slane %v49_v0, 7  ;;  %v2684_v35 = vld [vmem:[#allocation2 + $0x30] sm:$0xff] }
   0xf   :  { %v79_v8 = vmul.f32 %v2647_v4, %v52_v1  ;;  %v80_v9 = vmul.f32 %v2647_v4, %v53_v2  ;;  %v132_v10 = vmul.f32 %v2649_v5, %v52_v1  ;;  %v62_v14 = vmul.f32 %v2645_v3, %v52_v1  ;;  %v2672_v22 = vld [vmem:[#allocation5 + $0x8] ss:$0 sm:$0xff]  ;;  %v2686_v36 = vld [vmem:[#allocation2 + $0x38] sm:$0xff]  ;;  %v54_v37 = vld [vmem:[#allocation2 + $0x10] sm:$0xff]  ;;  %s2488_s4 = sshll.u32 %s4206_s3, 4  ;;  %s2489_s4 = int_to_ptr.hbm [resolvable:$true] %s2488_s4 }
  0x10   :  { %v133_v15 = vmul.f32 %v2649_v5, %v53_v2  ;;  %v213_v16 = vmul.f32 %v2651_v6, %v2658_v11  ;;  %v214_v17 = vmul.f32 %v2651_v6, %v2660_v12  ;;  %v265_v21 = vmul.f32 %v2653_v7, %v2658_v11  ;;  %v2703_v54 = vld [vmem:[#allocation2 + $0x28] sm:$0xff]  ;;  %v2713_v63 = vld [vmem:[#allocation2 + $0x40] sm:$0xff] }
  0x11   :  { %v98_v18 = vrot.slane %v79_v8, 1  ;;  %v99_v19 = vrot.slane %v80_v9, 1  ;;  %v151_v20 = vrot.slane %v132_v10, 2  ;;  %v266_v26 = vmul.f32 %v2653_v7, %v2660_v12 }
  0x12   :  { %v152_v23 = vrot.slane %v133_v15, 2  ;;  %v231_v24 = vrot.slane %v213_v16, 1  ;;  %v232_v25 = vrot.slane %v214_v17, 1  ;;  %v283_v28 = vrot.slane %v265_v21, 2 }
  0x13   :  { %v100_v27 = vsel %vm97_vm0, %v98_v18, %v99_v19  ;;  %v196_v33 = vmul.f32 %v2662_v13, %v2658_v11  ;;  %v284_v34 = vrot.slane %v266_v26, 2  ;;  %v345_v39 = vmul.f32 %v2679_v30, %v2684_v35 }
  0x14   :  { %v123_v31 = vadd.f32 %v100_v27, %v62_v14  ;;  %v153_v32 = vsel %vm150_vm1, %v151_v20, %v152_v23  ;;  %v233_v38 = vsel %vm97_vm0, %v231_v24, %v232_v25  ;;  %v346_v40 = vmul.f32 %v2679_v30, %v2686_v36 }
  0x15   :  { %v397_v41 = vmul.f32 %v2672_v22, %v2684_v35  ;;  %v285_v43 = vsel %vm150_vm1, %v283_v28, %v284_v34  ;;  %v328_v44 = vmul.f32 %v2677_v29, %v2684_v35  ;;  %v398_v45 = vmul.f32 %v2672_v22, %v2686_v36 }
  0x16   :  { %v176_v42 = vadd.f32 %v153_v32, %v123_v31  ;;  %v363_v46 = vrot.slane %v345_v39, 1  ;;  %v364_v47 = vrot.slane %v346_v40, 1  ;;  %v81_v49 = vmul.f32 %v2647_v4, %v54_v37  ;;  %v2736_v32 = vld [vmem:[%s4205_s2] ss:$0 sm:$0xff] }
  0x17   :  { %v415_v48 = vrot.slane %v397_v41, 2  ;;  %v416_v51 = vrot.slane %v398_v45, 2  ;;  %v63_v52 = vmul.f32 %v2645_v3, %v53_v2  ;;  %v134_v53 = vmul.f32 %v2649_v5, %v54_v37 }
  0x18   :  { %v204_v50 = vadd.f32 %v196_v33, %v176_v42  ;;  %v101_v55 = vrot.slane %v81_v49, 1  ;;  %v197_v56 = vmul.f32 %v2662_v13, %v2660_v12  ;;  %v215_v57 = vmul.f32 %v2651_v6, %v2703_v54  ;;  %v2743_v42 = vld [vmem:[#allocation2 + $0x48] sm:$0xff] }
  0x19   :  { %v267_v58 = vmul.f32 %v2653_v7, %v2703_v54  ;;  %v365_v60 = vsel %vm97_vm0, %v363_v46, %v364_v47  ;;  %v417_v61 = vsel %vm150_vm1, %v415_v48, %v416_v51  ;;  %v154_v62 = vrot.slane %v134_v53, 2 }
  0x1a   :  { %v256_v59 = vadd.f32 %v233_v38, %v204_v50  ;;  %v102_v0 = vsel %vm97_vm0, %v99_v19, %v101_v55  ;;  %v234_v1 = vrot.slane %v215_v57, 1  ;;  %v347_v8 = vmul.f32 %v2679_v30, %v2713_v63 }
  0x1b   :  { %v286_v2 = vrot.slane %v267_v58, 2  ;;  %v124_v10 = vadd.f32 %v102_v0, %v63_v52  ;;  %v155_v14 = vsel %vm150_vm1, %v152_v23, %v154_v62  ;;  %v399_v15 = vmul.f32 %v2672_v22, %v2713_v63 }
  0x1c   :  { %v308_v9 = vadd.f32 %v285_v43, %v256_v59  ;;  %v235_v16 = vsel %vm97_vm0, %v232_v25, %v234_v1  ;;  %v329_v18 = vmul.f32 %v2677_v29, %v2686_v36  ;;  %v366_v19 = vrot.slane %v347_v8, 1 }
  0x1d   :  { %v287_v17 = vsel %vm150_vm1, %v284_v34, %v286_v2  ;;  %v177_v21 = vadd.f32 %v155_v14, %v124_v10  ;;  %v418_v24 = vrot.slane %v399_v15, 2  ;;  %v82_v26 = vmul.f32 %v2658_v11, %v2647_v4 }
  0x1e   :  { %v336_v20 = vadd.f32 %v328_v44, %v308_v9  ;;  %v367_v27 = vsel %vm97_vm0, %v364_v47, %v366_v19  ;;  %v64_v23 = vmul.f32 %v2645_v3, %v54_v37  ;;  %v135_v28 = vmul.f32 %v2658_v11, %v2649_v5 }
  0x1f   :  { %v216_v25 = vmul.f32 %v2684_v35, %v2651_v6  ;;  %v205_v33 = vadd.f32 %v197_v56, %v177_v21  ;;  %v103_v34 = vrot.slane %v82_v26, 1  ;;  %v198_v38 = vmul.f32 %v2662_v13, %v2703_v54 }
  0x20   :  { %v388_v31 = vadd.f32 %v365_v60, %v336_v20  ;;  %v419_v39 = vsel %vm150_vm1, %v416_v51, %v418_v24  ;;  %v156_v37 = vrot.slane %v135_v28, 2  ;;  %v268_v41 = vmul.f32 %v2684_v35, %v2653_v7  ;;  %v2772_v28 = vld [vmem:[#allocation2 + $0x50] sm:$0xff] }
  0x21   :  { %v236_v40 = vrot.slane %v216_v25, 1  ;;  %v257_v44 = vadd.f32 %v235_v16, %v205_v33  ;;  %v104_v45 = vsel %vm97_vm0, %v101_v55, %v103_v34  ;;  %v348_v46 = vmul.f32 %v2679_v30, %v2743_v42 }
  0x22   :  { %v440_v43 = vadd.f32 %v417_v61, %v388_v31  ;;  %v125_v47 = vadd.f32 %v104_v45, %v64_v23  ;;  %v157_v48 = vsel %vm150_vm1, %v154_v62, %v156_v37  ;;  %v288_v49 = vrot.slane %v268_v41, 2 }
  0x23   :  { %v330_v50 = vmul.f32 %v2677_v29, %v2713_v63  ;;  %v309_v52 = vadd.f32 %v287_v17, %v257_v44  ;;  %v368_v53 = vrot.slane %v348_v46, 1  ;;  %v400_v56 = vmul.f32 %v2672_v22, %v2743_v42 }
  0x24   :  { %v451_v51 = vadd.f32 %v2736_v32, %v440_v43  ;;  %v178_v57 = vadd.f32 %v157_v48, %v125_v47  ;;  %v237_v55 = vsel %vm97_vm0, %v234_v1, %v236_v40  ;;  %v289_v58 = vsel %vm150_vm1, %v286_v2, %v288_v49 }
  0x25   :  { %v83_v59 = vmul.f32 %v2660_v12, %v2647_v4  ;;  %v337_v60 = vadd.f32 %v329_v18, %v309_v52  ;;  %v420_v61 = vrot.slane %v400_v56, 2  ;;  %v65_v62 = vmul.f32 %v2658_v11, %v2645_v3 }
  0x26   :  { %459 = vst [vmem:[#allocation7] sm:$0xff] %v451_v51  ;;  %v136_v0 = vmul.f32 %v2660_v12, %v2649_v5  ;;  %v206_v8 = vadd.f32 %v198_v38, %v178_v57  ;;  %v369_v9 = vsel %vm97_vm0, %v366_v19, %v368_v53  ;;  %v217_v1 = vmul.f32 %v2686_v36, %v2651_v6 }
  0x27   :  { %v105_v10 = vrot.slane %v83_v59, 1  ;;  %v389_v2 = vadd.f32 %v367_v27, %v337_v60  ;;  %v199_v15 = vmul.f32 %v2684_v35, %v2662_v13  ;;  %v269_v16 = vmul.f32 %v2686_v36, %v2653_v7 }
  0x28   :  { %v158_v14 = vrot.slane %v136_v0, 2  ;;  %v258_v17 = vadd.f32 %v237_v55, %v206_v8  ;;  %v421_v11 = vsel %vm150_vm1, %v418_v24, %v420_v61  ;;  %v238_v20 = vrot.slane %v217_v1, 1 }
  0x29   :  { %v106_v18 = vsel %vm97_vm0, %v103_v34, %v105_v10  ;;  %v441_v21 = vadd.f32 %v419_v39, %v389_v2  ;;  %v290_v23 = vrot.slane %v269_v16, 2  ;;  %v331_v25 = vmul.f32 %v2677_v29, %v2743_v42 }
  0x2a   :  { %v126_v19 = vadd.f32 %v106_v18, %v65_v62  ;;  %v159_v26 = vsel %vm150_vm1, %v156_v37, %v158_v14  ;;  %v310_v27 = vadd.f32 %v289_v58, %v258_v17  ;;  %v349_v31 = vmul.f32 %v2679_v30, %v2772_v28 }
  0x2b   :  { %v401_v24 = vmul.f32 %v2672_v22, %v2772_v28  ;;  %v452_v33 = vadd.f32 %v2736_v32, %v441_v21  ;;  %v239_v38 = vsel %vm97_vm0, %v236_v40, %v238_v20  ;;  %v291_v39 = vsel %vm150_vm1, %v288_v49, %v290_v23 }
  0x2c   :  { %v179_v34 = vadd.f32 %v159_v26, %v126_v19  ;;  %v338_v37 = vadd.f32 %v330_v50, %v310_v27  ;;  %v370_v41 = vrot.slane %v349_v31, 1  ;;  %v84_v44 = vmul.f32 %v2703_v54, %v2647_v4 }
  0x2d   :  { %v422_v43 = vrot.slane %v401_v24, 2  ;;  %460 = vst [vmem:[#allocation7 + $0x8] sm:$0xff] %v452_v33  ;;  %v66_v46 = vmul.f32 %v2660_v12, %v2645_v3  ;;  %v137_v47 = vmul.f32 %v2703_v54, %v2649_v5  ;;  %v218_v48 = vmul.f32 %v2713_v63, %v2651_v6  ;;  %v2796_v12 = vld [vmem:[#allocation2 + $0x58] sm:$0xff] }
  0x2e   :  { %v207_v45 = vadd.f32 %v199_v15, %v179_v34  ;;  %v390_v40 = vadd.f32 %v369_v9, %v338_v37  ;;  %v371_v49 = vsel %vm97_vm0, %v368_v53, %v370_v41  ;;  %v107_v50 = vrot.slane %v84_v44, 1 }
  0x2f   :  { %v200_v51 = vmul.f32 %v2686_v36, %v2662_v13  ;;  %v160_v56 = vrot.slane %v137_v47, 2  ;;  %v240_v57 = vrot.slane %v218_v48, 1  ;;  %v270_v55 = vmul.f32 %v2713_v63, %v2653_v7 }
  0x30   :  { %v259_v52 = vadd.f32 %v239_v38, %v207_v45  ;;  %v442_v58 = vadd.f32 %v421_v11, %v390_v40  ;;  %v423_v59 = vsel %vm150_vm1, %v420_v61, %v422_v43  ;;  %v108_v60 = vsel %vm97_vm0, %v105_v10, %v107_v50 }
  0x31   :  { %v350_v53 = vmul.f32 %v2679_v30, %v2796_v12  ;;  %v127_v0 = vadd.f32 %v108_v60, %v66_v46  ;;  %v161_v8 = vsel %vm150_vm1, %v158_v14, %v160_v56  ;;  %v332_v9 = vmul.f32 %v2677_v29, %v2772_v28  ;;  %v2826_v46 = vld [vmem:[#allocation2 + $0x60] sm:$0xff] }
  0x32   :  { %v311_v62 = vadd.f32 %v291_v39, %v259_v52  ;;  %v453_v1 = vadd.f32 %v2736_v32, %v442_v58  ;;  %v292_v2 = vrot.slane %v270_v55, 2  ;;  %v402_v16 = vmul.f32 %v2672_v22, %v2796_v12 }
  0x33   :  { %v372_v15 = vrot.slane %v350_v53, 1  ;;  %v180_v17 = vadd.f32 %v161_v8, %v127_v0  ;;  %v241_v10 = vsel %vm97_vm0, %v238_v20, %v240_v57  ;;  %v85_v11 = vmul.f32 %v2684_v35, %v2647_v4 }
  0x34   :  { %v339_v61 = vadd.f32 %v331_v25, %v311_v62  ;;  %461 = vst [vmem:[#allocation7 + $0x10] sm:$0xff] %v453_v1  ;;  %v293_v14 = vsel %vm150_vm1, %v290_v23, %v292_v2  ;;  %v424_v18 = vrot.slane %v402_v16, 2  ;;  %v67_v21 = vmul.f32 %v2703_v54, %v2645_v3 }
  0x35   :  { %v138_v19 = vmul.f32 %v2684_v35, %v2649_v5  ;;  %v208_v27 = vadd.f32 %v200_v51, %v180_v17  ;;  %v373_v25 = vsel %vm97_vm0, %v370_v41, %v372_v15  ;;  %v109_v31 = vrot.slane %v85_v11, 1 }
  0x36   :  { %v391_v26 = vadd.f32 %v371_v49, %v339_v61  ;;  %v201_v20 = vmul.f32 %v2713_v63, %v2662_v13  ;;  %v219_v33 = vmul.f32 %v2743_v42, %v2651_v6  ;;  %v271_v23 = vmul.f32 %v2743_v42, %v2653_v7 }
  0x37   :  { %v162_v24 = vrot.slane %v138_v19, 2  ;;  %v260_v54 = vadd.f32 %v241_v10, %v208_v27  ;;  %v425_v38 = vsel %vm150_vm1, %v422_v43, %v424_v18  ;;  %v110_v39 = vsel %vm97_vm0, %v107_v50, %v109_v31 }
  0x38   :  { %v443_v34 = vadd.f32 %v423_v59, %v391_v26  ;;  %v128_v37 = vadd.f32 %v110_v39, %v67_v21  ;;  %v242_v44 = vrot.slane %v219_v33, 1  ;;  %v294_v45 = vrot.slane %v271_v23, 2 }
  0x39   :  { %v163_v41 = vsel %vm150_vm1, %v160_v56, %v162_v24  ;;  %v312_v48 = vadd.f32 %v293_v14, %v260_v54  ;;  %v351_v40 = vmul.f32 %v2679_v30, %v2826_v46  ;;  %v403_v49 = vmul.f32 %v2672_v22, %v2826_v46 }
  0x3a   :  { %v454_v47 = vadd.f32 %v2736_v32, %v443_v34  ;;  %v181_v51 = vadd.f32 %v163_v41, %v128_v37  ;;  %v243_v43 = vsel %vm97_vm0, %v240_v57, %v242_v44  ;;  %v295_v50 = vsel %vm150_vm1, %v292_v2, %v294_v45 }
  0x3b   :  { %v333_v52 = vmul.f32 %v2677_v29, %v2796_v12  ;;  %v340_v56 = vadd.f32 %v332_v9, %v312_v48  ;;  %v374_v55 = vrot.slane %v351_v40, 1  ;;  %v426_v58 = vrot.slane %v403_v49, 2 }
  0x3c   :  { %462 = vst [vmem:[#allocation7 + $0x18] sm:$0xff] %v454_v47  ;;  %v86_v59 = vmul.f32 %v2686_v36, %v2647_v4  ;;  %v209_v60 = vadd.f32 %v201_v20, %v181_v51  ;;  %v68_v53 = vmul.f32 %v2684_v35, %v2645_v3  ;;  %v139_v62 = vmul.f32 %v2686_v36, %v2649_v5  ;;  %v2850_v35 = vld [vmem:[#allocation2 + $0x68] sm:$0xff] }
  0x3d   :  { %v220_v57 = vmul.f32 %v2772_v28, %v2651_v6  ;;  %v392_v0 = vadd.f32 %v373_v25, %v340_v56  ;;  %v375_v8 = vsel %vm97_vm0, %v372_v15, %v374_v55  ;;  %v202_v9 = vmul.f32 %v2743_v42, %v2662_v13 }
  0x3e   :  { %v111_v1 = vrot.slane %v86_v59, 1  ;;  %v261_v2 = vadd.f32 %v243_v43, %v209_v60  ;;  %v164_v16 = vrot.slane %v139_v62, 2  ;;  %v272_v17 = vmul.f32 %v2772_v28, %v2653_v7 }
  0x3f   :  { %v244_v61 = vrot.slane %v220_v57, 1  ;;  %v444_v10 = vadd.f32 %v425_v38, %v392_v0  ;;  %v427_v11 = vsel %vm150_vm1, %v424_v18, %v426_v58  ;;  %v352_v15 = vmul.f32 %v2679_v30, %v2850_v35 }
  0x40   :  { %v112_v14 = vsel %vm97_vm0, %v109_v31, %v111_v1  ;;  %v313_v21 = vadd.f32 %v295_v50, %v261_v2  ;;  %v165_v26 = vsel %vm150_vm1, %v162_v24, %v164_v16  ;;  %v334_v27 = vmul.f32 %v2677_v29, %v2826_v46 }
  0x41   :  { %v129_v19 = vadd.f32 %v112_v14, %v68_v53  ;;  %v455_v25 = vadd.f32 %v2736_v32, %v444_v10  ;;  %v296_v20 = vrot.slane %v272_v17, 2  ;;  %v376_v33 = vrot.slane %v352_v15, 1  ;;  %v2880_v53 = vld [vmem:[#allocation2 + $0x70] sm:$0xff] }
  0x42   :  { %v404_v23 = vmul.f32 %v2672_v22, %v2850_v35  ;;  %v341_v18 = vadd.f32 %v333_v52, %v313_v21  ;;  %v245_v31 = vsel %vm97_vm0, %v242_v44, %v244_v61  ;;  %v87_v54 = vmul.f32 %v2713_v63, %v2647_v4 }
  0x43   :  { %v182_v34 = vadd.f32 %v165_v26, %v129_v19  ;;  %463 = vst [vmem:[#allocation7 + $0x20] sm:$0xff] %v455_v25  ;;  %v297_v24 = vsel %vm150_vm1, %v294_v45, %v296_v20  ;;  %v69_v39 = vmul.f32 %v2686_v36, %v2645_v3  ;;  %v140_v37 = vmul.f32 %v2713_v63, %v2649_v5 }
  0x44   :  { %v428_v38 = vrot.slane %v404_v23, 2  ;;  %v393_v41 = vadd.f32 %v375_v8, %v341_v18  ;;  %v377_v48 = vsel %vm97_vm0, %v374_v55, %v376_v33  ;;  %v113_v40 = vrot.slane %v87_v54, 1 }
  0x45   :  { %v210_v47 = vadd.f32 %v202_v9, %v182_v34  ;;  %v166_v49 = vrot.slane %v140_v37, 2  ;;  %v203_v44 = vmul.f32 %v2772_v28, %v2662_v13  ;;  %v221_v51 = vmul.f32 %v2796_v12, %v2651_v6 }
  0x46   :  { %v273_v45 = vmul.f32 %v2796_v12, %v2653_v7  ;;  %v445_v43 = vadd.f32 %v427_v11, %v393_v41  ;;  %v429_v50 = vsel %vm150_vm1, %v426_v58, %v428_v38  ;;  %v114_v52 = vsel %vm97_vm0, %v111_v1, %v113_v40 }
  0x47   :  { %v262_v36 = vadd.f32 %v245_v31, %v210_v47  ;;  %v130_v56 = vadd.f32 %v114_v52, %v69_v39  ;;  %v167_v55 = vsel %vm150_vm1, %v164_v16, %v166_v49  ;;  %v246_v59 = vrot.slane %v221_v51, 1  ;;  %v2911_v47 = vld [vmem:[#allocation2 + $0x78] sm:$0xff] }
  0x48   :  { %v298_v60 = vrot.slane %v273_v45, 2  ;;  %v456_v62 = vadd.f32 %v2736_v32, %v445_v43  ;;  %v353_v0 = vmul.f32 %v2679_v30, %v2880_v53  ;;  %v2887_v8 = vmul.f32 %v2672_v22, %v2880_v53 }
  0x49   :  { %v314_v57 = vadd.f32 %v297_v24, %v262_v36  ;;  %v183_v58 = vadd.f32 %v167_v55, %v130_v56  ;;  %v247_v1 = vsel %vm97_vm0, %v244_v61, %v246_v59  ;;  %v335_v2 = vmul.f32 %v2677_v29, %v2850_v35 }
  0x4a   :  { %v299_v9 = vsel %vm150_vm1, %v296_v20, %v298_v60  ;;  %464 = vst [vmem:[#allocation7 + $0x28] sm:$0xff] %v456_v62  ;;  %v378_v17 = vrot.slane %v353_v0, 1  ;;  %v478_v10 = vmul.f32 %v2713_v63, %v2645_v3  ;;  %v495_v14 = vmul.f32 %v2743_v42, %v2647_v4 }
  0x4b   :  { %v342_v16 = vadd.f32 %v334_v27, %v314_v57  ;;  %v211_v11 = vadd.f32 %v203_v44, %v183_v58  ;;  %v546_v15 = vmul.f32 %v2743_v42, %v2649_v5  ;;  %v430_v19 = vrot.slane %v2887_v8, 2 }
  0x4c   :  { %v379_v61 = vsel %vm97_vm0, %v376_v33, %v378_v17  ;;  %v513_v25 = vrot.slane %v495_v14, 1  ;;  %v607_v23 = vmul.f32 %v2796_v12, %v2662_v13  ;;  %v624_v63 = vmul.f32 %v2826_v46, %v2651_v6 }
  0x4d   :  { %v394_v21 = vadd.f32 %v377_v48, %v342_v16  ;;  %v263_v26 = vadd.f32 %v247_v1, %v211_v11  ;;  %v564_v20 = vrot.slane %v546_v15, 2  ;;  %v431_v37 = vsel %vm150_vm1, %v428_v38, %v430_v19 }
  0x4e   :  { %v514_v34 = vsel %vm97_vm0, %v113_v40, %v513_v25  ;;  %v642_v24 = vrot.slane %v624_v63, 1  ;;  %v675_v41 = vmul.f32 %v2826_v46, %v2653_v7  ;;  %v753_v40 = vmul.f32 %v2911_v47, %v2679_v30 }
  0x4f   :  { %v446_v27 = vadd.f32 %v429_v50, %v394_v21  ;;  %v315_v18 = vadd.f32 %v299_v9, %v263_v26  ;;  %v565_v31 = vsel %vm150_vm1, %v166_v49, %v564_v20  ;;  %v537_v33 = vadd.f32 %v514_v34, %v478_v10 }
  0x50   :  { %v643_v44 = vsel %vm97_vm0, %v246_v59, %v642_v24  ;;  %v693_v51 = vrot.slane %v675_v41, 2  ;;  %v804_v45 = vmul.f32 %v2672_v22, %v2911_v47  ;;  %v736_v38 = vmul.f32 %v2677_v29, %v2880_v53 }
  0x51   :  { %v457_v54 = vadd.f32 %v2736_v32, %v446_v27  ;;  %v343_v39 = vadd.f32 %v335_v2, %v315_v18  ;;  %v588_v48 = vadd.f32 %v565_v31, %v537_v33  ;;  %v771_v52 = vrot.slane %v753_v40, 1  ;;  %v2932_v2 = vld [vmem:[#allocation2 + $0x80] sm:$0xff] }
  0x52   :  { %v694_v50 = vsel %vm150_vm1, %v298_v60, %v693_v51  ;;  %v479_v55 = vmul.f32 %v2743_v42, %v2645_v3  ;;  %v496_v59 = vmul.f32 %v2772_v28, %v2647_v4  ;;  %v547_v62 = vmul.f32 %v2772_v28, %v2649_v5 }
  0x53   :  { %465 = vst [vmem:[#allocation7 + $0x30] sm:$0xff] %v457_v54  ;;  %v395_v49 = vadd.f32 %v379_v61, %v343_v39  ;;  %v615_v43 = vadd.f32 %v607_v23, %v588_v48  ;;  %v822_v0 = vrot.slane %v804_v45, 2  ;;  %v625_v8 = vmul.f32 %v2850_v35, %v2651_v6 }
  0x54   :  { %v515_v1 = vrot.slane %v496_v59, 1  ;;  %v566_v60 = vrot.slane %v547_v62, 2  ;;  %v676_v9 = vmul.f32 %v2850_v35, %v2653_v7  ;;  %v772_v42 = vsel %vm97_vm0, %v378_v17, %v771_v52 }
  0x55   :  { %v447_v36 = vadd.f32 %v431_v37, %v395_v49  ;;  %v666_v56 = vadd.f32 %v643_v44, %v615_v43  ;;  %v644_v16 = vrot.slane %v625_v8, 1  ;;  %v2937_v10 = vmul.f32 %v2932_v2, %v2679_v30  ;;  %v2966_v49 = vld [vmem:[#allocation2 + $0x88] sm:$0xff] }
  0x56   :  { %v2941_v11 = vmul.f32 %v2672_v22, %v2932_v2  ;;  %v516_v15 = vsel %vm97_vm0, %v513_v25, %v515_v1  ;;  %v567_v21 = vsel %vm150_vm1, %v564_v20, %v566_v60  ;;  %v695_v61 = vrot.slane %v676_v9, 2 }
  0x57   :  { %v458_v57 = vadd.f32 %v2736_v32, %v447_v36  ;;  %v717_v58 = vadd.f32 %v694_v50, %v666_v56  ;;  %v823_v26 = vsel %vm150_vm1, %v430_v19, %v822_v0  ;;  %v538_v27 = vadd.f32 %v516_v15, %v479_v55 }
  0x58   :  { %v608_v17 = vmul.f32 %v2826_v46, %v2662_v13  ;;  %v737_v23 = vmul.f32 %v2911_v47, %v2677_v29  ;;  %v645_v18 = vsel %vm97_vm0, %v642_v24, %v644_v16  ;;  %v773_v34 = vrot.slane %v2937_v10, 1 }
  0x59   :  { %466 = vst [vmem:[#allocation7 + $0x38] sm:$0xff] %v458_v57  ;;  %v744_v14 = vadd.f32 %v736_v38, %v717_v58  ;;  %v497_v25 = vmul.f32 %v2796_v12, %v2647_v4  ;;  %v589_v31 = vadd.f32 %v567_v21, %v538_v27  ;;  %v824_v20 = vrot.slane %v2941_v11, 2 }
  0x5a   :  { %v480_v19 = vmul.f32 %v2772_v28, %v2645_v3  ;;  %v548_v54 = vmul.f32 %v2796_v12, %v2649_v5  ;;  %v696_v39 = vsel %vm150_vm1, %v693_v51, %v695_v61  ;;  %v626_v24 = vmul.f32 %v2880_v53, %v2651_v6 }
  0x5b   :  { %v795_v63 = vadd.f32 %v772_v42, %v744_v14  ;;  %v517_v37 = vrot.slane %v497_v25, 1  ;;  %v616_v41 = vadd.f32 %v608_v17, %v589_v31  ;;  %v609_v44 = vmul.f32 %v2850_v35, %v2662_v13 }
  0x5c   :  { %v568_v48 = vrot.slane %v548_v54, 2  ;;  %v677_v40 = vmul.f32 %v2880_v53, %v2653_v7  ;;  %v646_v43 = vrot.slane %v626_v24, 1  ;;  %v755_v51 = vmul.f32 %v2966_v49, %v2679_v30 }
  0x5d   :  { %v846_v33 = vadd.f32 %v823_v26, %v795_v63  ;;  %v518_v45 = vsel %vm97_vm0, %v515_v1, %v517_v37  ;;  %v667_v38 = vadd.f32 %v645_v18, %v616_v41  ;;  %v774_v55 = vsel %vm97_vm0, %v771_v52, %v773_v34  ;;  %v2999_v63 = vld [vmem:[#allocation2 + $0x90] sm:$0xff] }
  0x5e   :  { %v539_v36 = vadd.f32 %v518_v45, %v480_v19  ;;  %v569_v50 = vsel %vm150_vm1, %v566_v60, %v568_v48  ;;  %v697_v56 = vrot.slane %v677_v40, 2  ;;  %v825_v59 = vsel %vm150_vm1, %v822_v0, %v824_v20 }
  0x5f   :  { %v854_v28 = vadd.f32 %v2736_v32, %v846_v33  ;;  %v738_v62 = vmul.f32 %v2932_v2, %v2677_v29  ;;  %v2979_v57 = vmul.f32 %v2672_v22, %v2966_v49  ;;  %v718_v8 = vadd.f32 %v696_v39, %v667_v38 }
  0x60   :  { %v590_v58 = vadd.f32 %v569_v50, %v539_v36  ;;  %v647_v1 = vsel %vm97_vm0, %v644_v16, %v646_v43  ;;  %v498_v60 = vmul.f32 %v2826_v46, %v2647_v4  ;;  %v698_v9 = vsel %vm150_vm1, %v695_v61, %v697_v56 }
  0x61   :  { %862 = vst [vmem:[#allocation7 + $0x40] sm:$0xff] %v854_v28  ;;  %v775_v42 = vrot.slane %v755_v51, 1  ;;  %v481_v52 = vmul.f32 %v2796_v12, %v2645_v3  ;;  %v549_v0 = vmul.f32 %v2826_v46, %v2649_v5  ;;  %v745_v10 = vadd.f32 %v737_v23, %v718_v8 }
  0x62   :  { %v617_v11 = vadd.f32 %v609_v44, %v590_v58  ;;  %v519_v14 = vrot.slane %v498_v60, 1  ;;  %v627_v15 = vmul.f32 %v2911_v47, %v2651_v6  ;;  %v826_v16 = vrot.slane %v2979_v57, 2 }
  0x63   :  { %v570_v21 = vrot.slane %v549_v0, 2  ;;  %v610_v26 = vmul.f32 %v2880_v53, %v2662_v13  ;;  %v2996_v61 = vmul.f32 %v2911_v47, %v2653_v7  ;;  %v796_v12 = vadd.f32 %v774_v55, %v745_v10 }
  0x64   :  { %v668_v27 = vadd.f32 %v647_v1, %v617_v11  ;;  %v520_v17 = vsel %vm97_vm0, %v517_v37, %v519_v14  ;;  %v648_v23 = vrot.slane %v627_v15, 1  ;;  %v756_v19 = vmul.f32 %v2999_v63, %v2679_v30 }
  0x65   :  { %v540_v18 = vadd.f32 %v520_v17, %v481_v52  ;;  %v571_v25 = vsel %vm150_vm1, %v568_v48, %v570_v21  ;;  %v699_v31 = vrot.slane %v2996_v61, 2  ;;  %v847_v54 = vadd.f32 %v825_v59, %v796_v12 }
  0x66   :  { %v719_v33 = vadd.f32 %v698_v9, %v668_v27  ;;  %v776_v39 = vsel %vm97_vm0, %v773_v34, %v775_v42  ;;  %v3008_v24 = vmul.f32 %v2672_v22, %v2999_v63  ;;  %v827_v37 = vsel %vm150_vm1, %v824_v20, %v826_v16 }
  0x67   :  { %v591_v41 = vadd.f32 %v571_v25, %v540_v18  ;;  %v739_v44 = vmul.f32 %v2966_v49, %v2677_v29  ;;  %v777_v48 = vrot.slane %v756_v19, 1  ;;  %v855_v40 = vadd.f32 %v2736_v32, %v847_v54 }
  0x68   :  { %v746_v28 = vadd.f32 %v738_v62, %v719_v33  ;;  %v649_v45 = vsel %vm97_vm0, %v646_v43, %v648_v23  ;;  %v499_v51 = vmul.f32 %v2850_v35, %v2647_v4  ;;  %v700_v38 = vsel %vm150_vm1, %v697_v56, %v699_v31 }
  0x69   :  { %v618_v34 = vadd.f32 %v610_v26, %v591_v41  ;;  %v482_v36 = vmul.f32 %v2826_v46, %v2645_v3  ;;  %v550_v20 = vmul.f32 %v2850_v35, %v2649_v5  ;;  %863 = vst [vmem:[#allocation7 + $0x48] sm:$0xff] %v855_v40  ;;  %v828_v55 = vrot.slane %v3008_v24, 2  ;;  %v3030_v46 = vld [vmem:[#allocation2 + $0x98] sm:$0xff] }
  0x6a   :  { %v797_v50 = vadd.f32 %v776_v39, %v746_v28  ;;  %v521_v59 = vrot.slane %v499_v51, 1  ;;  %v628_v43 = vmul.f32 %v2932_v2, %v2651_v6  ;;  %v778_v57 = vsel %vm97_vm0, %v775_v42, %v777_v48 }
  0x6b   :  { %v669_v62 = vadd.f32 %v649_v45, %v618_v34  ;;  %v572_v8 = vrot.slane %v550_v20, 2  ;;  %v3028_v56 = vmul.f32 %v2932_v2, %v2653_v7  ;;  %v757_v9 = vmul.f32 %v3030_v46, %v2679_v30  ;;  %v3063_v45 = vld [vmem:[#allocation2 + $0xa0] sm:$0xff] }
  0x6c   :  { %v848_v58 = vadd.f32 %v827_v37, %v797_v50  ;;  %v522_v1 = vsel %vm97_vm0, %v519_v14, %v521_v59  ;;  %v650_v60 = vrot.slane %v628_v43, 1  ;;  %v611_v42 = vmul.f32 %v2911_v47, %v2662_v13 }
  0x6d   :  { %v720_v52 = vadd.f32 %v700_v38, %v669_v62  ;;  %v541_v0 = vadd.f32 %v522_v1, %v482_v36  ;;  %v573_v10 = vsel %vm150_vm1, %v570_v21, %v572_v8  ;;  %v829_v15 = vsel %vm150_vm1, %v826_v16, %v828_v55 }
  0x6e   :  { %v856_v11 = vadd.f32 %v2736_v32, %v848_v58  ;;  %v701_v26 = vrot.slane %v3028_v56, 2  ;;  %v3043_v14 = vmul.f32 %v2672_v22, %v3030_v46  ;;  %v740_v27 = vmul.f32 %v2999_v63, %v2677_v29 }
  0x6f   :  { %v747_v61 = vadd.f32 %v739_v44, %v720_v52  ;;  %v592_v12 = vadd.f32 %v573_v10, %v541_v0  ;;  %v779_v17 = vrot.slane %v757_v9, 1  ;;  %v651_v21 = vsel %vm97_vm0, %v648_v23, %v650_v60 }
  0x70   :  { %864 = vst [vmem:[#allocation7 + $0x50] sm:$0xff] %v856_v11  ;;  %v483_v18 = vmul.f32 %v2850_v35, %v2645_v3  ;;  %v500_v16 = vmul.f32 %v2880_v53, %v2647_v4  ;;  %v551_v25 = vmul.f32 %v2880_v53, %v2649_v5  ;;  %v830_v33 = vrot.slane %v3043_v14, 2 }
  0x71   :  { %v798_v19 = vadd.f32 %v778_v57, %v747_v61  ;;  %v619_v54 = vadd.f32 %v611_v42, %v592_v12  ;;  %v629_v39 = vmul.f32 %v2966_v49, %v2651_v6  ;;  %v702_v24 = vsel %vm150_vm1, %v699_v31, %v701_v26 }
  0x72   :  { %v523_v37 = vrot.slane %v500_v16, 1  ;;  %v574_v23 = vrot.slane %v551_v25, 2  ;;  %v680_v35 = vmul.f32 %v2966_v49, %v2653_v7  ;;  %v780_v40 = vsel %vm97_vm0, %v777_v48, %v779_v17  ;;  %v3096_v16 = vld [vmem:[#allocation2 + $0xa8] sm:$0xff] }
  0x73   :  { %v849_v41 = vadd.f32 %v829_v15, %v798_v19  ;;  %v670_v44 = vadd.f32 %v651_v21, %v619_v54  ;;  %v612_v28 = vmul.f32 %v2932_v2, %v2662_v13  ;;  %v652_v38 = vrot.slane %v629_v39, 1 }
  0x74   :  { %v524_v51 = vsel %vm97_vm0, %v521_v59, %v523_v37  ;;  %v575_v34 = vsel %vm150_vm1, %v572_v8, %v574_v23  ;;  %v3069_v31 = vmul.f32 %v3063_v45, %v2679_v30  ;;  %v831_v50 = vsel %vm150_vm1, %v828_v55, %v830_v33 }
  0x75   :  { %v857_v36 = vadd.f32 %v2736_v32, %v849_v41  ;;  %v721_v20 = vadd.f32 %v702_v24, %v670_v44  ;;  %v542_v48 = vadd.f32 %v524_v51, %v483_v18  ;;  %v703_v43 = vrot.slane %v680_v35, 2 }
  0x76   :  { %v741_v62 = vmul.f32 %v3030_v46, %v2677_v29  ;;  %v781_v57 = vrot.slane %v3069_v31, 1  ;;  %v3078_v59 = vmul.f32 %v2672_v22, %v3063_v45  ;;  %v501_v58 = vmul.f32 %v2911_v47, %v2647_v4 }
  0x77   :  { %865 = vst [vmem:[#allocation7 + $0x58] sm:$0xff] %v857_v36  ;;  %v748_v8 = vadd.f32 %v740_v27, %v721_v20  ;;  %v593_v56 = vadd.f32 %v575_v34, %v542_v48  ;;  %v552_v55 = vmul.f32 %v2911_v47, %v2649_v5  ;;  %v653_v1 = vsel %vm97_vm0, %v650_v60, %v652_v38 }
  0x78   :  { %v832_v9 = vrot.slane %v3078_v59, 2  ;;  %v484_v52 = vmul.f32 %v2880_v53, %v2645_v3  ;;  %v630_v0 = vmul.f32 %v2999_v63, %v2651_v6  ;;  %v525_v11 = vrot.slane %v501_v58, 1 }
  0x79   :  { %v799_v10 = vadd.f32 %v780_v40, %v748_v8  ;;  %v620_v42 = vadd.f32 %v612_v28, %v593_v56  ;;  %v576_v15 = vrot.slane %v552_v55, 2  ;;  %v704_v14 = vsel %vm150_vm1, %v701_v26, %v703_v43 }
  0x7a   :  { %v782_v61 = vsel %vm97_vm0, %v779_v17, %v781_v57  ;;  %v654_v12 = vrot.slane %v630_v0, 1  ;;  %v681_v60 = vmul.f32 %v2999_v63, %v2653_v7  ;;  %v526_v18 = vsel %vm97_vm0, %v523_v37, %v525_v11 }
  0x7b   :  { %v850_v27 = vadd.f32 %v831_v50, %v799_v10  ;;  %v671_v21 = vadd.f32 %v653_v1, %v620_v42  ;;  %v577_v53 = vsel %vm150_vm1, %v574_v23, %v576_v15  ;;  %v543_v25 = vadd.f32 %v526_v18, %v484_v52  ;;  %v3131_v52 = vld [vmem:[#allocation2 + $0xb0] sm:$0xff] }
  0x7c   :  { %v613_v19 = vmul.f32 %v2966_v49, %v2662_v13  ;;  %v705_v54 = vrot.slane %v681_v60, 2  ;;  %v3102_v26 = vmul.f32 %v3096_v16, %v2679_v30  ;;  %v833_v24 = vsel %vm150_vm1, %v830_v33, %v832_v9 }
  0x7d   :  { %v858_v17 = vadd.f32 %v2736_v32, %v850_v27  ;;  %v722_v39 = vadd.f32 %v704_v14, %v671_v21  ;;  %v3108_v37 = vmul.f32 %v2672_v22, %v3096_v16  ;;  %v594_v23 = vadd.f32 %v577_v53, %v543_v25 }
  0x7e   :  { %v655_v35 = vsel %vm97_vm0, %v652_v38, %v654_v12  ;;  %v742_v41 = vmul.f32 %v3063_v45, %v2677_v29  ;;  %v502_v44 = vmul.f32 %v2932_v2, %v2647_v4  ;;  %v783_v28 = vrot.slane %v3102_v26, 1 }
  0x7f   :  { %866 = vst [vmem:[#allocation7 + $0x60] sm:$0xff] %v858_v17  ;;  %v749_v40 = vadd.f32 %v741_v62, %v722_v39  ;;  %v485_v33 = vmul.f32 %v2911_v47, %v2645_v3  ;;  %v553_v51 = vmul.f32 %v2932_v2, %v2649_v5  ;;  %v621_v34 = vadd.f32 %v613_v19, %v594_v23  ;;  %v3161_v23 = vld [vmem:[#allocation2 + $0xb8] sm:$0xff] }
  0x80   :  { %v706_v31 = vsel %vm150_vm1, %v703_v43, %v705_v54  ;;  %v527_v38 = vrot.slane %v502_v44, 1  ;;  %v631_v36 = vmul.f32 %v3030_v46, %v2651_v6  ;;  %v834_v50 = vrot.slane %v3108_v37, 2 }
  0x81   :  { %v800_v20 = vadd.f32 %v782_v61, %v749_v40  ;;  %v578_v48 = vrot.slane %v553_v51, 2  ;;  %v682_v62 = vmul.f32 %v3030_v46, %v2653_v7  ;;  %v672_v59 = vadd.f32 %v655_v35, %v621_v34 }
  0x82   :  { %v528_v47 = vsel %vm97_vm0, %v525_v11, %v527_v38  ;;  %v614_v8 = vmul.f32 %v2999_v63, %v2662_v13  ;;  %v656_v56 = vrot.slane %v631_v36, 1  ;;  %v784_v43 = vsel %vm97_vm0, %v781_v57, %v783_v28 }
  0x83   :  { %v851_v58 = vadd.f32 %v833_v24, %v800_v20  ;;  %v544_v55 = vadd.f32 %v528_v47, %v485_v33  ;;  %v579_v1 = vsel %vm150_vm1, %v576_v15, %v578_v48  ;;  %v723_v0 = vadd.f32 %v706_v31, %v672_v59 }
  0x84   :  { %v707_v10 = vrot.slane %v682_v62, 2  ;;  %v3135_v42 = vmul.f32 %v3131_v52, %v2679_v30  ;;  %v3139_v11 = vmul.f32 %v2672_v22, %v3131_v52  ;;  %v835_v61 = vsel %vm150_vm1, %v832_v9, %v834_v50  ;;  %v3172_v62 = vld [vmem:[#allocation5 + $0x8] ss:$0 sm:$0xff] }
  0x85   :  { %v859_v14 = vadd.f32 %v2736_v32, %v851_v58  ;;  %v595_v57 = vadd.f32 %v579_v1, %v544_v55  ;;  %v743_v15 = vmul.f32 %v3096_v16, %v2677_v29  ;;  %v750_v60 = vadd.f32 %v742_v41, %v723_v0 }
  0x86   :  { %v657_v27 = vsel %vm97_vm0, %v654_v12, %v656_v56  ;;  %v881_v21 = vmul.f32 %v2932_v2, %v2645_v3  ;;  %v898_v18 = vmul.f32 %v2966_v49, %v2647_v4  ;;  %v785_v53 = vrot.slane %v3135_v42, 1 }
  0x87   :  { %867 = vst [vmem:[#allocation7 + $0x68] sm:$0xff] %v859_v14  ;;  %v622_v22 = vadd.f32 %v614_v8, %v595_v57  ;;  %v949_v9 = vmul.f32 %v2966_v49, %v2649_v5  ;;  %v1027_v25 = vmul.f32 %v3063_v45, %v2651_v6  ;;  %v801_v19 = vadd.f32 %v784_v43, %v750_v60 }
  0x88   :  { %v708_v26 = vsel %vm150_vm1, %v705_v54, %v707_v10  ;;  %v836_v12 = vrot.slane %v3139_v11, 2  ;;  %v916_v17 = vrot.slane %v898_v18, 1  ;;  %v1010_v24 = vmul.f32 %v3030_v46, %v2662_v13 }
  0x89   :  { %v673_v2 = vadd.f32 %v657_v27, %v622_v22  ;;  %v967_v39 = vrot.slane %v949_v9, 2  ;;  %v1078_v37 = vmul.f32 %v3063_v45, %v2653_v7  ;;  %v852_v35 = vadd.f32 %v835_v61, %v801_v19  ;;  %v3198_v22 = vld [vmem:[#allocation2 + $0xc0] sm:$0xff] }
  0x8a   :  { %v917_v41 = vsel %vm97_vm0, %v527_v38, %v916_v17  ;;  %v1045_v44 = vrot.slane %v1027_v25, 1  ;;  %v3166_v54 = vmul.f32 %v3161_v23, %v2679_v30  ;;  %v786_v33 = vsel %vm97_vm0, %v783_v28, %v785_v53 }
  0x8b   :  { %v724_v40 = vadd.f32 %v708_v26, %v673_v2  ;;  %v940_v51 = vadd.f32 %v917_v41, %v881_v21  ;;  %v968_v34 = vsel %vm150_vm1, %v578_v48, %v967_v39  ;;  %v860_v31 = vadd.f32 %v2736_v32, %v852_v35 }
  0x8c   :  { %v837_v36 = vsel %vm150_vm1, %v834_v50, %v836_v12  ;;  %v1096_v20 = vrot.slane %v1078_v37, 2  ;;  %v3176_v38 = vmul.f32 %v3172_v62, %v3161_v23  ;;  %v1139_v8 = vmul.f32 %v3131_v52, %v2677_v29 }
  0x8d   :  { %v751_v59 = vadd.f32 %v743_v15, %v724_v40  ;;  %v991_v47 = vadd.f32 %v968_v34, %v940_v51  ;;  %v899_v28 = vmul.f32 %v2999_v63, %v2647_v4  ;;  %868 = vst [vmem:[#allocation7 + $0x70] sm:$0xff] %v860_v31  ;;  %v1046_v48 = vsel %vm97_vm0, %v656_v56, %v1045_v44 }
  0x8e   :  { %v1174_v50 = vrot.slane %v3166_v54, 1  ;;  %v882_v58 = vmul.f32 %v2966_v49, %v2645_v3  ;;  %v950_v43 = vmul.f32 %v2999_v63, %v2649_v5  ;;  %v1097_v0 = vsel %vm150_vm1, %v707_v10, %v1096_v20 }
  0x8f   :  { %v802_v55 = vadd.f32 %v786_v33, %v751_v59  ;;  %v1018_v1 = vadd.f32 %v1010_v24, %v991_v47  ;;  %v918_v42 = vrot.slane %v899_v28, 1  ;;  %v1225_v11 = vrot.slane %v3176_v38, 2  ;;  %v3229_v59 = vld [vmem:[#allocation2 + $0xc8] sm:$0xff] }
  0x90   :  { %v969_v14 = vrot.slane %v950_v43, 2  ;;  %v1028_v61 = vmul.f32 %v3096_v16, %v2651_v6  ;;  %v1079_v56 = vmul.f32 %v3096_v16, %v2653_v7  ;;  %v1011_v60 = vmul.f32 %v3063_v45, %v2662_v13 }
  0x91   :  { %v853_v57 = vadd.f32 %v837_v36, %v802_v55  ;;  %v1069_v15 = vadd.f32 %v1046_v48, %v1018_v1  ;;  %v919_v49 = vsel %vm97_vm0, %v916_v17, %v918_v42  ;;  %v3203_v19 = vmul.f32 %v3198_v22, %v2679_v30  ;;  %v3241_v1 = vld [vmem:[%s4205_s2] ss:$0 sm:$0xff] }
  0x92   :  { %v941_v27 = vadd.f32 %v919_v49, %v882_v58  ;;  %v970_v10 = vsel %vm150_vm1, %v967_v39, %v969_v14  ;;  %v1047_v21 = vrot.slane %v1028_v61, 1  ;;  %v1098_v18 = vrot.slane %v1079_v56, 2 }
  0x93   :  { %v861_v9 = vadd.f32 %v2736_v32, %v853_v57  ;;  %v1120_v25 = vadd.f32 %v1097_v0, %v1069_v15  ;;  %v3207_v26 = vmul.f32 %v3172_v62, %v3198_v22  ;;  %v1175_v17 = vsel %vm97_vm0, %v785_v53, %v1174_v50 }
  0x94   :  { %v1226_v2 = vsel %vm150_vm1, %v836_v12, %v1225_v11  ;;  %v992_v39 = vadd.f32 %v970_v10, %v941_v27  ;;  %v1140_v24 = vmul.f32 %v3161_v23, %v2677_v29  ;;  %v1048_v32 = vsel %vm97_vm0, %v1045_v44, %v1047_v21 }
  0x95   :  { %869 = vst [vmem:[#allocation7 + $0x78] sm:$0xff] %v861_v9  ;;  %v1147_v37 = vadd.f32 %v1139_v8, %v1120_v25  ;;  %v883_v35 = vmul.f32 %v2999_v63, %v2645_v3  ;;  %v900_v41 = vmul.f32 %v3030_v46, %v2647_v4  ;;  %v1176_v40 = vrot.slane %v3203_v19, 1 }
  0x96   :  { %v1019_v54 = vadd.f32 %v1011_v60, %v992_v39  ;;  %v951_v53 = vmul.f32 %v3030_v46, %v2649_v5  ;;  %v1029_v12 = vmul.f32 %v3131_v52, %v2651_v6  ;;  %v1099_v51 = vsel %vm150_vm1, %v1096_v20, %v1098_v18 }
  0x97   :  { %v1198_v33 = vadd.f32 %v1175_v17, %v1147_v37  ;;  %v1227_v44 = vrot.slane %v3207_v26, 2  ;;  %v920_v34 = vrot.slane %v900_v41, 1  ;;  %v1012_v36 = vmul.f32 %v3096_v16, %v2662_v13 }
  0x98   :  { %v1070_v31 = vadd.f32 %v1048_v32, %v1019_v54  ;;  %v971_v63 = vrot.slane %v951_v53, 2  ;;  %v1080_v38 = vmul.f32 %v3131_v52, %v2653_v7  ;;  %v1049_v28 = vrot.slane %v1029_v12, 1  ;;  %v3269_v54 = vld [vmem:[#allocation2 + $0xd0] sm:$0xff] }
  0x99   :  { %v1249_v47 = vadd.f32 %v1226_v2, %v1198_v33  ;;  %v921_v8 = vsel %vm97_vm0, %v918_v42, %v920_v34  ;;  %v3234_v20 = vmul.f32 %v3229_v59, %v2679_v30  ;;  %v1177_v58 = vsel %vm97_vm0, %v1174_v50, %v1176_v40 }
  0x9a   :  { %v1121_v48 = vadd.f32 %v1099_v51, %v1070_v31  ;;  %v942_v43 = vadd.f32 %v921_v8, %v883_v35  ;;  %v972_v55 = vsel %vm150_vm1, %v969_v14, %v971_v63  ;;  %v1228_v42 = vsel %vm150_vm1, %v1225_v11, %v1227_v44 }
  0x9b   :  { %v1257_v0 = vadd.f32 %v3241_v1, %v1249_v47  ;;  %v1100_v61 = vrot.slane %v1080_v38, 2  ;;  %v3247_v56 = vmul.f32 %v3172_v62, %v3229_v59  ;;  %v1141_v50 = vmul.f32 %v3198_v22, %v2677_v29 }
  0x9c   :  { %v1148_v57 = vadd.f32 %v1140_v24, %v1121_v48  ;;  %v993_v15 = vadd.f32 %v972_v55, %v942_v43  ;;  %v901_v14 = vmul.f32 %v3063_v45, %v2647_v4  ;;  %v1050_v49 = vsel %vm97_vm0, %v1047_v21, %v1049_v28 }
  0x9d   :  { %1265 = vst [vmem:[#allocation7 + $0x80] sm:$0xff] %v1257_v0  ;;  %v1178_v60 = vrot.slane %v3234_v20, 1  ;;  %v884_v11 = vmul.f32 %v3030_v46, %v2645_v3  ;;  %v952_v27 = vmul.f32 %v3063_v45, %v2649_v5  ;;  %v1101_v25 = vsel %vm150_vm1, %v1098_v18, %v1100_v61 }
  0x9e   :  { %v1199_v10 = vadd.f32 %v1177_v58, %v1148_v57  ;;  %v1020_v9 = vadd.f32 %v1012_v36, %v993_v15  ;;  %v922_v19 = vrot.slane %v901_v14, 1  ;;  %v1229_v26 = vrot.slane %v3247_v56, 2  ;;  %v3300_v15 = vld [vmem:[#allocation2 + $0xd8] sm:$0xff] }
  0x9f   :  { %v973_v17 = vrot.slane %v952_v27, 2  ;;  %v1030_v2 = vmul.f32 %v3161_v23, %v2651_v6  ;;  %v1081_v21 = vmul.f32 %v3161_v23, %v2653_v7  ;;  %v1013_v37 = vmul.f32 %v3131_v52, %v2662_v13 }
  0xa0   :  { %v1250_v39 = vadd.f32 %v1228_v42, %v1199_v10  ;;  %v1071_v24 = vadd.f32 %v1050_v49, %v1020_v9  ;;  %v923_v46 = vsel %vm97_vm0, %v920_v34, %v922_v19  ;;  %v3274_v33 = vmul.f32 %v3269_v54, %v2679_v30 }
  0xa1   :  { %v943_v32 = vadd.f32 %v923_v46, %v884_v11  ;;  %v974_v18 = vsel %vm150_vm1, %v971_v63, %v973_v17  ;;  %v1051_v35 = vrot.slane %v1030_v2, 1  ;;  %v1102_v41 = vrot.slane %v1081_v21, 2 }
  0xa2   :  { %v1258_v53 = vadd.f32 %v3241_v1, %v1250_v39  ;;  %v1122_v12 = vadd.f32 %v1101_v25, %v1071_v24  ;;  %v3278_v51 = vmul.f32 %v3172_v62, %v3269_v54  ;;  %v1179_v34 = vsel %vm97_vm0, %v1176_v40, %v1178_v60 }
  0xa3   :  { %v1230_v31 = vsel %vm150_vm1, %v1227_v44, %v1229_v26  ;;  %v994_v63 = vadd.f32 %v974_v18, %v943_v32  ;;  %v1142_v36 = vmul.f32 %v3229_v59, %v2677_v29  ;;  %v1052_v47 = vsel %vm97_vm0, %v1049_v28, %v1051_v35 }
  0xa4   :  { %1266 = vst [vmem:[#allocation7 + $0x88] sm:$0xff] %v1258_v53  ;;  %v1149_v38 = vadd.f32 %v1141_v50, %v1122_v12  ;;  %v885_v8 = vmul.f32 %v3063_v45, %v2645_v3  ;;  %v902_v20 = vmul.f32 %v3096_v16, %v2647_v4  ;;  %v1180_v58 = vrot.slane %v3274_v33, 1 }
  0xa5   :  { %v1021_v48 = vadd.f32 %v1013_v37, %v994_v63  ;;  %v953_v40 = vmul.f32 %v3096_v16, %v2649_v5  ;;  %v1031_v44 = vmul.f32 %v3198_v22, %v2651_v6  ;;  %v1103_v55 = vsel %vm150_vm1, %v1100_v61, %v1102_v41 }
  0xa6   :  { %v1200_v43 = vadd.f32 %v1179_v34, %v1149_v38  ;;  %v1231_v28 = vrot.slane %v3278_v51, 2  ;;  %v924_v0 = vrot.slane %v902_v20, 1  ;;  %v1014_v56 = vmul.f32 %v3161_v23, %v2662_v13 }
  0xa7   :  { %v1072_v42 = vadd.f32 %v1052_v47, %v1021_v48  ;;  %v975_v45 = vrot.slane %v953_v40, 2  ;;  %v1082_v57 = vmul.f32 %v3198_v22, %v2653_v7  ;;  %v1053_v49 = vrot.slane %v1031_v44, 1  ;;  %v3335_v48 = vld [vmem:[#allocation2 + $0xe0] sm:$0xff] }
  0xa8   :  { %v1251_v50 = vadd.f32 %v1230_v31, %v1200_v43  ;;  %v925_v14 = vsel %vm97_vm0, %v922_v19, %v924_v0  ;;  %v3305_v61 = vmul.f32 %v3300_v15, %v2679_v30  ;;  %v1181_v27 = vsel %vm97_vm0, %v1178_v60, %v1180_v58 }
  0xa9   :  { %v1123_v11 = vadd.f32 %v1103_v55, %v1072_v42  ;;  %v944_v10 = vadd.f32 %v925_v14, %v885_v8  ;;  %v976_v9 = vsel %vm150_vm1, %v973_v17, %v975_v45  ;;  %v1232_v2 = vsel %vm150_vm1, %v1229_v26, %v1231_v28 }
  0xaa   :  { %v1259_v25 = vadd.f32 %v3241_v1, %v1251_v50  ;;  %v1104_v21 = vrot.slane %v1082_v57, 2  ;;  %v3313_v39 = vmul.f32 %v3172_v62, %v3300_v15  ;;  %v1143_v46 = vmul.f32 %v3269_v54, %v2677_v29 }
  0xab   :  { %v1150_v19 = vadd.f32 %v1142_v36, %v1123_v11  ;;  %v995_v24 = vadd.f32 %v976_v9, %v944_v10  ;;  %v903_v60 = vmul.f32 %v3131_v52, %v2647_v4  ;;  %v1054_v17 = vsel %vm97_vm0, %v1051_v35, %v1053_v49 }
  0xac   :  { %1267 = vst [vmem:[#allocation7 + $0x90] sm:$0xff] %v1259_v25  ;;  %v1182_v37 = vrot.slane %v3305_v61, 1  ;;  %v886_v26 = vmul.f32 %v3096_v16, %v2645_v3  ;;  %v954_v32 = vmul.f32 %v3131_v52, %v2649_v5  ;;  %v1105_v12 = vsel %vm150_vm1, %v1102_v41, %v1104_v21 }
  0xad   :  { %v1201_v18 = vadd.f32 %v1181_v27, %v1150_v19  ;;  %v1022_v53 = vadd.f32 %v1014_v56, %v995_v24  ;;  %v926_v33 = vrot.slane %v903_v60, 1  ;;  %v1233_v51 = vrot.slane %v3313_v39, 2  ;;  %v3366_v24 = vld [vmem:[#allocation2 + $0xe8] sm:$0xff] }
  0xae   :  { %v977_v34 = vrot.slane %v954_v32, 2  ;;  %v1032_v31 = vmul.f32 %v3229_v59, %v2651_v6  ;;  %v1083_v35 = vmul.f32 %v3229_v59, %v2653_v7  ;;  %v1015_v38 = vmul.f32 %v3198_v22, %v2662_v13 }
  0xaf   :  { %v1252_v63 = vadd.f32 %v1232_v2, %v1201_v18  ;;  %v1073_v36 = vadd.f32 %v1054_v17, %v1022_v53  ;;  %v927_v16 = vsel %vm97_vm0, %v924_v0, %v926_v33  ;;  %v3340_v43 = vmul.f32 %v3335_v48, %v2679_v30 }
  0xb0   :  { %v945_v47 = vadd.f32 %v927_v16, %v886_v26  ;;  %v978_v41 = vsel %vm150_vm1, %v975_v45, %v977_v34  ;;  %v1055_v8 = vrot.slane %v1032_v31, 1  ;;  %v1106_v20 = vrot.slane %v1083_v35, 2 }
  0xb1   :  { %v1260_v40 = vadd.f32 %v3241_v1, %v1252_v63  ;;  %v1124_v44 = vadd.f32 %v1105_v12, %v1073_v36  ;;  %v3344_v55 = vmul.f32 %v3172_v62, %v3335_v48  ;;  %v1183_v0 = vsel %vm97_vm0, %v1180_v58, %v1182_v37 }
  0xb2   :  { %v1234_v42 = vsel %vm150_vm1, %v1231_v28, %v1233_v51  ;;  %v996_v45 = vadd.f32 %v978_v41, %v945_v47  ;;  %v1144_v56 = vmul.f32 %v3300_v15, %v2677_v29  ;;  %v1056_v50 = vsel %vm97_vm0, %v1053_v49, %v1055_v8 }
  0xb3   :  { %1268 = vst [vmem:[#allocation7 + $0x98] sm:$0xff] %v1260_v40  ;;  %v1151_v57 = vadd.f32 %v1143_v46, %v1124_v44  ;;  %v887_v14 = vmul.f32 %v3131_v52, %v2645_v3  ;;  %v904_v61 = vmul.f32 %v3161_v23, %v2647_v4  ;;  %v1184_v27 = vrot.slane %v3340_v43, 1 }
  0xb4   :  { %v1023_v11 = vadd.f32 %v1015_v38, %v996_v45  ;;  %v955_v58 = vmul.f32 %v3161_v23, %v2649_v5  ;;  %v1033_v28 = vmul.f32 %v3269_v54, %v2651_v6  ;;  %v1107_v9 = vsel %vm150_vm1, %v1104_v21, %v1106_v20 }
  0xb5   :  { %v1202_v10 = vadd.f32 %v1183_v0, %v1151_v57  ;;  %v1235_v49 = vrot.slane %v3344_v55, 2  ;;  %v928_v25 = vrot.slane %v904_v61, 1  ;;  %v1016_v39 = vmul.f32 %v3229_v59, %v2662_v13 }
  0xb6   :  { %v1074_v2 = vadd.f32 %v1056_v50, %v1023_v11  ;;  %v979_v52 = vrot.slane %v955_v58, 2  ;;  %v1084_v19 = vmul.f32 %v3269_v54, %v2653_v7  ;;  %v1057_v17 = vrot.slane %v1033_v28, 1  ;;  %v3401_v11 = vld [vmem:[#allocation2 + $0xf0] sm:$0xff] }
  0xb7   :  { %v1253_v46 = vadd.f32 %v1234_v42, %v1202_v10  ;;  %v929_v60 = vsel %vm97_vm0, %v926_v33, %v928_v25  ;;  %v3371_v21 = vmul.f32 %v3366_v24, %v2679_v30  ;;  %v1185_v32 = vsel %vm97_vm0, %v1182_v37, %v1184_v27 }
  0xb8   :  { %v1125_v26 = vadd.f32 %v1107_v9, %v1074_v2  ;;  %v946_v18 = vadd.f32 %v929_v60, %v887_v14  ;;  %v980_v53 = vsel %vm150_vm1, %v977_v34, %v979_v52  ;;  %v1236_v31 = vsel %vm150_vm1, %v1233_v51, %v1235_v49 }
  0xb9   :  { %v1261_v12 = vadd.f32 %v3241_v1, %v1253_v46  ;;  %v1108_v35 = vrot.slane %v1084_v19, 2  ;;  %v3379_v63 = vmul.f32 %v3172_v62, %v3366_v24  ;;  %v1145_v16 = vmul.f32 %v3335_v48, %v2677_v29 }
  0xba   :  { %v1152_v33 = vadd.f32 %v1144_v56, %v1125_v26  ;;  %v997_v36 = vadd.f32 %v980_v53, %v946_v18  ;;  %v905_v37 = vmul.f32 %v3198_v22, %v2647_v4  ;;  %v1058_v34 = vsel %vm97_vm0, %v1055_v8, %v1057_v17 }
  0xbb   :  { %1269 = vst [vmem:[#allocation7 + $0xa0] sm:$0xff] %v1261_v12  ;;  %v1186_v38 = vrot.slane %v3371_v21, 1  ;;  %v888_v51 = vmul.f32 %v3161_v23, %v2645_v3  ;;  %v956_v47 = vmul.f32 %v3198_v22, %v2649_v5  ;;  %v1109_v44 = vsel %vm150_vm1, %v1106_v20, %v1108_v35 }
  0xbc   :  { %v1203_v41 = vadd.f32 %v1185_v32, %v1152_v33  ;;  %v1024_v40 = vadd.f32 %v1016_v39, %v997_v36  ;;  %v930_v43 = vrot.slane %v905_v37, 1  ;;  %v1237_v55 = vrot.slane %v3379_v63, 2  ;;  %v3432_v36 = vld [vmem:[#allocation2 + $0xf8] sm:$0xff] }
  0xbd   :  { %v981_v0 = vrot.slane %v956_v47, 2  ;;  %v1034_v42 = vmul.f32 %v3300_v15, %v2651_v6  ;;  %v1085_v8 = vmul.f32 %v3300_v15, %v2653_v7  ;;  %v1017_v57 = vmul.f32 %v3269_v54, %v2662_v13 }
  0xbe   :  { %v1254_v45 = vadd.f32 %v1236_v31, %v1203_v41  ;;  %v1075_v56 = vadd.f32 %v1058_v34, %v1024_v40  ;;  %v931_v23 = vsel %vm97_vm0, %v928_v25, %v930_v43  ;;  %v3406_v10 = vmul.f32 %v3401_v11, %v2679_v30 }
  0xbf   :  { %v947_v50 = vadd.f32 %v931_v23, %v888_v51  ;;  %v982_v20 = vsel %vm150_vm1, %v979_v52, %v981_v0  ;;  %v1059_v14 = vrot.slane %v1034_v42, 1  ;;  %v1110_v61 = vrot.slane %v1085_v8, 2 }
  0xc0   :  { %v1262_v58 = vadd.f32 %v3241_v1, %v1254_v45  ;;  %v1126_v28 = vadd.f32 %v1109_v44, %v1075_v56  ;;  %v3410_v9 = vmul.f32 %v3172_v62, %v3401_v11  ;;  %v1187_v25 = vsel %vm97_vm0, %v1184_v27, %v1186_v38 }
  0xc1   :  { %v1238_v2 = vsel %vm150_vm1, %v1235_v49, %v1237_v55  ;;  %v998_v52 = vadd.f32 %v982_v20, %v947_v50  ;;  %v1146_v39 = vmul.f32 %v3366_v24, %v2677_v29  ;;  %v1060_v46 = vsel %vm97_vm0, %v1057_v17, %v1059_v14 }
  0xc2   :  { %1270 = vst [vmem:[#allocation7 + $0xa8] sm:$0xff] %v1262_v58  ;;  %v1153_v19 = vadd.f32 %v1145_v16, %v1126_v28  ;;  %v1284_v60 = vmul.f32 %v3198_v22, %v2645_v3  ;;  %v1301_v21 = vmul.f32 %v3229_v59, %v2647_v4  ;;  %v1188_v32 = vrot.slane %v3406_v10, 1 }
  0xc3   :  { %v1025_v26 = vadd.f32 %v1017_v57, %v998_v52  ;;  %v1352_v27 = vmul.f32 %v3229_v59, %v2649_v5  ;;  %v1430_v49 = vmul.f32 %v3335_v48, %v2651_v6  ;;  %v1111_v53 = vsel %vm150_vm1, %v1108_v35, %v1110_v61 }
  0xc4   :  { %v1204_v18 = vadd.f32 %v1187_v25, %v1153_v19  ;;  %v1239_v17 = vrot.slane %v3410_v9, 2  ;;  %v1319_v12 = vrot.slane %v1301_v21, 1  ;;  %v1413_v63 = vmul.f32 %v3300_v15, %v2662_v13 }
  0xc5   :  { %v1076_v31 = vadd.f32 %v1060_v46, %v1025_v26  ;;  %v1370_v22 = vrot.slane %v1352_v27, 2  ;;  %v1481_v33 = vmul.f32 %v3335_v48, %v2653_v7  ;;  %v1448_v34 = vrot.slane %v1430_v49, 1  ;;  %v3467_v26 = vld [vmem:[#allocation2 + $0x100] sm:$0xff] }
  0xc6   :  { %v1255_v16 = vadd.f32 %v1238_v2, %v1204_v18  ;;  %v1320_v37 = vsel %vm97_vm0, %v930_v43, %v1319_v12  ;;  %v3437_v35 = vmul.f32 %v3432_v36, %v2679_v30  ;;  %v1189_v47 = vsel %vm97_vm0, %v1186_v38, %v1188_v32 }
  0xc7   :  { %v1127_v51 = vadd.f32 %v1111_v53, %v1076_v31  ;;  %v1343_v41 = vadd.f32 %v1320_v37, %v1284_v60  ;;  %v1371_v40 = vsel %vm150_vm1, %v981_v0, %v1370_v22  ;;  %v1240_v42 = vsel %vm150_vm1, %v1237_v55, %v1239_v17 }
  0xc8   :  { %v1263_v44 = vadd.f32 %v3241_v1, %v1255_v16  ;;  %v1499_v8 = vrot.slane %v1481_v33, 2  ;;  %v3445_v45 = vmul.f32 %v3172_v62, %v3432_v36  ;;  %v1542_v23 = vmul.f32 %v3401_v11, %v2677_v29 }
  0xc9   :  { %v1154_v43 = vadd.f32 %v1146_v39, %v1127_v51  ;;  %v1394_v56 = vadd.f32 %v1371_v40, %v1343_v41  ;;  %v1302_v38 = vmul.f32 %v3269_v54, %v2647_v4  ;;  %v1449_v0 = vsel %vm97_vm0, %v1059_v14, %v1448_v34 }
  0xca   :  { %1271 = vst [vmem:[#allocation7 + $0xb0] sm:$0xff] %v1263_v44  ;;  %v1577_v57 = vrot.slane %v3437_v35, 1  ;;  %v1285_v55 = vmul.f32 %v3229_v59, %v2645_v3  ;;  %v1353_v50 = vmul.f32 %v3269_v54, %v2649_v5  ;;  %v1500_v28 = vsel %vm150_vm1, %v1110_v61, %v1499_v8 }
  0xcb   :  { %v1205_v20 = vadd.f32 %v1189_v47, %v1154_v43  ;;  %v1421_v58 = vadd.f32 %v1413_v63, %v1394_v56  ;;  %v1321_v10 = vrot.slane %v1302_v38, 1  ;;  %v1628_v9 = vrot.slane %v3445_v45, 2  ;;  %v3498_v56 = vld [vmem:[#allocation2 + $0x108] sm:$0xff] }
  0xcc   :  { %v1372_v25 = vrot.slane %v1353_v50, 2  ;;  %v1431_v2 = vmul.f32 %v3366_v24, %v2651_v6  ;;  %v1482_v14 = vmul.f32 %v3366_v24, %v2653_v7  ;;  %v1414_v19 = vmul.f32 %v3335_v48, %v2662_v13 }
  0xcd   :  { %v1256_v52 = vadd.f32 %v1240_v42, %v1205_v20  ;;  %v1472_v39 = vadd.f32 %v1449_v0, %v1421_v58  ;;  %v1322_v59 = vsel %vm97_vm0, %v1319_v12, %v1321_v10  ;;  %v3472_v18 = vmul.f32 %v3467_v26, %v2679_v30 }
  0xce   :  { %v1344_v46 = vadd.f32 %v1322_v59, %v1285_v55  ;;  %v1373_v61 = vsel %vm150_vm1, %v1370_v22, %v1372_v25  ;;  %v1450_v60 = vrot.slane %v1431_v2, 1  ;;  %v1501_v21 = vrot.slane %v1482_v14, 2 }
  0xcf   :  { %v1264_v27 = vadd.f32 %v3241_v1, %v1256_v52  ;;  %v1523_v49 = vadd.f32 %v1500_v28, %v1472_v39  ;;  %v3476_v53 = vmul.f32 %v3172_v62, %v3467_v26  ;;  %v1578_v12 = vsel %vm97_vm0, %v1188_v32, %v1577_v57 }
  0xd0   :  { %v1629_v31 = vsel %vm150_vm1, %v1239_v17, %v1628_v9  ;;  %v1395_v22 = vadd.f32 %v1373_v61, %v1344_v46  ;;  %v1543_v63 = vmul.f32 %v3432_v36, %v2677_v29  ;;  %v1451_v16 = vsel %vm97_vm0, %v1448_v34, %v1450_v60 }
  0xd1   :  { %1272 = vst [vmem:[#allocation7 + $0xb8] sm:$0xff] %v1264_v27  ;;  %v1550_v33 = vadd.f32 %v1542_v23, %v1523_v49  ;;  %v1286_v37 = vmul.f32 %v3269_v54, %v2645_v3  ;;  %v1303_v35 = vmul.f32 %v3300_v15, %v2647_v4  ;;  %v1579_v47 = vrot.slane %v3472_v18, 1 }
  0xd2   :  { %v1422_v51 = vadd.f32 %v1414_v19, %v1395_v22  ;;  %v1354_v32 = vmul.f32 %v3300_v15, %v2649_v5  ;;  %v1432_v17 = vmul.f32 %v3401_v11, %v2651_v6  ;;  %v1502_v40 = vsel %vm150_vm1, %v1499_v8, %v1501_v21 }
  0xd3   :  { %v1601_v41 = vadd.f32 %v1578_v12, %v1550_v33  ;;  %v1630_v34 = vrot.slane %v3476_v53, 2  ;;  %v1323_v44 = vrot.slane %v1303_v35, 1  ;;  %v1415_v45 = vmul.f32 %v3366_v24, %v2662_v13 }
  0xd4   :  { %v1473_v42 = vadd.f32 %v1451_v16, %v1422_v51  ;;  %v1374_v54 = vrot.slane %v1354_v32, 2  ;;  %v1483_v43 = vmul.f32 %v3401_v11, %v2653_v7  ;;  %v1452_v0 = vrot.slane %v1432_v17, 1  ;;  %v3533_v51 = vld [vmem:[#allocation2 + $0x110] sm:$0xff] }
  0xd5   :  { %v1652_v23 = vadd.f32 %v1629_v31, %v1601_v41  ;;  %v1324_v38 = vsel %vm97_vm0, %v1321_v10, %v1323_v44  ;;  %v3503_v8 = vmul.f32 %v3498_v56, %v2679_v30  ;;  %v1580_v50 = vsel %vm97_vm0, %v1577_v57, %v1579_v47 }
  0xd6   :  { %v1524_v55 = vadd.f32 %v1502_v40, %v1473_v42  ;;  %v1345_v20 = vadd.f32 %v1324_v38, %v1286_v37  ;;  %v1375_v58 = vsel %vm150_vm1, %v1372_v25, %v1374_v54  ;;  %v1631_v2 = vsel %vm150_vm1, %v1628_v9, %v1630_v34 }
  0xd7   :  { %v1660_v28 = vadd.f32 %v3241_v1, %v1652_v23  ;;  %v1503_v14 = vrot.slane %v1483_v43, 2  ;;  %v3511_v52 = vmul.f32 %v3172_v62, %v3498_v56  ;;  %v1544_v59 = vmul.f32 %v3467_v26, %v2677_v29 }
  0xd8   :  { %v1551_v10 = vadd.f32 %v1543_v63, %v1524_v55  ;;  %v1396_v39 = vadd.f32 %v1375_v58, %v1345_v20  ;;  %v1304_v57 = vmul.f32 %v3335_v48, %v2647_v4  ;;  %v1453_v25 = vsel %vm97_vm0, %v1450_v60, %v1452_v0 }
  0xd9   :  { %1668 = vst [vmem:[#allocation7 + $0xc0] sm:$0xff] %v1660_v28  ;;  %v1581_v19 = vrot.slane %v3503_v8, 1  ;;  %v1287_v9 = vmul.f32 %v3300_v15, %v2645_v3  ;;  %v1355_v46 = vmul.f32 %v3335_v48, %v2649_v5  ;;  %v1504_v49 = vsel %vm150_vm1, %v1501_v21, %v1503_v14 }
  0xda   :  { %v1602_v61 = vadd.f32 %v1580_v50, %v1551_v10  ;;  %v1423_v27 = vadd.f32 %v1415_v45, %v1396_v39  ;;  %v1325_v18 = vrot.slane %v1304_v57, 1  ;;  %v1632_v53 = vrot.slane %v3511_v52, 2  ;;  %v3564_v39 = vld [vmem:[#allocation2 + $0x118] sm:$0xff] }
  0xdb   :  { %v1376_v12 = vrot.slane %v1355_v46, 2  ;;  %v1433_v31 = vmul.f32 %v3432_v36, %v2651_v6  ;;  %v1484_v60 = vmul.f32 %v3432_v36, %v2653_v7  ;;  %v1416_v33 = vmul.f32 %v3401_v11, %v2662_v13 }
  0xdc   :  { %v1653_v22 = vadd.f32 %v1631_v2, %v1602_v61  ;;  %v1474_v63 = vadd.f32 %v1453_v25, %v1423_v27  ;;  %v1326_v15 = vsel %vm97_vm0, %v1323_v44, %v1325_v18  ;;  %v3538_v41 = vmul.f32 %v3533_v51, %v2679_v30 }
  0xdd   :  { %v1346_v16 = vadd.f32 %v1326_v15, %v1287_v9  ;;  %v1377_v21 = vsel %vm150_vm1, %v1374_v54, %v1376_v12  ;;  %v1454_v37 = vrot.slane %v1433_v31, 1  ;;  %v1505_v35 = vrot.slane %v1484_v60, 2 }
  0xde   :  { %v1661_v32 = vadd.f32 %v3241_v1, %v1653_v22  ;;  %v1525_v17 = vadd.f32 %v1504_v49, %v1474_v63  ;;  %v3542_v40 = vmul.f32 %v3172_v62, %v3533_v51  ;;  %v1582_v44 = vsel %vm97_vm0, %v1579_v47, %v1581_v19 }
  0xdf   :  { %v1633_v42 = vsel %vm150_vm1, %v1630_v34, %v1632_v53  ;;  %v1397_v54 = vadd.f32 %v1377_v21, %v1346_v16  ;;  %v1545_v45 = vmul.f32 %v3498_v56, %v2677_v29  ;;  %v1455_v23 = vsel %vm97_vm0, %v1452_v0, %v1454_v37 }
  0xe0   :  { %1669 = vst [vmem:[#allocation7 + $0xc8] sm:$0xff] %v1661_v32  ;;  %v1552_v43 = vadd.f32 %v1544_v59, %v1525_v17  ;;  %v1288_v38 = vmul.f32 %v3335_v48, %v2645_v3  ;;  %v1305_v8 = vmul.f32 %v3366_v24, %v2647_v4  ;;  %v1583_v50 = vrot.slane %v3538_v41, 1 }
  0xe1   :  { %v1424_v55 = vadd.f32 %v1416_v33, %v1397_v54  ;;  %v1356_v47 = vmul.f32 %v3366_v24, %v2649_v5  ;;  %v1434_v34 = vmul.f32 %v3467_v26, %v2651_v6  ;;  %v1506_v58 = vsel %vm150_vm1, %v1503_v14, %v1505_v35 }
  0xe2   :  { %v1603_v20 = vadd.f32 %v1582_v44, %v1552_v43  ;;  %v1634_v0 = vrot.slane %v3542_v40, 2  ;;  %v1327_v28 = vrot.slane %v1305_v8, 1  ;;  %v1417_v52 = vmul.f32 %v3432_v36, %v2662_v13 }
  0xe3   :  { %v1475_v2 = vadd.f32 %v1455_v23, %v1424_v55  ;;  %v1378_v48 = vrot.slane %v1356_v47, 2  ;;  %v1485_v10 = vmul.f32 %v3467_v26, %v2653_v7  ;;  %v1456_v25 = vrot.slane %v1434_v34, 1  ;;  %v3599_v55 = vld [vmem:[#allocation2 + $0x120] sm:$0xff] }
  0xe4   :  { %v1654_v59 = vadd.f32 %v1633_v42, %v1603_v20  ;;  %v1328_v57 = vsel %vm97_vm0, %v1325_v18, %v1327_v28  ;;  %v3569_v14 = vmul.f32 %v3564_v39, %v2679_v30  ;;  %v1584_v46 = vsel %vm97_vm0, %v1581_v19, %v1583_v50 }
  0xe5   :  { %v1526_v9 = vadd.f32 %v1506_v58, %v1475_v2  ;;  %v1347_v61 = vadd.f32 %v1328_v57, %v1288_v38  ;;  %v1379_v27 = vsel %vm150_vm1, %v1376_v12, %v1378_v48  ;;  %v1635_v31 = vsel %vm150_vm1, %v1632_v53, %v1634_v0 }
  0xe6   :  { %v1662_v49 = vadd.f32 %v3241_v1, %v1654_v59  ;;  %v1507_v60 = vrot.slane %v1485_v10, 2  ;;  %v3577_v22 = vmul.f32 %v3172_v62, %v3564_v39  ;;  %v1546_v15 = vmul.f32 %v3533_v51, %v2677_v29 }
  0xe7   :  { %v1553_v18 = vadd.f32 %v1545_v45, %v1526_v9  ;;  %v1398_v63 = vadd.f32 %v1379_v27, %v1347_v61  ;;  %v1306_v19 = vmul.f32 %v3401_v11, %v2647_v4  ;;  %v1457_v12 = vsel %vm97_vm0, %v1454_v37, %v1456_v25 }
  0xe8   :  { %1670 = vst [vmem:[#allocation7 + $0xd0] sm:$0xff] %v1662_v49  ;;  %v1585_v33 = vrot.slane %v3569_v14, 1  ;;  %v1289_v53 = vmul.f32 %v3366_v24, %v2645_v3  ;;  %v1357_v16 = vmul.f32 %v3401_v11, %v2649_v5  ;;  %v1508_v17 = vsel %vm150_vm1, %v1505_v35, %v1507_v60 }
  0xe9   :  { %v1604_v21 = vadd.f32 %v1584_v46, %v1553_v18  ;;  %v1425_v32 = vadd.f32 %v1417_v52, %v1398_v63  ;;  %v1329_v41 = vrot.slane %v1306_v19, 1  ;;  %v1636_v40 = vrot.slane %v3577_v22, 2  ;;  %v3630_v63 = vld [vmem:[#allocation2 + $0x128] sm:$0xff] }
  0xea   :  { %v1380_v44 = vrot.slane %v1357_v16, 2  ;;  %v1435_v42 = vmul.f32 %v3498_v56, %v2651_v6  ;;  %v1486_v37 = vmul.f32 %v3498_v56, %v2653_v7  ;;  %v1418_v43 = vmul.f32 %v3467_v26, %v2662_v13 }
  0xeb   :  { %v1655_v54 = vadd.f32 %v1635_v31, %v1604_v21  ;;  %v1476_v45 = vadd.f32 %v1457_v12, %v1425_v32  ;;  %v1330_v24 = vsel %vm97_vm0, %v1327_v28, %v1329_v41  ;;  %v3604_v20 = vmul.f32 %v3599_v55, %v2679_v30 }
  0xec   :  { %v1348_v23 = vadd.f32 %v1330_v24, %v1289_v53  ;;  %v1381_v35 = vsel %vm150_vm1, %v1378_v48, %v1380_v44  ;;  %v1458_v38 = vrot.slane %v1435_v42, 1  ;;  %v1509_v8 = vrot.slane %v1486_v37, 2 }
  0xed   :  { %v1663_v47 = vadd.f32 %v3241_v1, %v1655_v54  ;;  %v1527_v34 = vadd.f32 %v1508_v17, %v1476_v45  ;;  %v3608_v58 = vmul.f32 %v3172_v62, %v3599_v55  ;;  %v1586_v28 = vsel %vm97_vm0, %v1583_v50, %v1585_v33 }
  0xee   :  { %v1637_v2 = vsel %vm150_vm1, %v1634_v0, %v1636_v40  ;;  %v1399_v48 = vadd.f32 %v1381_v35, %v1348_v23  ;;  %v1547_v52 = vmul.f32 %v3564_v39, %v2677_v29  ;;  %v1459_v59 = vsel %vm97_vm0, %v1456_v25, %v1458_v38 }
  0xef   :  { %1671 = vst [vmem:[#allocation7 + $0xd8] sm:$0xff] %v1663_v47  ;;  %v1554_v10 = vadd.f32 %v1546_v15, %v1527_v34  ;;  %v1290_v57 = vmul.f32 %v3401_v11, %v2645_v3  ;;  %v1307_v14 = vmul.f32 %v3432_v36, %v2647_v4  ;;  %v1587_v46 = vrot.slane %v3604_v20, 1 }
  0xf0   :  { %v1426_v9 = vadd.f32 %v1418_v43, %v1399_v48  ;;  %v1358_v50 = vmul.f32 %v3432_v36, %v2649_v5  ;;  %v1436_v0 = vmul.f32 %v3533_v51, %v2651_v6  ;;  %v1510_v27 = vsel %vm150_vm1, %v1507_v60, %v1509_v8 }
  0xf1   :  { %v1605_v61 = vadd.f32 %v1586_v28, %v1554_v10  ;;  %v1638_v25 = vrot.slane %v3608_v58, 2  ;;  %v1331_v49 = vrot.slane %v1307_v14, 1  ;;  %v1419_v22 = vmul.f32 %v3498_v56, %v2662_v13 }
  0xf2   :  { %v1477_v31 = vadd.f32 %v1459_v59, %v1426_v9  ;;  %v1382_v11 = vrot.slane %v1358_v50, 2  ;;  %v1487_v18 = vmul.f32 %v3533_v51, %v2653_v7  ;;  %v1460_v12 = vrot.slane %v1436_v0, 1  ;;  %v3665_v9 = vld [vmem:[#allocation2 + $0x130] sm:$0xff] }
  0xf3   :  { %v1656_v15 = vadd.f32 %v1637_v2, %v1605_v61  ;;  %v1332_v19 = vsel %vm97_vm0, %v1329_v41, %v1331_v49  ;;  %v3635_v60 = vmul.f32 %v3630_v63, %v2679_v30  ;;  %v1588_v16 = vsel %vm97_vm0, %v1585_v33, %v1587_v46 }
  0xf4   :  { %v1528_v53 = vadd.f32 %v1510_v27, %v1477_v31  ;;  %v1349_v21 = vadd.f32 %v1332_v19, %v1290_v57  ;;  %v1383_v32 = vsel %vm150_vm1, %v1380_v44, %v1382_v11  ;;  %v1639_v42 = vsel %vm150_vm1, %v1636_v40, %v1638_v25 }
  0xf5   :  { %v1664_v17 = vadd.f32 %v3241_v1, %v1656_v15  ;;  %v1511_v37 = vrot.slane %v1487_v18, 2  ;;  %v3643_v54 = vmul.f32 %v3172_v62, %v3630_v63  ;;  %v1548_v24 = vmul.f32 %v3599_v55, %v2677_v29 }
  0xf6   :  { %v1555_v41 = vadd.f32 %v1547_v52, %v1528_v53  ;;  %v1400_v45 = vadd.f32 %v1383_v32, %v1349_v21  ;;  %v1308_v33 = vmul.f32 %v3467_v26, %v2647_v4  ;;  %v1461_v44 = vsel %vm97_vm0, %v1458_v38, %v1460_v12 }
  0xf7   :  { %1672 = vst [vmem:[#allocation7 + $0xe0] sm:$0xff] %v1664_v17  ;;  %v1589_v43 = vrot.slane %v3635_v60, 1  ;;  %v1291_v40 = vmul.f32 %v3432_v36, %v2645_v3  ;;  %v1359_v23 = vmul.f32 %v3467_v26, %v2649_v5  ;;  %v1512_v34 = vsel %vm150_vm1, %v1509_v8, %v1511_v37 }
  0xf8   :  { %v1606_v35 = vadd.f32 %v1588_v16, %v1555_v41  ;;  %v1427_v47 = vadd.f32 %v1419_v22, %v1400_v45  ;;  %v1333_v20 = vrot.slane %v1308_v33, 1  ;;  %v1640_v58 = vrot.slane %v3643_v54, 2  ;;  %v3696_v41 = vld [vmem:[#allocation2 + $0x138] sm:$0xff] }
  0xf9   :  { %v1384_v28 = vrot.slane %v1359_v23, 2  ;;  %v1437_v2 = vmul.f32 %v3564_v39, %v2651_v6  ;;  %v1488_v38 = vmul.f32 %v3564_v39, %v2653_v7  ;;  %v1420_v10 = vmul.f32 %v3533_v51, %v2662_v13 }
  0xfa   :  { %v1657_v48 = vadd.f32 %v1639_v42, %v1606_v35  ;;  %v1478_v52 = vadd.f32 %v1461_v44, %v1427_v47  ;;  %v1334_v36 = vsel %vm97_vm0, %v1331_v49, %v1333_v20  ;;  %v3670_v61 = vmul.f32 %v3665_v9, %v2679_v30 }
  0xfb   :  { %v1350_v59 = vadd.f32 %v1334_v36, %v1291_v40  ;;  %v1385_v8 = vsel %vm150_vm1, %v1382_v11, %v1384_v28  ;;  %v1462_v57 = vrot.slane %v1437_v2, 1  ;;  %v1513_v14 = vrot.slane %v1488_v38, 2  ;;  %v3707_v38 = vld [vmem:[#allocation5 + $0x8] ss:$0 sm:$0xff] }
  0xfc   :  { %v1665_v50 = vadd.f32 %v3241_v1, %v1657_v48  ;;  %v1529_v0 = vadd.f32 %v1512_v34, %v1478_v52  ;;  %v3674_v27 = vmul.f32 %v3172_v62, %v3665_v9  ;;  %v1590_v49 = vsel %vm97_vm0, %v1587_v46, %v1589_v43 }
  0xfd   :  { %v1641_v31 = vsel %vm150_vm1, %v1638_v25, %v1640_v58  ;;  %v1401_v11 = vadd.f32 %v1385_v8, %v1350_v59  ;;  %v1549_v22 = vmul.f32 %v3630_v63, %v2677_v29  ;;  %v1463_v15 = vsel %vm97_vm0, %v1460_v12, %v1462_v57 }
  0xfe   :  { %1673 = vst [vmem:[#allocation7 + $0xe8] sm:$0xff] %v1665_v50  ;;  %v1556_v18 = vadd.f32 %v1548_v24, %v1529_v0  ;;  %v1687_v19 = vmul.f32 %v3467_v26, %v2645_v3  ;;  %v1704_v60 = vmul.f32 %v3498_v56, %v2647_v4  ;;  %v1591_v53 = vrot.slane %v3670_v61, 1 }
  0xff   :  { %v1428_v62 = vadd.f32 %v1420_v10, %v1401_v11  ;;  %v1755_v46 = vmul.f32 %v3498_v56, %v2649_v5  ;;  %v1833_v25 = vmul.f32 %v3599_v55, %v2651_v6  ;;  %v1514_v21 = vsel %vm150_vm1, %v1511_v37, %v1513_v14 }
 0x100   :  { %v1607_v16 = vadd.f32 %v1590_v49, %v1556_v18  ;;  %v1642_v12 = vrot.slane %v3674_v27, 2  ;;  %v1722_v32 = vrot.slane %v1704_v60, 1  ;;  %v1816_v42 = vmul.f32 %v3564_v39, %v2662_v13 }
 0x101   :  { %v1479_v17 = vadd.f32 %v1463_v15, %v1428_v62  ;;  %v1773_v26 = vrot.slane %v1755_v46, 2  ;;  %v1884_v54 = vmul.f32 %v3599_v55, %v2653_v7  ;;  %v1851_v33 = vrot.slane %v1833_v25, 1  ;;  %v3733_v62 = vld [vmem:[#allocation2 + $0x140] sm:$0xff] }
 0x102   :  { %v1658_v45 = vadd.f32 %v1641_v31, %v1607_v16  ;;  %v1723_v24 = vsel %vm97_vm0, %v1333_v20, %v1722_v32  ;;  %v3701_v37 = vmul.f32 %v3696_v41, %v2679_v30  ;;  %v1592_v40 = vsel %vm97_vm0, %v1589_v43, %v1591_v53 }
 0x103   :  { %v1530_v44 = vadd.f32 %v1514_v21, %v1479_v17  ;;  %v1746_v23 = vadd.f32 %v1723_v24, %v1687_v19  ;;  %v1774_v35 = vsel %vm150_vm1, %v1384_v28, %v1773_v26  ;;  %v1643_v34 = vsel %vm150_vm1, %v1640_v58, %v1642_v12 }
 0x104   :  { %v1666_v47 = vadd.f32 %v3241_v1, %v1658_v45  ;;  %v1902_v2 = vrot.slane %v1884_v54, 2  ;;  %v3711_v20 = vmul.f32 %v3707_v38, %v3696_v41  ;;  %v1945_v36 = vmul.f32 %v3665_v9, %v2677_v29 }
 0x105   :  { %v1557_v48 = vadd.f32 %v1549_v22, %v1530_v44  ;;  %v1797_v52 = vadd.f32 %v1774_v35, %v1746_v23  ;;  %v1705_v43 = vmul.f32 %v3533_v51, %v2647_v4  ;;  %v1852_v28 = vsel %vm97_vm0, %v1462_v57, %v1851_v33 }
 0x106   :  { %1674 = vst [vmem:[#allocation7 + $0xf0] sm:$0xff] %v1666_v47  ;;  %v1980_v58 = vrot.slane %v3701_v37, 1  ;;  %v1688_v10 = vmul.f32 %v3498_v56, %v2645_v3  ;;  %v1756_v59 = vmul.f32 %v3533_v51, %v2649_v5  ;;  %v1903_v0 = vsel %vm150_vm1, %v1513_v14, %v1902_v2 }
 0x107   :  { %v1608_v8 = vadd.f32 %v1592_v40, %v1557_v48  ;;  %v1824_v50 = vadd.f32 %v1816_v42, %v1797_v52  ;;  %v1724_v61 = vrot.slane %v1705_v43, 1  ;;  %v2031_v27 = vrot.slane %v3711_v20, 2  ;;  %v3764_v48 = vld [vmem:[#allocation2 + $0x148] sm:$0xff] }
 0x108   :  { %v1775_v49 = vrot.slane %v1756_v59, 2  ;;  %v1834_v31 = vmul.f32 %v3630_v63, %v2651_v6  ;;  %v1885_v57 = vmul.f32 %v3630_v63, %v2653_v7  ;;  %v1817_v18 = vmul.f32 %v3599_v55, %v2662_v13 }
 0x109   :  { %v1659_v11 = vadd.f32 %v1643_v34, %v1608_v8  ;;  %v1875_v22 = vadd.f32 %v1852_v28, %v1824_v50  ;;  %v1725_v56 = vsel %vm97_vm0, %v1722_v32, %v1724_v61  ;;  %v3738_v16 = vmul.f32 %v3733_v62, %v2679_v30  ;;  %v3776_v50 = vld [vmem:[%s4205_s2] ss:$0 sm:$0xff]  ;;  %s2612_s2 = smov [#allocation7]  }
 0x10a   :  { %v1747_v15 = vadd.f32 %v1725_v56, %v1688_v10  ;;  %v1776_v14 = vsel %vm150_vm1, %v1773_v26, %v1775_v49  ;;  %v1853_v19 = vrot.slane %v1834_v31, 1  ;;  %v1904_v60 = vrot.slane %v1885_v57, 2  ;;  %s2486_s28 = sshll.u32 %s2612_s2, 4  ;;  %s2487_s28 = int_to_ptr.vmem [resolvable:$true] %s2486_s28 }
 0x10b   :  { %v1667_v46 = vadd.f32 %v3241_v1, %v1659_v11  ;;  %v1926_v25 = vadd.f32 %v1903_v0, %v1875_v22  ;;  %v3742_v21 = vmul.f32 %v3707_v38, %v3733_v62  ;;  %v1981_v32 = vsel %vm97_vm0, %v1591_v53, %v1980_v58 }
 0x10c   :  { %v2032_v17 = vsel %vm150_vm1, %v1642_v12, %v2031_v27  ;;  %v1798_v26 = vadd.f32 %v1776_v14, %v1747_v15  ;;  %v1946_v42 = vmul.f32 %v3696_v41, %v2677_v29  ;;  %v1854_v1 = vsel %vm97_vm0, %v1851_v33, %v1853_v19 }
 0x10d   :  { %1675 = vst [vmem:[#allocation7 + $0xf8] sm:$0xff] %v1667_v46  ;;  %v1953_v54 = vadd.f32 %v1945_v36, %v1926_v25  ;;  %v1689_v45 = vmul.f32 %v3533_v51, %v2645_v3  ;;  %v1706_v24 = vmul.f32 %v3564_v39, %v2647_v4  ;;  %v1982_v44 = vrot.slane %v3738_v16, 1 }
 0x10e   :  { %v1825_v37 = vadd.f32 %v1817_v18, %v1798_v26  ;;  %v1757_v53 = vmul.f32 %v3564_v39, %v2649_v5  ;;  %v1835_v12 = vmul.f32 %v3665_v9, %v2651_v6  ;;  %v1905_v23 = vsel %vm150_vm1, %v1902_v2, %v1904_v60 }
 0x10f   :  { %v2004_v40 = vadd.f32 %v1981_v32, %v1953_v54  ;;  %v2033_v33 = vrot.slane %v3742_v21, 2  ;;  %v1726_v35 = vrot.slane %v1706_v24, 1  ;;  %v1818_v34 = vmul.f32 %v3630_v63, %v2662_v13 }
 0x110   :  { %v1876_v47 = vadd.f32 %v1854_v1, %v1825_v37  ;;  %v1777_v51 = vrot.slane %v1757_v53, 2  ;;  %v1886_v20 = vmul.f32 %v3665_v9, %v2653_v7  ;;  %v1855_v43 = vrot.slane %v1835_v12, 1  ;;  %v3804_v37 = vld [vmem:[#allocation2 + $0x150] sm:$0xff] }
 0x111   :  { %v2055_v52 = vadd.f32 %v2032_v17, %v2004_v40  ;;  %v1727_v36 = vsel %vm97_vm0, %v1724_v61, %v1726_v35  ;;  %v3769_v2 = vmul.f32 %v3764_v48, %v2679_v30  ;;  %v1983_v10 = vsel %vm97_vm0, %v1980_v58, %v1982_v44 }
 0x112   :  { %v1927_v28 = vadd.f32 %v1905_v23, %v1876_v47  ;;  %v1748_v59 = vadd.f32 %v1727_v36, %v1689_v45  ;;  %v1778_v8 = vsel %vm150_vm1, %v1775_v49, %v1777_v51  ;;  %v2034_v61 = vsel %vm150_vm1, %v2031_v27, %v2033_v33 }
 0x113   :  { %v2063_v0 = vadd.f32 %v3776_v50, %v2055_v52  ;;  %v1906_v31 = vrot.slane %v1886_v20, 2  ;;  %v3782_v57 = vmul.f32 %v3707_v38, %v3764_v48  ;;  %v1947_v58 = vmul.f32 %v3733_v62, %v2677_v29 }
 0x114   :  { %v1954_v11 = vadd.f32 %v1946_v42, %v1927_v28  ;;  %v1799_v22 = vadd.f32 %v1778_v8, %v1748_v59  ;;  %v1707_v49 = vmul.f32 %v3599_v55, %v2647_v4  ;;  %v1856_v56 = vsel %vm97_vm0, %v1853_v19, %v1855_v43 }
 0x115   :  { %2071 = vst [vmem:[#allocation7 + $0x100] sm:$0xff] %v2063_v0  ;;  %v1984_v18 = vrot.slane %v3769_v2, 1  ;;  %v1690_v27 = vmul.f32 %v3564_v39, %v2645_v3  ;;  %v1758_v15 = vmul.f32 %v3599_v55, %v2649_v5  ;;  %v1907_v25 = vsel %vm150_vm1, %v1904_v60, %v1906_v31 }
 0x116   :  { %v2005_v14 = vadd.f32 %v1983_v10, %v1954_v11  ;;  %v1826_v46 = vadd.f32 %v1818_v34, %v1799_v22  ;;  %v1728_v16 = vrot.slane %v1707_v49, 1  ;;  %v2035_v21 = vrot.slane %v3782_v57, 2  ;;  %v3835_v22 = vld [vmem:[#allocation2 + $0x158] sm:$0xff] }
 0x117   :  { %v1779_v32 = vrot.slane %v1758_v15, 2  ;;  %v1836_v17 = vmul.f32 %v3696_v41, %v2651_v6  ;;  %v1887_v19 = vmul.f32 %v3696_v41, %v2653_v7  ;;  %v1819_v54 = vmul.f32 %v3665_v9, %v2662_v13 }
 0x118   :  { %v2056_v26 = vadd.f32 %v2034_v61, %v2005_v14  ;;  %v1877_v42 = vadd.f32 %v1856_v56, %v1826_v46  ;;  %v1729_v39 = vsel %vm97_vm0, %v1726_v35, %v1728_v16  ;;  %v3809_v40 = vmul.f32 %v3804_v37, %v2679_v30 }
 0x119   :  { %v1749_v1 = vadd.f32 %v1729_v39, %v1690_v27  ;;  %v1780_v60 = vsel %vm150_vm1, %v1777_v51, %v1779_v32  ;;  %v1857_v45 = vrot.slane %v1836_v17, 1  ;;  %v1908_v24 = vrot.slane %v1887_v19, 2 }
 0x11a   :  { %v2064_v53 = vadd.f32 %v3776_v50, %v2056_v26  ;;  %v1928_v12 = vadd.f32 %v1907_v25, %v1877_v42  ;;  %v3813_v23 = vmul.f32 %v3707_v38, %v3804_v37  ;;  %v1985_v35 = vsel %vm97_vm0, %v1982_v44, %v1984_v18 }
 0x11b   :  { %v2036_v47 = vsel %vm150_vm1, %v2033_v33, %v2035_v21  ;;  %v1800_v51 = vadd.f32 %v1780_v60, %v1749_v1  ;;  %v1948_v34 = vmul.f32 %v3764_v48, %v2677_v29  ;;  %v1858_v52 = vsel %vm97_vm0, %v1855_v43, %v1857_v45 }
 0x11c   :  { %2072 = vst [vmem:[#allocation7 + $0x108] sm:$0xff] %v2064_v53  ;;  %v1955_v20 = vadd.f32 %v1947_v58, %v1928_v12  ;;  %v1691_v36 = vmul.f32 %v3599_v55, %v2645_v3  ;;  %v1708_v2 = vmul.f32 %v3630_v63, %v2647_v4  ;;  %v1986_v10 = vrot.slane %v3809_v40, 1 }
 0x11d   :  { %v1827_v28 = vadd.f32 %v1819_v54, %v1800_v51  ;;  %v1759_v44 = vmul.f32 %v3630_v63, %v2649_v5  ;;  %v1837_v33 = vmul.f32 %v3733_v62, %v2651_v6  ;;  %v1909_v8 = vsel %vm150_vm1, %v1906_v31, %v1908_v24 }
 0x11e   :  { %v2006_v59 = vadd.f32 %v1985_v35, %v1955_v20  ;;  %v2037_v43 = vrot.slane %v3813_v23, 2  ;;  %v1730_v0 = vrot.slane %v1708_v2, 1  ;;  %v1820_v57 = vmul.f32 %v3696_v41, %v2662_v13 }
 0x11f   :  { %v1878_v61 = vadd.f32 %v1858_v52, %v1827_v28  ;;  %v1781_v55 = vrot.slane %v1759_v44, 2  ;;  %v1888_v11 = vmul.f32 %v3733_v62, %v2653_v7  ;;  %v1859_v56 = vrot.slane %v1837_v33, 1  ;;  %v3870_v28 = vld [vmem:[#allocation2 + $0x160] sm:$0xff] }
 0x120   :  { %v2057_v58 = vadd.f32 %v2036_v47, %v2006_v59  ;;  %v1731_v49 = vsel %vm97_vm0, %v1728_v16, %v1730_v0  ;;  %v3840_v31 = vmul.f32 %v3835_v22, %v2679_v30  ;;  %v1987_v15 = vsel %vm97_vm0, %v1984_v18, %v1986_v10 }
 0x121   :  { %v1929_v27 = vadd.f32 %v1909_v8, %v1878_v61  ;;  %v1750_v14 = vadd.f32 %v1731_v49, %v1691_v36  ;;  %v1782_v46 = vsel %vm150_vm1, %v1779_v32, %v1781_v55  ;;  %v2038_v17 = vsel %vm150_vm1, %v2035_v21, %v2037_v43 }
 0x122   :  { %v2065_v25 = vadd.f32 %v3776_v50, %v2057_v58  ;;  %v1910_v19 = vrot.slane %v1888_v11, 2  ;;  %v3848_v26 = vmul.f32 %v3707_v38, %v3835_v22  ;;  %v1949_v39 = vmul.f32 %v3804_v37, %v2677_v29 }
 0x123   :  { %v1956_v16 = vadd.f32 %v1948_v34, %v1929_v27  ;;  %v1801_v42 = vadd.f32 %v1782_v46, %v1750_v14  ;;  %v1709_v18 = vmul.f32 %v3665_v9, %v2647_v4  ;;  %v1860_v32 = vsel %vm97_vm0, %v1857_v45, %v1859_v56 }
 0x124   :  { %2073 = vst [vmem:[#allocation7 + $0x110] sm:$0xff] %v2065_v25  ;;  %v1988_v54 = vrot.slane %v3840_v31, 1  ;;  %v1692_v21 = vmul.f32 %v3630_v63, %v2645_v3  ;;  %v1760_v1 = vmul.f32 %v3665_v9, %v2649_v5  ;;  %v1911_v12 = vsel %vm150_vm1, %v1908_v24, %v1910_v19 }
 0x125   :  { %v2007_v60 = vadd.f32 %v1987_v15, %v1956_v16  ;;  %v1828_v53 = vadd.f32 %v1820_v57, %v1801_v42  ;;  %v1732_v40 = vrot.slane %v1709_v18, 1  ;;  %v2039_v23 = vrot.slane %v3848_v26, 2  ;;  %v3901_v42 = vld [vmem:[#allocation2 + $0x168] sm:$0xff] }
 0x126   :  { %v1783_v35 = vrot.slane %v1760_v1, 2  ;;  %v1838_v47 = vmul.f32 %v3764_v48, %v2651_v6  ;;  %v1889_v45 = vmul.f32 %v3764_v48, %v2653_v7  ;;  %v1821_v20 = vmul.f32 %v3733_v62, %v2662_v13 }
 0x127   :  { %v2058_v51 = vadd.f32 %v2038_v17, %v2007_v60  ;;  %v1879_v34 = vadd.f32 %v1860_v32, %v1828_v53  ;;  %v1733_v63 = vsel %vm97_vm0, %v1730_v0, %v1732_v40  ;;  %v3875_v59 = vmul.f32 %v3870_v28, %v2679_v30 }
 0x128   :  { %v1751_v52 = vadd.f32 %v1733_v63, %v1692_v21  ;;  %v1784_v24 = vsel %vm150_vm1, %v1781_v55, %v1783_v35  ;;  %v1861_v36 = vrot.slane %v1838_v47, 1  ;;  %v1912_v2 = vrot.slane %v1889_v45, 2 }
 0x129   :  { %v2066_v44 = vadd.f32 %v3776_v50, %v2058_v51  ;;  %v1930_v33 = vadd.f32 %v1911_v12, %v1879_v34  ;;  %v3879_v8 = vmul.f32 %v3707_v38, %v3870_v28  ;;  %v1989_v0 = vsel %vm97_vm0, %v1986_v10, %v1988_v54 }
 0x12a   :  { %v2040_v61 = vsel %vm150_vm1, %v2037_v43, %v2039_v23  ;;  %v1802_v55 = vadd.f32 %v1784_v24, %v1751_v52  ;;  %v1950_v57 = vmul.f32 %v3835_v22, %v2677_v29  ;;  %v1862_v58 = vsel %vm97_vm0, %v1859_v56, %v1861_v36 }
 0x12b   :  { %2074 = vst [vmem:[#allocation7 + $0x118] sm:$0xff] %v2066_v44  ;;  %v1957_v11 = vadd.f32 %v1949_v39, %v1930_v33  ;;  %v1693_v49 = vmul.f32 %v3665_v9, %v2645_v3  ;;  %v1710_v31 = vmul.f32 %v3696_v41, %v2647_v4  ;;  %v1990_v15 = vrot.slane %v3875_v59, 1 }
 0x12c   :  { %v1829_v27 = vadd.f32 %v1821_v20, %v1802_v55  ;;  %v1761_v10 = vmul.f32 %v3696_v41, %v2649_v5  ;;  %v1839_v43 = vmul.f32 %v3804_v37, %v2651_v6  ;;  %v1913_v46 = vsel %vm150_vm1, %v1910_v19, %v1912_v2 }
 0x12d   :  { %v2008_v14 = vadd.f32 %v1989_v0, %v1957_v11  ;;  %v2041_v56 = vrot.slane %v3879_v8, 2  ;;  %v1734_v25 = vrot.slane %v1710_v31, 1  ;;  %v1822_v26 = vmul.f32 %v3764_v48, %v2662_v13 }
 0x12e   :  { %v1880_v17 = vadd.f32 %v1862_v58, %v1829_v27  ;;  %v1785_v9 = vrot.slane %v1761_v10, 2  ;;  %v1890_v16 = vmul.f32 %v3804_v37, %v2653_v7  ;;  %v1863_v32 = vrot.slane %v1839_v43, 1  ;;  %v3936_v27 = vld [vmem:[#allocation2 + $0x170] sm:$0xff] }
 0x12f   :  { %v2059_v39 = vadd.f32 %v2040_v61, %v2008_v14  ;;  %v1735_v18 = vsel %vm97_vm0, %v1732_v40, %v1734_v25  ;;  %v3906_v19 = vmul.f32 %v3901_v42, %v2679_v30  ;;  %v1991_v1 = vsel %vm97_vm0, %v1988_v54, %v1990_v15 }
 0x130   :  { %v1931_v21 = vadd.f32 %v1913_v46, %v1880_v17  ;;  %v1752_v60 = vadd.f32 %v1735_v18, %v1693_v49  ;;  %v1786_v53 = vsel %vm150_vm1, %v1783_v35, %v1785_v9  ;;  %v2042_v47 = vsel %vm150_vm1, %v2039_v23, %v2041_v56 }
 0x131   :  { %v2067_v12 = vadd.f32 %v3776_v50, %v2059_v39  ;;  %v1914_v45 = vrot.slane %v1890_v16, 2  ;;  %v3914_v51 = vmul.f32 %v3707_v38, %v3901_v42  ;;  %v1951_v63 = vmul.f32 %v3870_v28, %v2677_v29 }
 0x132   :  { %v1958_v40 = vadd.f32 %v1950_v57, %v1931_v21  ;;  %v1803_v34 = vadd.f32 %v1786_v53, %v1752_v60  ;;  %v1711_v54 = vmul.f32 %v3733_v62, %v2647_v4  ;;  %v1864_v35 = vsel %vm97_vm0, %v1861_v36, %v1863_v32 }
 0x133   :  { %2075 = vst [vmem:[#allocation7 + $0x120] sm:$0xff] %v2067_v12  ;;  %v1992_v20 = vrot.slane %v3906_v19, 1  ;;  %v1694_v23 = vmul.f32 %v3696_v41, %v2645_v3  ;;  %v1762_v52 = vmul.f32 %v3733_v62, %v2649_v5  ;;  %v1915_v33 = vsel %vm150_vm1, %v1912_v2, %v1914_v45 }
 0x134   :  { %v2009_v24 = vadd.f32 %v1991_v1, %v1958_v40  ;;  %v1830_v44 = vadd.f32 %v1822_v26, %v1803_v34  ;;  %v1736_v59 = vrot.slane %v1711_v54, 1  ;;  %v2043_v8 = vrot.slane %v3914_v51, 2  ;;  %v3967_v34 = vld [vmem:[#allocation2 + $0x178] sm:$0xff] }
 0x135   :  { %v1787_v0 = vrot.slane %v1762_v52, 2  ;;  %v1840_v61 = vmul.f32 %v3835_v22, %v2651_v6  ;;  %v1891_v36 = vmul.f32 %v3835_v22, %v2653_v7  ;;  %v1823_v11 = vmul.f32 %v3804_v37, %v2662_v13 }
 0x136   :  { %v2060_v55 = vadd.f32 %v2042_v47, %v2009_v24  ;;  %v1881_v57 = vadd.f32 %v1864_v35, %v1830_v44  ;;  %v1737_v41 = vsel %vm97_vm0, %v1734_v25, %v1736_v59  ;;  %v3941_v14 = vmul.f32 %v3936_v27, %v2679_v30 }
 0x137   :  { %v1753_v58 = vadd.f32 %v1737_v41, %v1694_v23  ;;  %v1788_v2 = vsel %vm150_vm1, %v1785_v9, %v1787_v0  ;;  %v1865_v49 = vrot.slane %v1840_v61, 1  ;;  %v1916_v31 = vrot.slane %v1891_v36, 2 }
 0x138   :  { %v2068_v10 = vadd.f32 %v3776_v50, %v2060_v55  ;;  %v1932_v43 = vadd.f32 %v1915_v33, %v1881_v57  ;;  %v3945_v46 = vmul.f32 %v3707_v38, %v3936_v27  ;;  %v1993_v25 = vsel %vm97_vm0, %v1990_v15, %v1992_v20 }
 0x139   :  { %v2044_v17 = vsel %vm150_vm1, %v2041_v56, %v2043_v8  ;;  %v1804_v9 = vadd.f32 %v1788_v2, %v1753_v58  ;;  %v1952_v26 = vmul.f32 %v3901_v42, %v2677_v29  ;;  %v1866_v39 = vsel %vm97_vm0, %v1863_v32, %v1865_v49 }
 0x13a   :  { %2076 = vst [vmem:[#allocation7 + $0x128] sm:$0xff] %v2068_v10  ;;  %v1959_v16 = vadd.f32 %v1951_v63, %v1932_v43  ;;  %v2090_v18 = vmul.f32 %v3733_v62, %v2645_v3  ;;  %v2107_v19 = vmul.f32 %v3764_v48, %v2647_v4  ;;  %v1994_v1 = vrot.slane %v3941_v14, 1 }
 0x13b   :  { %v1831_v21 = vadd.f32 %v1823_v11, %v1804_v9  ;;  %v2158_v15 = vmul.f32 %v3764_v48, %v2649_v5  ;;  %v2236_v56 = vmul.f32 %v3870_v28, %v2651_v6  ;;  %v1917_v53 = vsel %vm150_vm1, %v1914_v45, %v1916_v31 }
 0x13c   :  { %v2010_v60 = vadd.f32 %v1993_v25, %v1959_v16  ;;  %v2045_v32 = vrot.slane %v3945_v46, 2  ;;  %v2125_v12 = vrot.slane %v2107_v19, 1  ;;  %v2219_v51 = vmul.f32 %v3835_v22, %v2662_v13 }
 0x13d   :  { %v1882_v47 = vadd.f32 %v1866_v39, %v1831_v21  ;;  %v2176_v62 = vrot.slane %v2158_v15, 2  ;;  %v2287_v40 = vmul.f32 %v3870_v28, %v2653_v7  ;;  %v2254_v35 = vrot.slane %v2236_v56, 1  ;;  %v4002_v21 = vld [vmem:[#allocation2 + $0x180] sm:$0xff] }
 0x13e   :  { %v2061_v63 = vadd.f32 %v2044_v17, %v2010_v60  ;;  %v2126_v54 = vsel %vm97_vm0, %v1736_v59, %v2125_v12  ;;  %v3972_v45 = vmul.f32 %v3967_v34, %v2679_v30  ;;  %v1995_v52 = vsel %vm97_vm0, %v1992_v20, %v1994_v1 }
 0x13f   :  { %v1933_v23 = vadd.f32 %v1917_v53, %v1882_v47  ;;  %v2149_v24 = vadd.f32 %v2126_v54, %v2090_v18  ;;  %v2177_v44 = vsel %vm150_vm1, %v1787_v0, %v2176_v62  ;;  %v2046_v61 = vsel %vm150_vm1, %v2043_v8, %v2045_v32 }
 0x140   :  { %v2069_v33 = vadd.f32 %v3776_v50, %v2061_v63  ;;  %v2305_v36 = vrot.slane %v2287_v40, 2  ;;  %v3980_v55 = vmul.f32 %v3707_v38, %v3967_v34  ;;  %v2348_v41 = vmul.f32 %v3936_v27, %v2677_v29 }
 0x141   :  { %v1960_v59 = vadd.f32 %v1952_v26, %v1933_v23  ;;  %v2200_v57 = vadd.f32 %v2177_v44, %v2149_v24  ;;  %v2108_v20 = vmul.f32 %v3804_v37, %v2647_v4  ;;  %v2255_v0 = vsel %vm97_vm0, %v1865_v49, %v2254_v35 }
 0x142   :  { %2077 = vst [vmem:[#allocation7 + $0x130] sm:$0xff] %v2069_v33  ;;  %v2383_v11 = vrot.slane %v3972_v45, 1  ;;  %v2091_v8 = vmul.f32 %v3764_v48, %v2645_v3  ;;  %v2159_v58 = vmul.f32 %v3804_v37, %v2649_v5  ;;  %v2306_v43 = vsel %vm150_vm1, %v1916_v31, %v2305_v36 }
 0x143   :  { %v2011_v2 = vadd.f32 %v1995_v52, %v1960_v59  ;;  %v2227_v10 = vadd.f32 %v2219_v51, %v2200_v57  ;;  %v2127_v14 = vrot.slane %v2108_v20, 1  ;;  %v2434_v46 = vrot.slane %v3980_v55, 2  ;;  %v4033_v57 = vld [vmem:[#allocation2 + $0x188] sm:$0xff] }
 0x144   :  { %v2178_v25 = vrot.slane %v2159_v58, 2  ;;  %v2237_v17 = vmul.f32 %v3901_v42, %v2651_v6  ;;  %v2288_v49 = vmul.f32 %v3901_v42, %v2653_v7  ;;  %v2220_v16 = vmul.f32 %v3870_v28, %v2662_v13 }
 0x145   :  { %v2062_v9 = vadd.f32 %v2046_v61, %v2011_v2  ;;  %v2278_v26 = vadd.f32 %v2255_v0, %v2227_v10  ;;  %v2128_v48 = vsel %vm97_vm0, %v2125_v12, %v2127_v14  ;;  %v4007_v60 = vmul.f32 %v4002_v21, %v2679_v30 }
 0x146   :  { %v2150_v39 = vadd.f32 %v2128_v48, %v2091_v8  ;;  %v2179_v31 = vsel %vm150_vm1, %v2176_v62, %v2178_v25  ;;  %v2256_v18 = vrot.slane %v2237_v17, 1  ;;  %v2307_v19 = vrot.slane %v2288_v49, 2 }
 0x147   :  { %v2070_v15 = vadd.f32 %v3776_v50, %v2062_v9  ;;  %v2329_v56 = vadd.f32 %v2306_v43, %v2278_v26  ;;  %v4011_v53 = vmul.f32 %v3707_v38, %v4002_v21  ;;  %v2384_v12 = vsel %vm97_vm0, %v1994_v1, %v2383_v11 }
 0x148   :  { %v2435_v47 = vsel %vm150_vm1, %v2045_v32, %v2434_v46  ;;  %v2201_v62 = vadd.f32 %v2179_v31, %v2150_v39  ;;  %v2349_v51 = vmul.f32 %v3967_v34, %v2677_v29  ;;  %v2257_v63 = vsel %vm97_vm0, %v2254_v35, %v2256_v18 }
 0x149   :  { %2078 = vst [vmem:[#allocation7 + $0x138] sm:$0xff] %v2070_v15  ;;  %v2356_v40 = vadd.f32 %v2348_v41, %v2329_v56  ;;  %v2092_v54 = vmul.f32 %v3804_v37, %v2645_v3  ;;  %v2109_v45 = vmul.f32 %v3835_v22, %v2647_v4  ;;  %v2385_v52 = vrot.slane %v4007_v60, 1 }
 0x14a   :  { %v2228_v23 = vadd.f32 %v2220_v16, %v2201_v62  ;;  %v2160_v1 = vmul.f32 %v3835_v22, %v2649_v5  ;;  %v2238_v32 = vmul.f32 %v3936_v27, %v2651_v6  ;;  %v2308_v44 = vsel %vm150_vm1, %v2305_v36, %v2307_v19 }
 0x14b   :  { %v2407_v24 = vadd.f32 %v2384_v12, %v2356_v40  ;;  %v2436_v35 = vrot.slane %v4011_v53, 2  ;;  %v2129_v33 = vrot.slane %v2109_v45, 1  ;;  %v2221_v55 = vmul.f32 %v3901_v42, %v2662_v13 }
 0x14c   :  { %v2279_v61 = vadd.f32 %v2257_v63, %v2228_v23  ;;  %v2180_v37 = vrot.slane %v2160_v1, 2  ;;  %v2289_v59 = vmul.f32 %v3936_v27, %v2653_v7  ;;  %v2258_v0 = vrot.slane %v2238_v32, 1  ;;  %v4068_v23 = vld [vmem:[#allocation2 + $0x190] sm:$0xff] }
 0x14d   :  { %v2458_v41 = vadd.f32 %v2435_v47, %v2407_v24  ;;  %v2130_v20 = vsel %vm97_vm0, %v2127_v14, %v2129_v33  ;;  %v4038_v36 = vmul.f32 %v4033_v57, %v2679_v30  ;;  %v2386_v58 = vsel %vm97_vm0, %v2383_v11, %v2385_v52 }
 0x14e   :  { %v2330_v8 = vadd.f32 %v2308_v44, %v2279_v61  ;;  %v2151_v2 = vadd.f32 %v2130_v20, %v2092_v54  ;;  %v2181_v10 = vsel %vm150_vm1, %v2178_v25, %v2180_v37  ;;  %v2437_v17 = vsel %vm150_vm1, %v2434_v46, %v2436_v35 }
 0x14f   :  { %v2466_v43 = vadd.f32 %v3776_v50, %v2458_v41  ;;  %v2309_v49 = vrot.slane %v2289_v59, 2  ;;  %v4046_v9 = vmul.f32 %v3707_v38, %v4033_v57  ;;  %v2350_v48 = vmul.f32 %v4002_v21, %v2677_v29 }
 0x150   :  { %v2357_v14 = vadd.f32 %v2349_v51, %v2330_v8  ;;  %v2202_v26 = vadd.f32 %v2181_v10, %v2151_v2  ;;  %v2110_v11 = vmul.f32 %v3870_v28, %v2647_v4  ;;  %v2259_v25 = vsel %vm97_vm0, %v2256_v18, %v2258_v0 }
 0x151   :  { %2474 = vst [vmem:[#allocation7 + $0x140] sm:$0xff] %v2466_v43  ;;  %v2387_v16 = vrot.slane %v4038_v36, 1  ;;  %v2093_v46 = vmul.f32 %v3835_v22, %v2645_v3  ;;  %v2161_v39 = vmul.f32 %v3870_v28, %v2649_v5  ;;  %v2310_v56 = vsel %vm150_vm1, %v2307_v19, %v2309_v49 }
 0x152   :  { %v2408_v31 = vadd.f32 %v2386_v58, %v2357_v14  ;;  %v2229_v15 = vadd.f32 %v2221_v55, %v2202_v26  ;;  %v2131_v60 = vrot.slane %v2110_v11, 1  ;;  %v2438_v53 = vrot.slane %v4046_v9, 2  ;;  %v4099_v26 = vld [vmem:[#allocation2 + $0x198] sm:$0xff] }
 0x153   :  { %v2182_v12 = vrot.slane %v2161_v39, 2  ;;  %v2239_v47 = vmul.f32 %v3967_v34, %v2651_v6  ;;  %v2290_v18 = vmul.f32 %v3967_v34, %v2653_v7  ;;  %v2222_v40 = vmul.f32 %v3936_v27, %v2662_v13 }
 0x154   :  { %v2459_v62 = vadd.f32 %v2437_v17, %v2408_v31  ;;  %v2280_v51 = vadd.f32 %v2259_v25, %v2229_v15  ;;  %v2132_v22 = vsel %vm97_vm0, %v2129_v33, %v2131_v60  ;;  %v4073_v24 = vmul.f32 %v4068_v23, %v2679_v30 }
 0x155   :  { %v2152_v63 = vadd.f32 %v2132_v22, %v2093_v46  ;;  %v2183_v19 = vsel %vm150_vm1, %v2180_v37, %v2182_v12  ;;  %v2260_v54 = vrot.slane %v2239_v47, 1  ;;  %v2311_v45 = vrot.slane %v2290_v18, 2 }
 0x156   :  { %v2467_v1 = vadd.f32 %v3776_v50, %v2459_v62  ;;  %v2331_v32 = vadd.f32 %v2310_v56, %v2280_v51  ;;  %v4077_v44 = vmul.f32 %v3707_v38, %v4068_v23  ;;  %v2388_v33 = vsel %vm97_vm0, %v2385_v52, %v2387_v16 }
 0x157   :  { %v2439_v61 = vsel %vm150_vm1, %v2436_v35, %v2438_v53  ;;  %v2203_v37 = vadd.f32 %v2183_v19, %v2152_v63  ;;  %v2351_v55 = vmul.f32 %v4033_v57, %v2677_v29  ;;  %v2261_v41 = vsel %vm97_vm0, %v2258_v0, %v2260_v54 }
 0x158   :  { %2475 = vst [vmem:[#allocation7 + $0x148] sm:$0xff] %v2467_v1  ;;  %v2358_v59 = vadd.f32 %v2350_v48, %v2331_v32  ;;  %v2094_v20 = vmul.f32 %v3870_v28, %v2645_v3  ;;  %v2111_v36 = vmul.f32 %v3901_v42, %v2647_v4  ;;  %v2389_v58 = vrot.slane %v4073_v24, 1 }
 0x159   :  { %v2230_v8 = vadd.f32 %v2222_v40, %v2203_v37  ;;  %v2162_v52 = vmul.f32 %v3901_v42, %v2649_v5  ;;  %v2240_v35 = vmul.f32 %v4002_v21, %v2651_v6  ;;  %v2312_v10 = vsel %vm150_vm1, %v2309_v49, %v2311_v45  ;;  %v2345_v37 = vld [vmem:[#allocation2 + $0x1a0] sm:$0xff] }
 0x15a   :  { %v2409_v2 = vadd.f32 %v2388_v33, %v2358_v59  ;;  %v2440_v0 = vrot.slane %v4077_v44, 2  ;;  %v2133_v43 = vrot.slane %v2111_v36, 1  ;;  %v2223_v9 = vmul.f32 %v3967_v34, %v2662_v13 }
 0x15b   :  { %v2281_v17 = vadd.f32 %v2261_v41, %v2230_v8  ;;  %v2184_v28 = vrot.slane %v2162_v52, 2  ;;  %v2291_v14 = vmul.f32 %v4002_v21, %v2653_v7  ;;  %v2262_v25 = vrot.slane %v2240_v35, 1 }
 0x15c   :  { %v2460_v48 = vadd.f32 %v2439_v61, %v2409_v2  ;;  %v2134_v11 = vsel %vm97_vm0, %v2131_v60, %v2133_v43  ;;  %v4104_v49 = vmul.f32 %v4099_v26, %v2679_v30  ;;  %v2390_v39 = vsel %vm97_vm0, %v2387_v16, %v2389_v58 }
 0x15d   :  { %v2332_v46 = vadd.f32 %v2312_v10, %v2281_v17  ;;  %v2153_v31 = vadd.f32 %v2134_v11, %v2094_v20  ;;  %v2185_v15 = vsel %vm150_vm1, %v2182_v12, %v2184_v28  ;;  %v2441_v47 = vsel %vm150_vm1, %v2438_v53, %v2440_v0 }
 0x15e   :  { %v2468_v56 = vadd.f32 %v3776_v50, %v2460_v48  ;;  %v2313_v18 = vrot.slane %v2291_v14, 2  ;;  %v4112_v62 = vmul.f32 %v3707_v38, %v4099_v26  ;;  %v2352_v22 = vmul.f32 %v4068_v23, %v2677_v29 }
 0x15f   :  { %v2359_v60 = vadd.f32 %v2351_v55, %v2332_v46  ;;  %v2204_v51 = vadd.f32 %v2185_v15, %v2153_v31  ;;  %v2112_v16 = vmul.f32 %v3936_v27, %v2647_v4  ;;  %v2263_v12 = vsel %vm97_vm0, %v2260_v54, %v2262_v25 }
 0x160   :  { %2476 = vst [vmem:[#allocation7 + $0x150] sm:$0xff] %v2468_v56  ;;  %v2391_v40 = vrot.slane %v4104_v49, 1  ;;  %v2095_v53 = vmul.f32 %v3901_v42, %v2645_v3  ;;  %v2163_v63 = vmul.f32 %v3936_v27, %v2649_v5  ;;  %v2314_v32 = vsel %vm150_vm1, %v2311_v45, %v2313_v18  ;;  %v2346_v56 = vld [vmem:[#allocation2 + $0x1a8] sm:$0xff] }
 0x161   :  { %v2410_v19 = vadd.f32 %v2390_v39, %v2359_v60  ;;  %v2231_v1 = vadd.f32 %v2223_v9, %v2204_v51  ;;  %v2135_v24 = vrot.slane %v2112_v16, 1  ;;  %v2442_v44 = vrot.slane %v4112_v62, 2 }
 0x162   :  { %v2186_v33 = vrot.slane %v2163_v63, 2  ;;  %v2241_v61 = vmul.f32 %v4033_v57, %v2651_v6  ;;  %v2292_v54 = vmul.f32 %v4033_v57, %v2653_v7  ;;  %v2224_v41 = vmul.f32 %v4002_v21, %v2662_v13 }
 0x163   :  { %v2461_v55 = vadd.f32 %v2441_v47, %v2410_v19  ;;  %v2282_v42 = vadd.f32 %v2263_v12, %v2231_v1  ;;  %v2136_v59 = vsel %vm97_vm0, %v2133_v43, %v2135_v24  ;;  %v4136_v2 = vmul.f32 %v2345_v37, %v2679_v30 }
 0x164   :  { %v2154_v20 = vadd.f32 %v2136_v59, %v2095_v53  ;;  %v2187_v45 = vsel %vm150_vm1, %v2184_v28, %v2186_v33  ;;  %v2264_v36 = vrot.slane %v2241_v61, 1  ;;  %v2315_v8 = vrot.slane %v2292_v54, 2 }
 0x165   :  { %v2469_v52 = vadd.f32 %v3776_v50, %v2461_v55  ;;  %v2333_v35 = vadd.f32 %v2314_v32, %v2282_v42  ;;  %v4139_v10 = vmul.f32 %v3707_v38, %v2345_v37  ;;  %v2392_v17 = vsel %vm97_vm0, %v2389_v58, %v2391_v40 }
 0x166   :  { %v2443_v43 = vsel %vm150_vm1, %v2440_v0, %v2442_v44  ;;  %v2205_v9 = vadd.f32 %v2187_v45, %v2154_v20  ;;  %v2265_v28 = vsel %vm97_vm0, %v2262_v25, %v2264_v36  ;;  %v2316_v48 = vsel %vm150_vm1, %v2313_v18, %v2315_v8 }
 0x167   :  { %2477 = vst [vmem:[#allocation7 + $0x158] sm:$0xff] %v2469_v52  ;;  %v2360_v14 = vadd.f32 %v2352_v22, %v2333_v35  ;;  %v2113_v11 = vmul.f32 %v3967_v34, %v2647_v4  ;;  %v2096_v46 = vmul.f32 %v3936_v27, %v2645_v3  ;;  %v2164_v39 = vmul.f32 %v3967_v34, %v2649_v5 }
 0x168   :  { %v2232_v49 = vadd.f32 %v2224_v41, %v2205_v9  ;;  %v2242_v58 = vmul.f32 %v4068_v23, %v2651_v6  ;;  %v2393_v31 = vrot.slane %v4136_v2, 1  ;;  %v2444_v25 = vrot.slane %v4139_v10, 2 }
 0x169   :  { %v2411_v0 = vadd.f32 %v2392_v17, %v2360_v14  ;;  %v2137_v15 = vrot.slane %v2113_v11, 1  ;;  %v2353_v18 = vmul.f32 %v4099_v26, %v2677_v29  ;;  %v2188_v62 = vrot.slane %v2164_v39, 2 }
 0x16a   :  { %v2283_v47 = vadd.f32 %v2265_v28, %v2232_v49  ;;  %v2293_v27 = vmul.f32 %v4068_v23, %v2653_v7  ;;  %v2225_v22 = vmul.f32 %v4033_v57, %v2662_v13  ;;  %v2266_v16 = vrot.slane %v2242_v58, 1 }
 0x16b   :  { %v2462_v60 = vadd.f32 %v2443_v43, %v2411_v0  ;;  %v2138_v51 = vsel %vm97_vm0, %v2135_v24, %v2137_v15  ;;  %v2189_v63 = vsel %vm150_vm1, %v2186_v33, %v2188_v62  ;;  %v2371_v19 = vmul.f32 %v2346_v56, %v2679_v30 }
 0x16c   :  { %v2334_v12 = vadd.f32 %v2316_v48, %v2283_v47  ;;  %v2155_v53 = vadd.f32 %v2138_v51, %v2096_v46  ;;  %v2394_v32 = vsel %vm97_vm0, %v2391_v40, %v2393_v31  ;;  %v2445_v61 = vsel %vm150_vm1, %v2442_v44, %v2444_v25 }
 0x16d   :  { %v2470_v1 = vadd.f32 %v3776_v50, %v2462_v60  ;;  %v2317_v54 = vrot.slane %v2293_v27, 2  ;;  %v2422_v24 = vmul.f32 %v3707_v38, %v2346_v56  ;;  %v2114_v57 = vmul.f32 %v4002_v21, %v2647_v4 }
 0x16e   :  { %v2361_v55 = vadd.f32 %v2353_v18, %v2334_v12  ;;  %v2206_v42 = vadd.f32 %v2189_v63, %v2155_v53  ;;  %v2267_v59 = vsel %vm97_vm0, %v2264_v36, %v2266_v16  ;;  %v2354_v33 = vmul.f32 %v2345_v37, %v2677_v29  ;;  %v2347_v37 = vld [vmem:[#allocation2 + $0x1b0] sm:$0xff] }
 0x16f   :  { %2478 = vst [vmem:[#allocation7 + $0x160] sm:$0xff] %v2470_v1  ;;  %v2097_v41 = vmul.f32 %v3967_v34, %v2645_v3  ;;  %v2165_v40 = vmul.f32 %v4002_v21, %v2649_v5  ;;  %v2395_v45 = vrot.slane %v2371_v19, 1  ;;  %v2139_v52 = vrot.slane %v2114_v57, 1 }
 0x170   :  { %v2412_v44 = vadd.f32 %v2394_v32, %v2361_v55  ;;  %v2233_v20 = vadd.f32 %v2225_v22, %v2206_v42  ;;  %v2318_v35 = vsel %vm150_vm1, %v2315_v8, %v2317_v54  ;;  %v2243_v4 = vmul.f32 %v4099_v26, %v2651_v6 }
 0x171   :  { %v2190_v2 = vrot.slane %v2165_v40, 2  ;;  %v2294_v36 = vmul.f32 %v4099_v26, %v2653_v7  ;;  %v2446_v3 = vrot.slane %v2422_v24, 2  ;;  %v2140_v34 = vsel %vm97_vm0, %v2137_v15, %v2139_v52 }
 0x172   :  { %v2463_v10 = vadd.f32 %v2445_v61, %v2412_v44  ;;  %v2284_v17 = vadd.f32 %v2267_v59, %v2233_v20  ;;  %v2156_v5 = vadd.f32 %v2140_v34, %v2097_v41  ;;  %v2226_v43 = vmul.f32 %v4068_v23, %v2662_v13 }
 0x173   :  { %v2191_v21 = vsel %vm150_vm1, %v2188_v62, %v2190_v2  ;;  %v2268_v8 = vrot.slane %v2243_v4, 1  ;;  %v2319_v6 = vrot.slane %v2294_v36, 2  ;;  %v2372_v28 = vmul.f32 %v2347_v37, %v2679_v30 }
 0x174   :  { %v2471_v9 = vadd.f32 %v3776_v50, %v2463_v10  ;;  %v2335_v14 = vadd.f32 %v2318_v35, %v2284_v17  ;;  %v2396_v7 = vsel %vm97_vm0, %v2393_v31, %v2395_v45  ;;  %v2207_v26 = vadd.f32 %v2191_v21, %v2156_v5 }
 0x175   :  { %v2269_v11 = vsel %vm97_vm0, %v2266_v16, %v2268_v8  ;;  %v2423_v49 = vmul.f32 %v3707_v38, %v2347_v37  ;;  %v2447_v46 = vsel %vm150_vm1, %v2444_v25, %v2446_v3  ;;  %v2320_v23 = vsel %vm150_vm1, %v2317_v54, %v2319_v6 }
 0x176   :  { %2479 = vst [vmem:[#allocation7 + $0x168] sm:$0xff] %v2471_v9  ;;  %v2362_v48 = vadd.f32 %v2354_v33, %v2335_v14  ;;  %v2234_v39 = vadd.f32 %v2226_v43, %v2207_v26  ;;  %v2397_v58 = vrot.slane %v2372_v28, 1  ;;  %v2355_v15 = vmul.f32 %v2346_v56, %v2677_v29 }
 0x177   :  { %v2448_v47 = vrot.slane %v2423_v49, 2 }
 0x178   :  { %v2413_v13 = vadd.f32 %v2396_v7, %v2362_v48  ;;  %v2285_v0 = vadd.f32 %v2269_v11, %v2234_v39  ;;  %v2398_v62 = vsel %vm97_vm0, %v2395_v45, %v2397_v58 }
 0x179   :  { %v2449_v38 = vsel %vm150_vm1, %v2446_v3, %v2448_v47 }
 0x17a   :  { %v2464_v30 = vadd.f32 %v2447_v46, %v2413_v13  ;;  %v2336_v31 = vadd.f32 %v2320_v23, %v2285_v0 }
 0x17c   :  { %v2472_v18 = vadd.f32 %v3776_v50, %v2464_v30  ;;  %v2363_v27 = vadd.f32 %v2355_v15, %v2336_v31 }
 0x17e   :  { %2480 = vst [vmem:[#allocation7 + $0x170] sm:$0xff] %v2472_v18  ;;  %v2414_v25 = vadd.f32 %v2398_v62, %v2363_v27 }
 0x180   :  { %v2465_v60 = vadd.f32 %v2449_v38, %v2414_v25 }
 0x182   :  { %v2473_v29 = vadd.f32 %v3776_v50, %v2465_v60 }
 0x184   :  { %2481 = vst [vmem:[#allocation7 + $0x178] sm:$0xff] %v2473_v29 }
 0x185   :  { %2494 = dma.vmem_to_hbm [thread:$0]  %s2487_s28, 6144, %s2489_s4, [#allocation4], %s2609_s20, %s2609_s20, %s2610_s21  }
 0x186   :  { %2606 = dma.done.wait [#allocation4], 6144  }
 0x187   :  { %2607 = vsyncadd [#allocation4], 4294961152 }
 0x188   :  { %2499 = vsyncpa [#allocation3], 1 }
 0x189   :  { %2500 = vsyncpa [#allocation6], 1 }
 0x18a   :  { %2501 = vsyncpa [#allocation4], 1 }

</bundles_post_ra>
